<compile_context>
chip_gen: v7x
topology: tpu7x:2x2x1
jax: 0.10.0
libtpu: 0.0.40
codegen_flags: <defaults>
</compile_context>

<pallas_src>
import functools

import jax
import jax.numpy as jnp
from jax.experimental import pallas as pl
from jax.experimental.pallas import tpu as pltpu

EPS = 1e-5  # PyTorch GroupNorm default eps


def linear_attention_kernel(x_ref, wqkv_ref, wout_ref, mask_ref, affine_ref,
                            o_ref, *, batch, heads, dim_head, seq):
    hid = heads * dim_head
    n = seq
    c = x_ref.shape[0]

    x = x_ref[...]                       # (C, B*N) bf16
    w_qkv = wqkv_ref[...]                # (C, 3*hid) bf16  (lane-dense)

    # --- to_qkv: 1x1 conv (no bias), single MXU pass, contract over C -------
    qkv = jax.lax.dot_general(
        w_qkv, x, dimension_numbers=(((0,), (0,)), ((), ())),
        preferred_element_type=jnp.float32)          # (3*hid, B*N) f32

    q = qkv[0:hid]                        # (hid, B*N)
    k = qkv[hid:2 * hid]                  # (hid, B*N)
    v = qkv[2 * hid:3 * hid]              # (hid, B*N)

    # --- q softmax over the per-head channel axis (torch dim=-2).  Position
    #     independent -> done once across both batches.  Divide replaced by
    #     approx reciprocal (EUP). ------------------------------------------
    qh = q.reshape(heads, dim_head, batch * n)
    qe = jnp.exp(qh - jnp.max(qh, axis=1, keepdims=True))
    q_soft = (qe * pl.reciprocal(jnp.sum(qe, axis=1, keepdims=True),
                                 approx=True)).reshape(hid, batch * n)
    q_bf = q_soft.astype(jnp.bfloat16)

    mask = mask_ref[...]                  # (hid, hid) bf16 block-diag 0/1
    w_out = wout_ref[...]                 # (C, hid) bf16, pre-scaled by scale
    aff = affine_ref[...]                 # (3*C, 1) f32
    bias, gamma, beta = aff[0:c], aff[c:2 * c], aff[2 * c:3 * c]

    inv_cnt = 1.0 / (c * n)

    # Per-batch part (k softmax / context / tail / GroupNorm must not mix
    # batches).  B is tiny and static: unrolled Python loop -> both chains sit
    # in one basic block and interleave.
    for b in range(batch):
        lo, hi = b * n, (b + 1) * n

        # k softmax over spatial positions (torch dim=-1), strictly per batch.
        kb = k[:, lo:hi]                                       # (hid, N) f32
        ke = jnp.exp(kb - jnp.max(kb, axis=-1, keepdims=True))
        k_soft = ke * pl.reciprocal(jnp.sum(ke, axis=-1, keepdims=True),
                                    approx=True)

        # context[e, d] = sum_n v[e, n] * k[d, n]  for all 4 heads in one MXU
        # op (trans_b dot_general, no explicit transpose), then masked to the
        # per-head diagonal 32x32 blocks with one cast + one vmul.
        ctx = jax.lax.dot_general(
            v[:, lo:hi].astype(jnp.bfloat16), k_soft.astype(jnp.bfloat16),
            dimension_numbers=(((1,), (1,)), ((), ())),
            preferred_element_type=jnp.float32)                # (hid, hid)
        ctx_m = ctx.astype(jnp.bfloat16) * mask

        # Reassociated tail: y = ((wout*scale) @ ctx_m) @ q
        w2 = jnp.dot(w_out, ctx_m,
                     preferred_element_type=jnp.float32)       # (C, hid)
        y = jnp.dot(w2.astype(jnp.bfloat16), q_bf[:, lo:hi],
                    preferred_element_type=jnp.float32)        # (C, N)
        y = y + bias

        # GroupNorm(1, dim): two-pass stats over the (C, N) slab of this
        # batch element (biased variance, like torch).
        mu = jnp.sum(y) * inv_cnt
        yc = y - mu
        var = jnp.sum(yc * yc) * inv_cnt
        o_ref[:, lo:hi] = yc * jax.lax.rsqrt(var + EPS) * gamma + beta


def linear_attention(x, wqkv, wout, bout, gamma, beta, *, heads, dim_head):
    b, c, h, w = x.shape
    n = h * w
    hid = heads * dim_head
    scale = dim_head ** (-0.5)

    # Layout plumbing in XLA (outside the kernel): channels on sublanes,
    # all B*N positions lane-dense on the last axis.
    x2 = x.reshape(b, c, n).transpose(1, 0, 2).reshape(c, b * n)
    x_bf = x2.astype(jnp.bfloat16)
    wqkv_t = jnp.transpose(wqkv).astype(jnp.bfloat16)       # (C, 3*hid)
    wout_s = (wout * scale).astype(jnp.bfloat16)            # fold q scale
    head_id = jnp.arange(hid, dtype=jnp.int32) // dim_head
    mask = (head_id[:, None] == head_id[None, :]).astype(jnp.bfloat16)
    affine = jnp.concatenate(
        [bout.reshape(c, 1), gamma.reshape(c, 1), beta.reshape(c, 1)],
        axis=0).astype(jnp.float32)

    kernel = functools.partial(linear_attention_kernel, batch=b, heads=heads,
                               dim_head=dim_head, seq=n)

    out = pl.pallas_call(
        kernel,
        out_shape=jax.ShapeDtypeStruct((c, b * n), jnp.float32),
        grid_spec=pltpu.PrefetchScalarGridSpec(
            num_scalar_prefetch=0,
            grid=(1,),  # single step: batch folded in, per-step overhead paid once
            in_specs=[
                pl.BlockSpec((c, b * n), lambda i: (0, 0)),      # x (bf16)
                pl.BlockSpec((c, 3 * hid), lambda i: (0, 0)),    # Wqkv^T (bf16)
                pl.BlockSpec((c, hid), lambda i: (0, 0)),        # Wout*scale (bf16)
                pl.BlockSpec((hid, hid), lambda i: (0, 0)),      # head mask (bf16)
                pl.BlockSpec((3 * c, 1), lambda i: (0, 0)),      # [b; gamma; beta]
            ],
            out_specs=pl.BlockSpec((c, b * n), lambda i: (0, 0)),
        ),
        compiler_params=pltpu.CompilerParams(
            dimension_semantics=("arbitrary",)),
    )(x_bf, wqkv_t, wout_s, mask, affine)

    return out.reshape(c, b, n).transpose(1, 0, 2).reshape(b, c, h, w)


def linear_attention_ref(x, wqkv, wout, bout, gamma, beta, *, heads, dim_head):
    """Pure-JAX f32 reference mirroring the PyTorch forward."""
    hi = jax.lax.Precision.HIGHEST
    b, c, h, w = x.shape
    n = h * w
    hid = heads * dim_head
    scale = dim_head ** (-0.5)
    x2 = x.reshape(b, c, n)
    qkv = jnp.einsum('oc,bcn->bon', wqkv, x2, precision=hi)
    q, k, v = jnp.split(qkv, 3, axis=1)
    q, k, v = (t.reshape(b, heads, dim_head, n) for t in (q, k, v))
    q = jax.nn.softmax(q, axis=2) * scale
    k = jax.nn.softmax(k, axis=3)
    context = jnp.einsum('bhdn,bhen->bhde', k, v, precision=hi)
    out = jnp.einsum('bhde,bhdn->bhen', context, q, precision=hi)
    out = out.reshape(b, hid, n)
    y = jnp.einsum('oc,bcn->bon', wout, out, precision=hi) + bout.reshape(1, c, 1)
    mu = y.mean(axis=(1, 2), keepdims=True)
    var = jnp.square(y - mu).mean(axis=(1, 2), keepdims=True)
    yn = (y - mu) / jnp.sqrt(var + EPS)
    yn = yn * gamma.reshape(1, c, 1) + beta.reshape(1, c, 1)
    return yn.reshape(b, c, h, w)


if __name__ == "__main__":
    B, DIM, H, W = 2, 8, 16, 16
    HEADS, DIM_HEAD = 4, 32
    HID = HEADS * DIM_HEAD

    key = jax.random.PRNGKey(0)
    kx, k1, k2, k3, k4, k5 = jax.random.split(key, 6)

    x = jax.random.normal(kx, (B, DIM, H, W), dtype=jnp.float32)
    # to_qkv: Conv2d(dim, 3*hid, 1, bias=False) -> weight (3*hid, dim)
    wqkv = 0.05 * jax.random.normal(k1, (3 * HID, DIM), dtype=jnp.float32)
    # to_out conv: Conv2d(hid, dim, 1) -> weight (dim, hid), bias (dim,)
    wout = 0.05 * jax.random.normal(k2, (DIM, HID), dtype=jnp.float32)
    bout = 0.1 * jax.random.normal(k3, (DIM,), dtype=jnp.float32)
    # GroupNorm(1, dim) affine params (non-trivial to exercise the path)
    gamma = 1.0 + 0.1 * jax.random.normal(k4, (DIM,), dtype=jnp.float32)
    beta = 0.1 * jax.random.normal(k5, (DIM,), dtype=jnp.float32)

    y = linear_attention(x, wqkv, wout, bout, gamma, beta,
                         heads=HEADS, dim_head=DIM_HEAD)
    y = jax.block_until_ready(y)

    y_ref = linear_attention_ref(x, wqkv, wout, bout, gamma, beta,
                                 heads=HEADS, dim_head=DIM_HEAD)
    assert y.shape == (B, DIM, H, W) and y.dtype == jnp.float32
    # bf16 MXU operands (f32 accumulation) now also cover the to_qkv stage
    # (per perf review); observed error is ~1e-3 but the bound leaves headroom
    # for the extra bf16 stage.
    assert jnp.allclose(y, y_ref, atol=1e-2, rtol=1e-2), "mismatch vs reference"

    print("KERNEL_OK")
</pallas_src>

<mosaic_0001>
module attributes {stable_mosaic.version = 11 : i64} {
  func.func @linear_attention_kernel(%arg0: i32, %arg1: memref<8x512xbf16, #tpu.memory_space<vmem>>, %arg2: memref<8x384xbf16, #tpu.memory_space<vmem>>, %arg3: memref<8x128xbf16, #tpu.memory_space<vmem>>, %arg4: memref<128x128xbf16, #tpu.memory_space<vmem>>, %arg5: memref<24x1xf32, #tpu.memory_space<vmem>>, %arg6: memref<8x512xf32, #tpu.memory_space<vmem>>) attributes {dimension_semantics = [#tpu.dimension_semantics<arbitrary>], iteration_bounds = array<i64: 1>, scalar_prefetch = 0 : i64, scratch_operands = 0 : i64, tpu.core_type = #tpu.core_type<tc>, window_params = [{pipeline_mode = #tpu.pipeline_mode<synchronous>, transform_indices = @transform_0, window_bounds = array<i64: 8, 512>}, {pipeline_mode = #tpu.pipeline_mode<synchronous>, transform_indices = @transform_1, window_bounds = array<i64: 8, 384>}, {pipeline_mode = #tpu.pipeline_mode<synchronous>, transform_indices = @transform_2, window_bounds = array<i64: 8, 128>}, {pipeline_mode = #tpu.pipeline_mode<synchronous>, transform_indices = @transform_3, window_bounds = array<i64: 128, 128>}, {pipeline_mode = #tpu.pipeline_mode<synchronous>, transform_indices = @transform_4, window_bounds = array<i64: 24, 1>}, {pipeline_mode = #tpu.pipeline_mode<synchronous>, transform_indices = @transform_5, window_bounds = array<i64: 8, 512>}]} {
    %c0 = arith.constant 0 : index
    %c0_0 = arith.constant 0 : index
    %0 = vector.load %arg1[%c0, %c0_0] : memref<8x512xbf16, #tpu.memory_space<vmem>>, vector<8x512xbf16>
    %c0_1 = arith.constant 0 : index
    %c0_2 = arith.constant 0 : index
    %1 = vector.load %arg2[%c0_1, %c0_2] : memref<8x384xbf16, #tpu.memory_space<vmem>>, vector<8x384xbf16>
    %cst = arith.constant dense<0.000000e+00> : vector<384x512xf32>
    %2 = tpu.matmul %1, %0, %cst {dimension_numbers = #tpu.dot_dimension_numbers<[0], [0], [1], [1], [0, 1, 1, 1], [], []>} : vector<8x384xbf16>, vector<8x512xbf16>, vector<384x512xf32> -> vector<384x512xf32>
    %3 = vector.extract_strided_slice %2 {offsets = [0, 0], sizes = [128, 512], strides = [1, 1]} : vector<384x512xf32> to vector<128x512xf32>
    %4 = vector.extract_strided_slice %2 {offsets = [128, 0], sizes = [128, 512], strides = [1, 1]} : vector<384x512xf32> to vector<128x512xf32>
    %5 = vector.extract_strided_slice %2 {offsets = [256, 0], sizes = [128, 512], strides = [1, 1]} : vector<384x512xf32> to vector<128x512xf32>
    %6 = vector.shape_cast %3 : vector<128x512xf32> to vector<4x32x512xf32>
    %cst_3 = arith.constant dense<0xFF800000> : vector<4x512xf32>
    %7 = vector.multi_reduction <maximumf>, %6, %cst_3 [1] : vector<4x32x512xf32> to vector<4x512xf32>
    %8 = vector.shape_cast %7 : vector<4x512xf32> to vector<4x1x512xf32>
    %9 = vector.broadcast %8 : vector<4x1x512xf32> to vector<4x32x512xf32>
    %10 = arith.subf %6, %9 : vector<4x32x512xf32>
    %11 = math.exp %10 : vector<4x32x512xf32>
    %cst_4 = arith.constant dense<0.000000e+00> : vector<4x512xf32>
    %12 = vector.multi_reduction <add>, %11, %cst_4 [1] : vector<4x32x512xf32> to vector<4x512xf32>
    %13 = vector.shape_cast %12 : vector<4x512xf32> to vector<4x1x512xf32>
    %14 = tpu.reciprocal %13 {approx = true} : vector<4x1x512xf32> -> vector<4x1x512xf32>
    %15 = vector.broadcast %14 : vector<4x1x512xf32> to vector<4x32x512xf32>
    %16 = arith.mulf %11, %15 : vector<4x32x512xf32>
    %17 = vector.shape_cast %16 : vector<4x32x512xf32> to vector<128x512xf32>
    %18 = arith.truncf %17 : vector<128x512xf32> to vector<128x512xbf16>
    %c0_5 = arith.constant 0 : index
    %c0_6 = arith.constant 0 : index
    %19 = vector.load %arg4[%c0_5, %c0_6] : memref<128x128xbf16, #tpu.memory_space<vmem>>, vector<128x128xbf16>
    %c0_7 = arith.constant 0 : index
    %c0_8 = arith.constant 0 : index
    %20 = vector.load %arg3[%c0_7, %c0_8] : memref<8x128xbf16, #tpu.memory_space<vmem>>, vector<8x128xbf16>
    %c0_9 = arith.constant 0 : index
    %c0_10 = arith.constant 0 : index
    %21 = vector.load %arg5[%c0_9, %c0_10] : memref<24x1xf32, #tpu.memory_space<vmem>>, vector<24x1xf32>
    %22 = vector.extract_strided_slice %21 {offsets = [0, 0], sizes = [8, 1], strides = [1, 1]} : vector<24x1xf32> to vector<8x1xf32>
    %23 = vector.extract_strided_slice %21 {offsets = [8, 0], sizes = [8, 1], strides = [1, 1]} : vector<24x1xf32> to vector<8x1xf32>
    %24 = vector.extract_strided_slice %21 {offsets = [16, 0], sizes = [8, 1], strides = [1, 1]} : vector<24x1xf32> to vector<8x1xf32>
    %25 = vector.extract_strided_slice %4 {offsets = [0, 0], sizes = [128, 256], strides = [1, 1]} : vector<128x512xf32> to vector<128x256xf32>
    %cst_11 = arith.constant dense<0xFF800000> : vector<128xf32>
    %26 = vector.multi_reduction <maximumf>, %25, %cst_11 [1] : vector<128x256xf32> to vector<128xf32>
    %27 = vector.shape_cast %26 : vector<128xf32> to vector<128x1xf32>
    %28 = vector.broadcast %27 : vector<128x1xf32> to vector<128x256xf32>
    %29 = arith.subf %25, %28 : vector<128x256xf32>
    %30 = math.exp %29 : vector<128x256xf32>
    %cst_12 = arith.constant dense<0.000000e+00> : vector<128xf32>
    %31 = vector.multi_reduction <add>, %30, %cst_12 [1] : vector<128x256xf32> to vector<128xf32>
    %32 = vector.shape_cast %31 : vector<128xf32> to vector<128x1xf32>
    %33 = tpu.reciprocal %32 {approx = true} : vector<128x1xf32> -> vector<128x1xf32>
    %34 = vector.broadcast %33 : vector<128x1xf32> to vector<128x256xf32>
    %35 = arith.mulf %30, %34 : vector<128x256xf32>
    %36 = vector.extract_strided_slice %5 {offsets = [0, 0], sizes = [128, 256], strides = [1, 1]} : vector<128x512xf32> to vector<128x256xf32>
    %37 = arith.truncf %36 : vector<128x256xf32> to vector<128x256xbf16>
    %38 = arith.truncf %35 : vector<128x256xf32> to vector<128x256xbf16>
    %cst_13 = arith.constant dense<0.000000e+00> : vector<128x128xf32>
    %39 = tpu.matmul %37, %38, %cst_13 {dimension_numbers = #tpu.dot_dimension_numbers<[1], [1], [0], [0], [0, 0, 1, 0], [], []>} : vector<128x256xbf16>, vector<128x256xbf16>, vector<128x128xf32> -> vector<128x128xf32>
    %40 = arith.truncf %39 : vector<128x128xf32> to vector<128x128xbf16>
    %41 = arith.mulf %40, %19 : vector<128x128xbf16>
    %cst_14 = arith.constant dense<0.000000e+00> : vector<8x128xf32>
    %42 = tpu.matmul %20, %41, %cst_14 {dimension_numbers = #tpu.dot_dimension_numbers<[1], [0], [0], [1], [0, 0, 1, 1], [], []>} : vector<8x128xbf16>, vector<128x128xbf16>, vector<8x128xf32> -> vector<8x128xf32>
    %43 = arith.truncf %42 : vector<8x128xf32> to vector<8x128xbf16>
    %44 = vector.extract_strided_slice %18 {offsets = [0, 0], sizes = [128, 256], strides = [1, 1]} : vector<128x512xbf16> to vector<128x256xbf16>
    %cst_15 = arith.constant dense<0.000000e+00> : vector<8x256xf32>
    %45 = tpu.matmul %43, %44, %cst_15 {dimension_numbers = #tpu.dot_dimension_numbers<[1], [0], [0], [1], [0, 0, 1, 1], [], []>} : vector<8x128xbf16>, vector<128x256xbf16>, vector<8x256xf32> -> vector<8x256xf32>
    %46 = vector.broadcast %22 : vector<8x1xf32> to vector<8x256xf32>
    %47 = arith.addf %45, %46 : vector<8x256xf32>
    %48 = vector.shape_cast %47 : vector<8x256xf32> to vector<1x8x256xf32>
    %cst_16 = arith.constant dense<0.000000e+00> : vector<1xf32>
    %49 = vector.multi_reduction <add>, %48, %cst_16 [1, 2] : vector<1x8x256xf32> to vector<1xf32>
    %50 = vector.shape_cast %49 : vector<1xf32> to vector<1x1x1xf32>
    %51 = vector.extract %50[0, 0, 0] : f32 from vector<1x1x1xf32>
    %cst_17 = arith.constant 4.8828125E-4 : f32
    %52 = arith.mulf %51, %cst_17 : f32
    %53 = vector.broadcast %52 : f32 to vector<8x256xf32>
    %54 = arith.subf %47, %53 : vector<8x256xf32>
    %55 = arith.mulf %54, %54 : vector<8x256xf32>
    %56 = vector.shape_cast %55 : vector<8x256xf32> to vector<1x8x256xf32>
    %cst_18 = arith.constant dense<0.000000e+00> : vector<1xf32>
    %57 = vector.multi_reduction <add>, %56, %cst_18 [1, 2] : vector<1x8x256xf32> to vector<1xf32>
    %58 = vector.shape_cast %57 : vector<1xf32> to vector<1x1x1xf32>
    %59 = vector.extract %58[0, 0, 0] : f32 from vector<1x1x1xf32>
    %cst_19 = arith.constant 4.8828125E-4 : f32
    %60 = arith.mulf %59, %cst_19 : f32
    %cst_20 = arith.constant 9.99999974E-6 : f32
    %61 = arith.addf %60, %cst_20 : f32
    %62 = math.rsqrt %61 : f32
    %63 = vector.broadcast %62 : f32 to vector<8x256xf32>
    %64 = arith.mulf %54, %63 : vector<8x256xf32>
    %65 = vector.broadcast %23 : vector<8x1xf32> to vector<8x256xf32>
    %66 = arith.mulf %64, %65 : vector<8x256xf32>
    %67 = vector.broadcast %24 : vector<8x1xf32> to vector<8x256xf32>
    %68 = arith.addf %66, %67 : vector<8x256xf32>
    %c0_21 = arith.constant 0 : index
    %c0_22 = arith.constant 0 : index
    %69 = vector.load %arg6[%c0_21, %c0_22] : memref<8x512xf32, #tpu.memory_space<vmem>>, vector<8x256xf32>
    tpu.vector_store %arg6[%c0_21, %c0_22], %68 {strides = array<i32>} : memref<8x512xf32, #tpu.memory_space<vmem>>, vector<8x256xf32>,
    %70 = vector.extract_strided_slice %4 {offsets = [0, 256], sizes = [128, 256], strides = [1, 1]} : vector<128x512xf32> to vector<128x256xf32>
    %cst_23 = arith.constant dense<0xFF800000> : vector<128xf32>
    %71 = vector.multi_reduction <maximumf>, %70, %cst_23 [1] : vector<128x256xf32> to vector<128xf32>
    %72 = vector.shape_cast %71 : vector<128xf32> to vector<128x1xf32>
    %73 = vector.broadcast %72 : vector<128x1xf32> to vector<128x256xf32>
    %74 = arith.subf %70, %73 : vector<128x256xf32>
    %75 = math.exp %74 : vector<128x256xf32>
    %cst_24 = arith.constant dense<0.000000e+00> : vector<128xf32>
    %76 = vector.multi_reduction <add>, %75, %cst_24 [1] : vector<128x256xf32> to vector<128xf32>
    %77 = vector.shape_cast %76 : vector<128xf32> to vector<128x1xf32>
    %78 = tpu.reciprocal %77 {approx = true} : vector<128x1xf32> -> vector<128x1xf32>
    %79 = vector.broadcast %78 : vector<128x1xf32> to vector<128x256xf32>
    %80 = arith.mulf %75, %79 : vector<128x256xf32>
    %81 = vector.extract_strided_slice %5 {offsets = [0, 256], sizes = [128, 256], strides = [1, 1]} : vector<128x512xf32> to vector<128x256xf32>
    %82 = arith.truncf %81 : vector<128x256xf32> to vector<128x256xbf16>
    %83 = arith.truncf %80 : vector<128x256xf32> to vector<128x256xbf16>
    %cst_25 = arith.constant dense<0.000000e+00> : vector<128x128xf32>
    %84 = tpu.matmul %82, %83, %cst_25 {dimension_numbers = #tpu.dot_dimension_numbers<[1], [1], [0], [0], [0, 0, 1, 0], [], []>} : vector<128x256xbf16>, vector<128x256xbf16>, vector<128x128xf32> -> vector<128x128xf32>
    %85 = arith.truncf %84 : vector<128x128xf32> to vector<128x128xbf16>
    %86 = arith.mulf %85, %19 : vector<128x128xbf16>
    %cst_26 = arith.constant dense<0.000000e+00> : vector<8x128xf32>
    %87 = tpu.matmul %20, %86, %cst_26 {dimension_numbers = #tpu.dot_dimension_numbers<[1], [0], [0], [1], [0, 0, 1, 1], [], []>} : vector<8x128xbf16>, vector<128x128xbf16>, vector<8x128xf32> -> vector<8x128xf32>
    %88 = arith.truncf %87 : vector<8x128xf32> to vector<8x128xbf16>
    %89 = vector.extract_strided_slice %18 {offsets = [0, 256], sizes = [128, 256], strides = [1, 1]} : vector<128x512xbf16> to vector<128x256xbf16>
    %cst_27 = arith.constant dense<0.000000e+00> : vector<8x256xf32>
    %90 = tpu.matmul %88, %89, %cst_27 {dimension_numbers = #tpu.dot_dimension_numbers<[1], [0], [0], [1], [0, 0, 1, 1], [], []>} : vector<8x128xbf16>, vector<128x256xbf16>, vector<8x256xf32> -> vector<8x256xf32>
    %91 = vector.broadcast %22 : vector<8x1xf32> to vector<8x256xf32>
    %92 = arith.addf %90, %91 : vector<8x256xf32>
    %93 = vector.shape_cast %92 : vector<8x256xf32> to vector<1x8x256xf32>
    %cst_28 = arith.constant dense<0.000000e+00> : vector<1xf32>
    %94 = vector.multi_reduction <add>, %93, %cst_28 [1, 2] : vector<1x8x256xf32> to vector<1xf32>
    %95 = vector.shape_cast %94 : vector<1xf32> to vector<1x1x1xf32>
    %96 = vector.extract %95[0, 0, 0] : f32 from vector<1x1x1xf32>
    %cst_29 = arith.constant 4.8828125E-4 : f32
    %97 = arith.mulf %96, %cst_29 : f32
    %98 = vector.broadcast %97 : f32 to vector<8x256xf32>
    %99 = arith.subf %92, %98 : vector<8x256xf32>
    %100 = arith.mulf %99, %99 : vector<8x256xf32>
    %101 = vector.shape_cast %100 : vector<8x256xf32> to vector<1x8x256xf32>
    %cst_30 = arith.constant dense<0.000000e+00> : vector<1xf32>
    %102 = vector.multi_reduction <add>, %101, %cst_30 [1, 2] : vector<1x8x256xf32> to vector<1xf32>
    %103 = vector.shape_cast %102 : vector<1xf32> to vector<1x1x1xf32>
    %104 = vector.extract %103[0, 0, 0] : f32 from vector<1x1x1xf32>
    %cst_31 = arith.constant 4.8828125E-4 : f32
    %105 = arith.mulf %104, %cst_31 : f32
    %cst_32 = arith.constant 9.99999974E-6 : f32
    %106 = arith.addf %105, %cst_32 : f32
    %107 = math.rsqrt %106 : f32
    %108 = vector.broadcast %107 : f32 to vector<8x256xf32>
    %109 = arith.mulf %99, %108 : vector<8x256xf32>
    %110 = vector.broadcast %23 : vector<8x1xf32> to vector<8x256xf32>
    %111 = arith.mulf %109, %110 : vector<8x256xf32>
    %112 = vector.broadcast %24 : vector<8x1xf32> to vector<8x256xf32>
    %113 = arith.addf %111, %112 : vector<8x256xf32>
    %c0_33 = arith.constant 0 : index
    %c256 = arith.constant 256 : index
    %114 = vector.load %arg6[%c0_33, %c256] : memref<8x512xf32, #tpu.memory_space<vmem>>, vector<8x256xf32>
    tpu.vector_store %arg6[%c0_33, %c256], %113 {strides = array<i32>} : memref<8x512xf32, #tpu.memory_space<vmem>>, vector<8x256xf32>,
    return
  }
  func.func @transform_0(%arg0: i32) -> (i32, i32) {
    %c0_i32 = arith.constant 0 : i32
    %c0_i32_0 = arith.constant 0 : i32
    %c0_i32_1 = arith.constant 0 : i32
    return %c0_i32, %c0_i32_0 : i32, i32
  }
  func.func @transform_1(%arg0: i32) -> (i32, i32) {
    %c0_i32 = arith.constant 0 : i32
    %c0_i32_0 = arith.constant 0 : i32
    %c0_i32_1 = arith.constant 0 : i32
    return %c0_i32, %c0_i32_0 : i32, i32
  }
  func.func @transform_2(%arg0: i32) -> (i32, i32) {
    %c0_i32 = arith.constant 0 : i32
    %c0_i32_0 = arith.constant 0 : i32
    %c0_i32_1 = arith.constant 0 : i32
    return %c0_i32, %c0_i32_0 : i32, i32
  }
  func.func @transform_3(%arg0: i32) -> (i32, i32) {
    %c0_i32 = arith.constant 0 : i32
    %c0_i32_0 = arith.constant 0 : i32
    %c0_i32_1 = arith.constant 0 : i32
    return %c0_i32, %c0_i32_0 : i32, i32
  }
  func.func @transform_4(%arg0: i32) -> (i32, i32) {
    %c0_i32 = arith.constant 0 : i32
    %c0_i32_0 = arith.constant 0 : i32
    %c0_i32_1 = arith.constant 0 : i32
    return %c0_i32, %c0_i32_0 : i32, i32
  }
  func.func @transform_5(%arg0: i32) -> (i32, i32) {
    %c0_i32 = arith.constant 0 : i32
    %c0_i32_0 = arith.constant 0 : i32
    %c0_i32_1 = arith.constant 0 : i32
    return %c0_i32, %c0_i32_0 : i32, i32
  }
}

</mosaic_0001>

<bundles_post_ra>
// kernel: tpu_custom_call.1
= control target key start
LH: loop header
LB: loop body
LE: loop exit
PB: predicated region body
PF: predicated region fallthrough
CT: control target
= control target key end

     0   :  { %10 = vsyncpa [#allocation3], 0  ;;  %s4998_s0 = inlined_call_operand.vmem [shape: bf16[8,512], index: 0, kind: input, shape index: {}]   ;;  %s4999_s1 = inlined_call_operand.vmem [shape: bf16[8,384], index: 1, kind: input, shape index: {}]   ;;  %s5000_s2 = inlined_call_operand.vmem [shape: bf16[8,128], index: 2, kind: input, shape index: {}]   ;;  %s5001_s3 = inlined_call_operand.hbm [shape: bf16[128,128], index: 3, kind: input, shape index: {}]   ;;  %s5002_s4 = inlined_call_operand.vmem [shape: f32[24,1], index: 4, kind: input, shape index: {}]   ;;  %s5003_s5 = inlined_call_operand.hbm [shape: f32[8,512], index: 5, kind: output, shape index: {}]  }
   0x1   :  { %11 = vsyncpa [#allocation4], 0  ;;  %s3010_s18 = smov [#allocation2]   ;;  %s2962_s22 = scalar_lea.hbm %s5001_s3, 1024 }
   0x2   :  { %s23_s19 = sshll.u32 %s3010_s18, 4  ;;  %p2963_p0 = scmp.ne.s32.totalorder %s5001_s3, %s2962_s22  ;;  %s24_s19 = int_to_ptr.vmem [resolvable:$true] %s23_s19 }
   0x3   :  { %p2966_p1 = scmp.lt.u32.totalorder %s2962_s22, %s5001_s3 }
   0x5   :  { %p2968_p2 = pnand %p2966_p1, %p2963_p0 }
   0x7   :  { %2971 = shalt.err (!%p2968_p2)
}
   0x8   :  { %s2972_s27 = scalar_lea.vmem %s24_s19, 1024  ;;  %p2977_p4 = scmp.lt.s32.totalorder %s24_s19, %s24_s19 }
   0x9   :  { %p2973_p3 = scmp.ne.s32.totalorder %s24_s19, %s2972_s27  ;;  %p2978_p5 = scmp.lt.s32.totalorder %s2972_s27, %s2972_s27 }
   0xb   :  { %p2979_p6 = por %p2978_p5, %p2977_p4 }
   0xd   :  { %p2980_p7 = pnand %p2979_p6, %p2973_p3 }
   0xf   :  { %2983 = shalt.err (!%p2980_p7)
}
  0x10   :  { %s3011_s28 = smov 64   ;;  %s3012_s29 = smov 4  }
  0x11   :  { %29 = dma.hbm_to_vmem [thread:$0]  %s5001_s3, 1024, %s24_s19, [#allocation3], %s3011_s28, %s3011_s28, %s3012_s29  }
  0x12   :  { %3006 = dma.done.wait [#allocation3], 1024  }
  0x13   :  { %3007 = vsyncadd [#allocation3], 4294966272  ;;  %v5004_v0 = vmov 0   ;;  %v2591_v1 = vld [vmem:[%s4999_s1 + $0x8] ss:$0 sps:$4 sm:$0xff]   ;;  %v38_v2 = vld [vmem:[%s4999_s1] sm:$0xff] }
  0x14   :  { %227 = vmatprep.mubr.bf16.mxu0 %v5004_v0  ;;  %457 = vmatprep.mubr.bf16.mxu1 %v5004_v0  ;;  %v2445_v3 = vcombine.low %v38_v2, %v38_v2  ;;  %v36_v4 = vld [vmem:[%s4998_s0] sm:$0xff]  ;;  %vm182_vm0 = vcmask 1043456   ;;  %v37_v8 = vld [vmem:[%s4998_s0 + $0x8] sm:$0xff]  ;;  %v2446_v12 = vcombine.high %v38_v2, %v38_v2  ;;  %vm109_vm1 = vcmask 64512   ;;  %s3016_s30 = smov [#allocation5]  }
  0x15   :  { %83 = vxpose.xlu1.c.b16.start.end [1/1] (short) %v2591_v1, 128  ;;  %v2449_v5 = vcombine.high %v36_v4, %v36_v4  ;;  %v2448_v6 = vcombine.low %v36_v4, %v36_v4  ;;  %v2451_v9 = vcombine.high %v37_v8, %v37_v8  ;;  %v2450_v10 = vcombine.low %v37_v8, %v37_v8  ;;  %s2436_s6 = sshll.u32 %s3016_s30, 4  ;;  %s2437_s6 = int_to_ptr.vmem [resolvable:$true] %s2436_s6 }
  0x16   :  { %51 = vxpose.xlu0.c.b16.start.end [1/1] (short) %v2445_v3, 128  ;;  %vm3015_vm2 = vmmov 0   ;;  %s2984_s7 = scalar_lea.vmem %s2437_s6, 512  ;;  %p2989_p9 = scmp.lt.s32.totalorder %s2437_s6, %s2437_s6 }
  0x17   :  { %2452 = vmatprep.subr.msk.bf16.mxu0 %vm182_vm0, %v2449_v5  ;;  %v184_v7 = vsel %vm182_vm0, %v2448_v6, 0  ;;  %2568 = vmatprep.subr.msk.bf16.mxu1 %vm182_vm0, %v2449_v5  ;;  %v190_v11 = vsel %vm182_vm0, %v2450_v10, 0  ;;  %p2985_p8 = scmp.ne.s32.totalorder %s2437_s6, %s2984_s7  ;;  %p2990_p10 = scmp.lt.s32.totalorder %s2984_s7, %s2984_s7 }
  0x18   :  { %196 = vmatpush1.bf16.msra.mxu0 %v184_v7  ;;  %2569 = vmatpush1.bf16.msra.mxu1 %v184_v7 }
  0x19   :  { %2590 = vset.pattern.permute.xlu1 %v5004_v0  ;;  %2477 = vmatprep.subr.msk.bf16.mxu1 %vm182_vm0, %v2451_v9  ;;  %p2991_p11 = por %p2990_p10, %p2989_p9 }
  0x1b   :  { %p2992_p12 = pnand %p2991_p11, %p2985_p8 }
  0x33   :  { %67 = vxpose.xlu0.c.b16.start.end [1/1] (short) %v2446_v12, 128 }
  0x3c   :  { %2589 = vset.pattern.permute.xlu0 %v5004_v0 }
  0x7b   :  { %v3075_v13 = vpop.trf.xlu1 }
  0x7c   :  { %v59_v14 = vpop.trf.xlu0 }
  0x7d   :  { %2453 = vmatmul.mubr.msk.bf16.vlgmr.msra.gmra.mrb[0].mxu0 %vm109_vm1, %v59_v14 }
  0x7e   :  { %237 = vmatprep.mubr.bf16.mxu0 %v5004_v0 }
  0x7f   :  { %v3079_v15 = vpop.trf.xlu1 }
  0x80   :  { %v60_v16 = vpop.trf.xlu0 }
  0x83   :  { %v3081_v17 = vpop.trf.xlu1 }
  0x84   :  { %v61_v19 = vpop.trf.xlu0 }
  0x85   :  { %2454 = vmatmul.mubr.msk.bf16.gmra.mrb[4].mxu0 %vm109_vm1, %v60_v16 }
  0x86   :  { %247 = vmatprep.mubr.bf16.mxu0 %v5004_v0 }
  0x87   :  { %v3085_v18 = vpop.trf.xlu1 }
  0x88   :  { %v62_v22 = vpop.trf.xlu0 }
  0x8b   :  { %v3087_v20 = vpop.trf.xlu1 }
  0x8c   :  { %v63_v25 = vpop.trf.xlu0 }
  0x8d   :  { %2455 = vmatmul.mubr.msk.bf16.gmra.mrb[8].mxu0 %vm109_vm1, %v61_v19 }
  0x8e   :  { %257 = vmatprep.mubr.bf16.mxu0 %v5004_v0 }
  0x8f   :  { %v3091_v21 = vpop.trf.xlu1 }
  0x90   :  { %v64_v26 = vpop.trf.xlu0 }
  0x93   :  { %v3093_v23 = vpop.trf.xlu1 }
  0x94   :  { %v65_v27 = vpop.trf.xlu0 }
  0x95   :  { %2456 = vmatmul.mubr.msk.bf16.gmra.mrb[12].mxu0 %vm109_vm1, %v62_v22 }
  0x96   :  { %267 = vmatprep.mubr.bf16.mxu0 %v5004_v0 }
  0x97   :  { %v3097_v24 = vpop.trf.xlu1 }
  0x98   :  { %2476 = vmatmul.mubr.msk.bf16.vlgmr.msra.gmra.mrb[0].mxu1 %vm109_vm1, %v3097_v24  ;;  %v66_v28 = vpop.trf.xlu0 }
  0x99   :  { %469 = vmatpush1.bf16.msra.mxu1 %v190_v11  ;;  %500 = vmatprep.mubr.bf16.mxu1 %v5004_v0 }
  0x9c   :  { %v75_v29 = vpop.trf.xlu0 }
  0x9d   :  { %2457 = vmatmul.mubr.msk.bf16.gmra.mrb[16].mxu0 %vm109_vm1, %v63_v25 }
  0x9e   :  { %277 = vmatprep.mubr.bf16.mxu0 %v5004_v0 }
  0xa0   :  { %2478 = vmatmul.mubr.msk.bf16.vlgmr.msra.gmra.mrb[4].mxu1 %vm109_vm1, %v59_v14  ;;  %v76_v30 = vpop.trf.xlu0 }
  0xa1   :  { %510 = vmatprep.mubr.bf16.mxu1 %v5004_v0 }
  0xa4   :  { %v77_v31 = vpop.trf.xlu0 }
  0xa5   :  { %2458 = vmatmul.mubr.msk.bf16.gmra.mrb[20].mxu0 %vm109_vm1, %v64_v26 }
  0xa6   :  { %287 = vmatprep.mubr.bf16.mxu0 %v5004_v0 }
  0xa8   :  { %2479 = vmatmul.mubr.msk.bf16.gmra.mrb[8].mxu1 %vm109_vm1, %v60_v16  ;;  %v78_v32 = vpop.trf.xlu0 }
  0xa9   :  { %520 = vmatprep.mubr.bf16.mxu1 %v5004_v0 }
  0xac   :  { %v79_v33 = vpop.trf.xlu0 }
  0xad   :  { %2459 = vmatmul.mubr.msk.bf16.gmra.mrb[24].mxu0 %vm109_vm1, %v65_v27 }
  0xae   :  { %297 = vmatprep.mubr.bf16.mxu0 %v5004_v0 }
  0xb0   :  { %2480 = vmatmul.mubr.msk.bf16.gmra.mrb[12].mxu1 %vm109_vm1, %v61_v19  ;;  %v80_v34 = vpop.trf.xlu0 }
  0xb1   :  { %530 = vmatprep.mubr.bf16.mxu1 %v5004_v0 }
  0xb4   :  { %v81_v35 = vpop.trf.xlu0 }
  0xb5   :  { %2460 = vmatmul.mubr.msk.bf16.gmra.mrb[28].mxu0 %vm109_vm1, %v66_v28 }
  0xb6   :  { %307 = vmatprep.mubr.bf16.mxu0 %v5004_v0 }
  0xb8   :  { %2481 = vmatmul.mubr.msk.bf16.gmra.mrb[16].mxu1 %vm109_vm1, %v62_v22  ;;  %v82_v36 = vpop.trf.xlu0 }
  0xb9   :  { %540 = vmatprep.mubr.bf16.mxu1 %v5004_v0 }
  0xbd   :  { %2461 = vmatmul.mubr.msk.bf16.gmra.mrb[32].mxu0 %vm109_vm1, %v75_v29 }
  0xbe   :  { %317 = vmatprep.mubr.bf16.mxu0 %v5004_v0 }
  0xc0   :  { %2482 = vmatmul.mubr.msk.bf16.gmra.mrb[20].mxu1 %vm109_vm1, %v63_v25 }
  0xc1   :  { %550 = vmatprep.mubr.bf16.mxu1 %v5004_v0 }
  0xc5   :  { %2462 = vmatmul.mubr.msk.bf16.gmra.mrb[36].mxu0 %vm109_vm1, %v76_v30 }
  0xc6   :  { %327 = vmatprep.mubr.bf16.mxu0 %v5004_v0 }
  0xc8   :  { %2483 = vmatmul.mubr.msk.bf16.gmra.mrb[24].mxu1 %vm109_vm1, %v64_v26 }
  0xc9   :  { %560 = vmatprep.mubr.bf16.mxu1 %v5004_v0 }
  0xcd   :  { %2463 = vmatmul.mubr.msk.bf16.gmra.mrb[40].mxu0 %vm109_vm1, %v77_v31 }
  0xce   :  { %337 = vmatprep.mubr.bf16.mxu0 %v5004_v0 }
  0xd0   :  { %2484 = vmatmul.mubr.msk.bf16.gmra.mrb[28].mxu1 %vm109_vm1, %v65_v27 }
  0xd1   :  { %570 = vmatprep.mubr.bf16.mxu1 %v5004_v0 }
  0xd5   :  { %2464 = vmatmul.mubr.msk.bf16.gmra.mrb[44].mxu0 %vm109_vm1, %v78_v32 }
  0xd6   :  { %347 = vmatprep.mubr.bf16.mxu0 %v5004_v0 }
  0xd8   :  { %2485 = vmatmul.mubr.msk.bf16.gmra.mrb[32].mxu1 %vm109_vm1, %v66_v28 }
  0xd9   :  { %580 = vmatprep.mubr.bf16.mxu1 %v5004_v0 }
  0xdd   :  { %2465 = vmatmul.mubr.msk.bf16.gmra.mrb[48].mxu0 %vm109_vm1, %v79_v33 }
  0xde   :  { %357 = vmatprep.mubr.bf16.mxu0 %v5004_v0 }
  0xe0   :  { %2486 = vmatmul.mubr.msk.bf16.gmra.mrb[36].mxu1 %vm109_vm1, %v75_v29 }
  0xe1   :  { %590 = vmatprep.mubr.bf16.mxu1 %v5004_v0 }
  0xe5   :  { %2466 = vmatmul.mubr.msk.bf16.gmra.mrb[52].mxu0 %vm109_vm1, %v80_v34 }
  0xe6   :  { %367 = vmatprep.mubr.bf16.mxu0 %v5004_v0 }
  0xe8   :  { %2487 = vmatmul.mubr.msk.bf16.gmra.mrb[40].mxu1 %vm109_vm1, %v76_v30 }
  0xe9   :  { %600 = vmatprep.mubr.bf16.mxu1 %v5004_v0 }
  0xed   :  { %2467 = vmatmul.mubr.msk.bf16.gmra.mrb[56].mxu0 %vm109_vm1, %v81_v35 }
  0xee   :  { %377 = vmatprep.mubr.bf16.mxu0 %v5004_v0 }
  0xf0   :  { %2488 = vmatmul.mubr.msk.bf16.gmra.mrb[44].mxu1 %vm109_vm1, %v77_v31 }
  0xf1   :  { %610 = vmatprep.mubr.bf16.mxu1 %v5004_v0 }
  0xf5   :  { %2468 = vmatmul.mubr.msk.bf16.gmra.mrb[60].mxu0 %vm109_vm1, %v82_v36 }
  0xf6   :  { %387 = vmatprep.mubr.bf16.mxu0 %v5004_v0 }
  0xf8   :  { %2489 = vmatmul.mubr.msk.bf16.gmra.mrb[48].mxu1 %vm109_vm1, %v78_v32 }
  0xf9   :  { %620 = vmatprep.mubr.bf16.mxu1 %v5004_v0 }
  0xfd   :  { %2469 = vmatmul.mubr.msk.bf16.gmra.mrb[64].mxu0 %vm109_vm1, %v3075_v13 }
  0xfe   :  { %397 = vmatprep.mubr.bf16.mxu0 %v5004_v0 }
 0x100   :  { %2490 = vmatmul.mubr.msk.bf16.gmra.mrb[52].mxu1 %vm109_vm1, %v79_v33 }
 0x101   :  { %630 = vmatprep.mubr.bf16.mxu1 %v5004_v0 }
 0x105   :  { %2470 = vmatmul.mubr.msk.bf16.gmra.mrb[68].mxu0 %vm109_vm1, %v3079_v15 }
 0x106   :  { %407 = vmatprep.mubr.bf16.mxu0 %v5004_v0 }
 0x108   :  { %2491 = vmatmul.mubr.msk.bf16.gmra.mrb[56].mxu1 %vm109_vm1, %v80_v34 }
 0x109   :  { %640 = vmatprep.mubr.bf16.mxu1 %v5004_v0 }
 0x10d   :  { %2471 = vmatmul.mubr.msk.bf16.gmra.mrb[72].mxu0 %vm109_vm1, %v3081_v17 }
 0x10e   :  { %417 = vmatprep.mubr.bf16.mxu0 %v5004_v0 }
 0x110   :  { %2492 = vmatmul.mubr.msk.bf16.gmra.mrb[60].mxu1 %vm109_vm1, %v81_v35 }
 0x111   :  { %650 = vmatprep.mubr.bf16.mxu1 %v5004_v0 }
 0x115   :  { %2472 = vmatmul.mubr.msk.bf16.gmra.mrb[76].mxu0 %vm109_vm1, %v3085_v18 }
 0x116   :  { %427 = vmatprep.mubr.bf16.mxu0 %v5004_v0 }
 0x118   :  { %2493 = vmatmul.mubr.msk.bf16.gmra.mrb[64].mxu1 %vm109_vm1, %v82_v36 }
 0x119   :  { %660 = vmatprep.mubr.bf16.mxu1 %v5004_v0 }
 0x11d   :  { %2473 = vmatmul.mubr.msk.bf16.gmra.mrb[80].mxu0 %vm109_vm1, %v3087_v20 }
 0x11e   :  { %437 = vmatprep.mubr.bf16.mxu0 %v5004_v0 }
 0x120   :  { %2494 = vmatmul.mubr.msk.bf16.gmra.mrb[68].mxu1 %vm109_vm1, %v3075_v13 }
 0x121   :  { %670 = vmatprep.mubr.bf16.mxu1 %v5004_v0 }
 0x125   :  { %2474 = vmatmul.mubr.msk.bf16.gmra.mrb[84].mxu0 %vm109_vm1, %v3091_v21 }
 0x126   :  { %447 = vmatprep.mubr.bf16.mxu0 %v5004_v0 }
 0x128   :  { %2495 = vmatmul.mubr.msk.bf16.gmra.mrb[72].mxu1 %vm109_vm1, %v3079_v15 }
 0x129   :  { %680 = vmatprep.mubr.bf16.mxu1 %v5004_v0 }
 0x12d   :  { %2475 = vmatmul.mubr.msk.bf16.gmra.mrb[88].mxu0 %vm109_vm1, %v3093_v23 }
 0x130   :  { %2496 = vmatmul.mubr.msk.bf16.gmra.mrb[76].mxu1 %vm109_vm1, %v3081_v17 }
 0x131   :  { %690 = vmatprep.mubr.bf16.mxu1 %v5004_v0 }
 0x138   :  { %2497 = vmatmul.mubr.msk.bf16.gmra.mrb[80].mxu1 %vm109_vm1, %v3085_v18 }
 0x139   :  { %700 = vmatprep.mubr.bf16.mxu1 %v5004_v0 }
 0x140   :  { %2498 = vmatmul.mubr.msk.bf16.gmra.mrb[84].mxu1 %vm109_vm1, %v3087_v20 }
 0x141   :  { %710 = vmatprep.mubr.bf16.mxu1 %v5004_v0 }
 0x148   :  { %2499 = vmatmul.mubr.msk.bf16.gmra.mrb[88].mxu1 %vm109_vm1, %v3091_v21 }
 0x149   :  { %720 = vmatprep.mubr.bf16.mxu1 %v5004_v0 }
 0x150   :  { %v229_v37 = vpop.f32.mrb[0].mxu0  ;;  %2500 = vmatmul.mubr.msk.bf16.gmra.mrb[92].mxu1 %vm109_vm1, %v3093_v23 }
 0x151   :  { %v231_v38 = vpop.f32.mrb[1].mxu0  ;;  %730 = vmatprep.mubr.bf16.mxu1 %v5004_v0 }
 0x152   :  { %v233_v39 = vpop.f32.mrb[2].mxu0 }
 0x153   :  { %v741_v40 = vmax.f32 %v229_v37, %v233_v39  ;;  %v235_v41 = vpop.f32.mrb[3].mxu0 }
 0x154   :  { %v750_v42 = vmax.f32 %v231_v38, %v235_v41 }
 0x158   :  { %v239_v43 = vpop.f32.mrb[4].mxu0  ;;  %2501 = vmatmul.mubr.msk.bf16.gmra.mrb[96].mxu1 %vm109_vm1, %v3097_v24 }
 0x159   :  { %v742_v44 = vmax.f32 %v741_v40, %v239_v43  ;;  %v241_v45 = vpop.f32.mrb[5].mxu0 }
 0x15a   :  { %v751_v46 = vmax.f32 %v750_v42, %v241_v45  ;;  %v243_v47 = vpop.f32.mrb[6].mxu0 }
 0x15b   :  { %v743_v48 = vmax.f32 %v742_v44, %v243_v47  ;;  %v245_v49 = vpop.f32.mrb[7].mxu0 }
 0x15c   :  { %v752_v50 = vmax.f32 %v751_v46, %v245_v49 }
 0x15d   :  { %v744_v51 = vrot.slane %v743_v48, 4 }
 0x15e   :  { %v753_v52 = vrot.slane %v752_v50, 4 }
 0x15f   :  { %v745_v53 = vmax.f32 %v743_v48, %v744_v51 }
 0x160   :  { %v754_v54 = vmax.f32 %v752_v50, %v753_v52  ;;  %v3201_v55 = vpop.f32.mrb[8].mxu0 }
 0x161   :  { %v746_v56 = vrot.slane %v745_v53, 2  ;;  %v3203_v57 = vpop.f32.mrb[9].mxu0 }
 0x162   :  { %v755_v58 = vrot.slane %v754_v54, 2  ;;  %v3205_v59 = vpop.f32.mrb[10].mxu0 }
 0x163   :  { %v747_v60 = vmax.f32 %v745_v53, %v746_v56  ;;  %v777_v61 = vmax.f32 %v3201_v55, %v3205_v59  ;;  %v3209_v62 = vpop.f32.mrb[11].mxu0 }
 0x164   :  { %v756_v63 = vmax.f32 %v754_v54, %v755_v58  ;;  %v786_v1 = vmax.f32 %v3203_v57, %v3209_v62 }
 0x165   :  { %v748_v2 = vrot.slane %v747_v60, 1 }
 0x166   :  { %v757_v3 = vrot.slane %v756_v63, 1 }
 0x167   :  { %v749_v4 = vmax.f32 %v747_v60, %v748_v2 }
 0x168   :  { %v758_v5 = vmax.f32 %v756_v63, %v757_v3  ;;  %v3213_v6 = vpop.f32.mrb[12].mxu0 }
 0x169   :  { %v885_v7 = vsub.f32 %v229_v37, %v749_v4  ;;  %v889_v8 = vsub.f32 %v233_v39, %v749_v4  ;;  %v893_v9 = vsub.f32 %v239_v43, %v749_v4  ;;  %v897_v10 = vsub.f32 %v243_v47, %v749_v4  ;;  %v3215_v11 = vpop.f32.mrb[13].mxu0 }
 0x16a   :  { %v886_v12 = vsub.f32 %v231_v38, %v758_v5  ;;  %v890_v13 = vsub.f32 %v235_v41, %v758_v5  ;;  %v894_v14 = vsub.f32 %v241_v45, %v758_v5  ;;  %v898_v15 = vsub.f32 %v245_v49, %v758_v5  ;;  %v3217_v16 = vpop.f32.mrb[14].mxu0 }
 0x16b   :  { %v949_v17 = vmul.f32 1.442695, %v885_v7  ;;  %v957_v18 = vmul.f32 1.442695, %v889_v8  ;;  %v965_v19 = vmul.f32 1.442695, %v893_v9  ;;  %v778_v20 = vmax.f32 %v777_v61, %v3213_v6 }
 0x16c   :  { %v973_v21 = vmul.f32 1.442695, %v897_v10  ;;  %v787_v22 = vmax.f32 %v786_v1, %v3215_v11  ;;  %v951_v23 = vmul.f32 1.442695, %v886_v12  ;;  %v3222_v25 = vpop.f32.mrb[15].mxu0  ;;  %v3224_v26 = vpop.f32.mrb[0].mxu1 }
 0x16d   :  { %2606 = vpow2.f32 %v949_v17  ;;  %v779_v24 = vmax.f32 %v778_v20, %v3217_v16  ;;  %5262 = vst [vmem:[#allocation8_spill] sm:$0xff] %v3224_v26  ;;  %v959_v27 = vmul.f32 1.442695, %v890_v13  ;;  %v3227_v29 = vpop.f32.mrb[1].mxu1  ;;  %v967_v32 = vmul.f32 1.442695, %v894_v14 }
 0x16e   :  { %2608 = vpow2.f32 %v957_v18  ;;  %v788_v28 = vmax.f32 %v787_v22, %v3222_v25  ;;  %5263 = vst [vmem:[#allocation9_spill] sm:$0xff] %v3227_v29  ;;  %v3229_v31 = vpop.f32.mrb[2].mxu1  ;;  %v975_v40 = vmul.f32 1.442695, %v898_v15 }
 0x16f   :  { %2610 = vpow2.f32 %v965_v19  ;;  %v780_v30 = vrot.slane %v779_v24, 4  ;;  %5264 = vst [vmem:[#allocation10_spill] sm:$0xff] %v3229_v31  ;;  %v3235_v36 = vpop.f32.mrb[3].mxu1 }
 0x170   :  { %2612 = vpow2.f32 %v973_v21  ;;  %v789_v33 = vrot.slane %v788_v28, 4  ;;  %v3231_v34 = vpop.f32.mrb[16].mxu0  ;;  %5265 = vst [vmem:[#allocation11_spill] sm:$0xff] %v3235_v36 }
 0x171   :  { %2614 = vpow2.f32 %v951_v23  ;;  %v781_v37 = vmax.f32 %v779_v24, %v780_v30  ;;  %v3237_v38 = vpop.f32.mrb[17].mxu0 }
 0x172   :  { %2616 = vpow2.f32 %v959_v27  ;;  %v790_v41 = vmax.f32 %v788_v28, %v789_v33  ;;  %v3241_v42 = vpop.f32.mrb[18].mxu0 }
 0x173   :  { %v782_v43 = vrot.slane %v781_v37, 2  ;;  %v813_v44 = vmax.f32 %v3231_v34, %v3241_v42  ;;  %v3245_v45 = vpop.f32.mrb[19].mxu0  ;;  %v3247_v46 = vpop.f32.mrb[4].mxu1  ;;  %2618 = vpow2.f32 %v967_v32 }
 0x174   :  { %v791_v47 = vrot.slane %v790_v41, 2  ;;  %v822_v48 = vmax.f32 %v3237_v38, %v3245_v45  ;;  %v3251_v49 = vpop.f32.mrb[5].mxu1  ;;  %2620 = vpow2.f32 %v975_v40 }
 0x175   :  { %v783_v50 = vmax.f32 %v781_v37, %v782_v43  ;;  %v3253_v51 = vpop.f32.mrb[6].mxu1 }
 0x176   :  { %v792_v52 = vmax.f32 %v790_v41, %v791_v47  ;;  %v759_v53 = vmax.f32 %v3247_v46, %v3253_v51  ;;  %v3257_v54 = vpop.f32.mrb[7].mxu1 }
 0x177   :  { %v3259_v56 = vpop.eup %2606  ;;  %v784_v58 = vrot.slane %v783_v50, 1  ;;  %v768_v60 = vmax.f32 %v3251_v49, %v3257_v54 }
 0x178   :  { %5266 = vst [vmem:[#allocation12_spill] sm:$0xff] %v3259_v56  ;;  %v3263_v61 = vpop.eup %2608  ;;  %v793_v63 = vrot.slane %v792_v52, 1  ;;  %v3265_v1 = vpop.f32.mrb[20].mxu0 }
 0x179   :  { %5267 = vst [vmem:[#allocation13_spill] sm:$0xff] %v3263_v61  ;;  %v3267_v2 = vpop.eup %2610  ;;  %v1077_v3 = vadd.f32 %v3263_v61, %v3259_v56  ;;  %v785_v4 = vmax.f32 %v783_v50, %v784_v58  ;;  %v814_v5 = vmax.f32 %v813_v44, %v3265_v1  ;;  %v3272_v7 = vpop.f32.mrb[21].mxu0 }
 0x17a   :  { %5268 = vst [vmem:[#allocation14_spill] sm:$0xff] %v3267_v2  ;;  %v3274_v8 = vpop.eup %2612  ;;  %v794_v9 = vmax.f32 %v792_v52, %v793_v63  ;;  %v823_v10 = vmax.f32 %v822_v48, %v3272_v7  ;;  %v3277_v12 = vpop.f32.mrb[22].mxu0 }
 0x17b   :  { %5269 = vst [vmem:[#allocation15_spill] sm:$0xff] %v3274_v8  ;;  %v3279_v13 = vpop.eup %2614  ;;  %v1078_v14 = vadd.f32 %v3267_v2, %v1077_v3  ;;  %v901_v15 = vsub.f32 %v3201_v55, %v785_v4  ;;  %v905_v17 = vsub.f32 %v3205_v59, %v785_v4  ;;  %v909_v18 = vsub.f32 %v3213_v6, %v785_v4  ;;  %v3285_v19 = vpop.f32.mrb[23].mxu0 }
 0x17c   :  { %5270 = vst [vmem:[#allocation16_spill] sm:$0xff] %v3279_v13  ;;  %v3287_v20 = vpop.f32.mrb[8].mxu1  ;;  %v3289_v21 = vpop.eup %2616  ;;  %v913_v22 = vsub.f32 %v3217_v16, %v785_v4  ;;  %v902_v23 = vsub.f32 %v3203_v57, %v794_v9  ;;  %v906_v24 = vsub.f32 %v3209_v62, %v794_v9  ;;  %v910_v27 = vsub.f32 %v3215_v11, %v794_v9 }
 0x17d   :  { %5271 = vst [vmem:[#allocation17_spill] sm:$0xff] %v3289_v21  ;;  %v3295_v28 = vpop.f32.mrb[9].mxu1  ;;  %v1079_v55 = vadd.f32 %v3274_v8, %v1078_v14  ;;  %v1086_v59 = vadd.f32 %v3289_v21, %v3279_v13  ;;  %v981_v6 = vmul.f32 1.442695, %v901_v15  ;;  %v989_v30 = vmul.f32 1.442695, %v905_v17  ;;  %v3302_v33 = vpop.eup %2618 }
 0x17e   :  { %v3300_v32 = vpop.f32.mrb[10].mxu1  ;;  %5272 = vst [vmem:[#allocation18_spill] sm:$0xff] %v3302_v33  ;;  %v997_v16 = vmul.f32 1.442695, %v909_v18  ;;  %v1005_v37 = vmul.f32 1.442695, %v913_v22  ;;  %v914_v57 = vsub.f32 %v3222_v25, %v794_v9  ;;  %v3308_v44 = vpop.eup %2620  ;;  %v815_v50 = vmax.f32 %v814_v5, %v3277_v12 }
 0x17f   :  { %v983_v62 = vmul.f32 1.442695, %v902_v23  ;;  %v1080_v40 = vrot.slane %v1079_v55, 4  ;;  %v1087_v11 = vadd.f32 %v3302_v33, %v1086_v59  ;;  %2622 = vpow2.f32 %v981_v6  ;;  %v3306_v43 = vpop.f32.mrb[11].mxu1  ;;  %5273 = vst [vmem:[#allocation19_spill] sm:$0xff] %v3308_v44 }
 0x180   :  { %v991_v41 = vmul.f32 1.442695, %v906_v24  ;;  %2624 = vpow2.f32 %v989_v30  ;;  %v999_v47 = vmul.f32 1.442695, %v910_v27  ;;  %v1007_v48 = vmul.f32 1.442695, %v914_v57 }
 0x181   :  { %v3311_v52 = vpop.f32.mrb[24].mxu0  ;;  %v1081_v58 = vadd.f32 %v1080_v40, %v1079_v55  ;;  %v1088_v25 = vadd.f32 %v3308_v44, %v1087_v11  ;;  %2626 = vpow2.f32 %v997_v16  ;;  %v824_v63 = vmax.f32 %v823_v10, %v3285_v19 }
 0x182   :  { %v3315_v3 = vpop.f32.mrb[25].mxu0  ;;  %2628 = vpow2.f32 %v1005_v37  ;;  %v816_v4 = vrot.slane %v815_v50, 4  ;;  %v760_v9 = vmax.f32 %v759_v53, %v3287_v20  ;;  %v769_v14 = vmax.f32 %v768_v60, %v3295_v28 }
 0x183   :  { %v3319_v15 = vpop.f32.mrb[26].mxu0  ;;  %v1082_v17 = vrot.slane %v1081_v58, 2  ;;  %v1089_v5 = vrot.slane %v1088_v25, 4  ;;  %2630 = vpow2.f32 %v983_v62  ;;  %v825_v18 = vrot.slane %v824_v63, 4  ;;  %v3323_v23 = vpop.f32.mrb[12].mxu1 }
 0x184   :  { %v3321_v22 = vpop.f32.mrb[27].mxu0  ;;  %2632 = vpow2.f32 %v991_v41  ;;  %v817_v10 = vmax.f32 %v815_v50, %v816_v4  ;;  %v761_v24 = vmax.f32 %v760_v9, %v3300_v32  ;;  %v770_v27 = vmax.f32 %v769_v14, %v3306_v43  ;;  %v3327_v55 = vpop.f32.mrb[13].mxu1 }
 0x185   :  { %v1083_v53 = vadd.f32 %v1082_v17, %v1081_v58  ;;  %v1090_v60 = vadd.f32 %v1089_v5, %v1088_v25  ;;  %2634 = vpow2.f32 %v999_v47  ;;  %v826_v59 = vmax.f32 %v824_v63, %v825_v18  ;;  %v3329_v6 = vpop.f32.mrb[14].mxu1 }
 0x186   :  { %2636 = vpow2.f32 %v1007_v48  ;;  %v818_v30 = vrot.slane %v817_v10, 2  ;;  %v762_v16 = vrot.slane %v761_v24, 4  ;;  %v771_v37 = vrot.slane %v770_v27, 4  ;;  %v3331_v57 = vpop.f32.mrb[15].mxu1 }
 0x187   :  { %v1084_v62 = vrot.slane %v1083_v53, 1  ;;  %v1091_v40 = vrot.slane %v1090_v60, 2  ;;  %v827_v11 = vrot.slane %v826_v59, 2  ;;  %v849_v41 = vmax.f32 %v3311_v52, %v3319_v15 }
 0x188   :  { %v819_v50 = vmax.f32 %v817_v10, %v818_v30  ;;  %v763_v4 = vmax.f32 %v761_v24, %v762_v16  ;;  %v772_v58 = vmax.f32 %v770_v27, %v771_v37  ;;  %v858_v47 = vmax.f32 %v3315_v3, %v3321_v22  ;;  %v3337_v25 = vpop.f32.mrb[28].mxu0 }
 0x189   :  { %v3339_v48 = vpop.eup %2622  ;;  %v1085_v63 = vadd.f32 %v1084_v62, %v1083_v53  ;;  %v1092_v9 = vadd.f32 %v1091_v40, %v1090_v60  ;;  %v828_v14 = vmax.f32 %v826_v59, %v827_v11  ;;  %v3343_v5 = vpop.f32.mrb[29].mxu0  ;;  %v850_v30 = vmax.f32 %v849_v41, %v3337_v25 }
 0x18a   :  { %5274 = vst [vmem:[#allocation20_spill] sm:$0xff] %v3339_v48  ;;  %v3345_v18 = vpop.eup %2624  ;;  %v820_v10 = vrot.slane %v819_v50, 1  ;;  %v764_v24 = vrot.slane %v763_v4, 2  ;;  %v773_v27 = vrot.slane %v772_v58, 2  ;;  %v3349_v16 = vpop.f32.mrb[30].mxu0  ;;  %v859_v36 = vmax.f32 %v858_v47, %v3343_v5 }
 0x18b   :  { %5275 = vst [vmem:[#allocation21_spill] sm:$0xff] %v3345_v18  ;;  %v3351_v37 = vpop.eup %2626  ;;  %2638 = vrcp.f32 %v1085_v63  ;;  %v1093_v53 = vrot.slane %v1092_v9, 1  ;;  %v1113_v60 = vadd.f32 %v3345_v18, %v3339_v48  ;;  %v829_v59 = vrot.slane %v828_v14, 1  ;;  %v3355_v62 = vpop.f32.mrb[31].mxu0 }
 0x18c   :  { %5276 = vst [vmem:[#allocation22_spill] sm:$0xff] %v3351_v37  ;;  %v3357_v40 = vpop.f32.mrb[16].mxu1  ;;  %v3359_v11 = vpop.eup %2628  ;;  %v821_v0 = vmax.f32 %v819_v50, %v820_v10  ;;  %v765_v35 = vmax.f32 %v763_v4, %v764_v24  ;;  %v774_v39 = vmax.f32 %v772_v58, %v773_v27 }
 0x18d   :  { %5277 = vst [vmem:[#allocation23_spill] sm:$0xff] %v3359_v11  ;;  %v3362_v17 = vpop.f32.mrb[17].mxu1  ;;  %v3364_v26 = vpop.eup %2630  ;;  %v1094_v63 = vadd.f32 %v1093_v53, %v1092_v9  ;;  %v1114_v31 = vadd.f32 %v3351_v37, %v1113_v60  ;;  %v830_v29 = vmax.f32 %v828_v14, %v829_v59 }
 0x18e   :  { %5278 = vst [vmem:[#allocation24_spill] sm:$0xff] %v3364_v26  ;;  %v3368_v18 = vpop.f32.mrb[18].mxu1  ;;  %v3370_v48 = vpop.eup %2632  ;;  %v917_v50 = vsub.f32 %v3231_v34, %v821_v0  ;;  %v921_v4 = vsub.f32 %v3241_v42, %v821_v0  ;;  %v925_v41 = vsub.f32 %v3265_v1, %v821_v0  ;;  %v929_v58 = vsub.f32 %v3277_v12, %v821_v0 }
 0x18f   :  { %5279 = vst [vmem:[#allocation25_spill] sm:$0xff] %v3370_v48  ;;  %v3376_v10 = vpop.f32.mrb[19].mxu1  ;;  %v3378_v9 = vpop.eup %2634  ;;  %2640 = vrcp.f32 %v1094_v63  ;;  %v1115_v14 = vadd.f32 %v3359_v11, %v1114_v31  ;;  %v1122_v47 = vadd.f32 %v3370_v48, %v3364_v26  ;;  %v918_v24 = vsub.f32 %v3237_v38, %v830_v29 }
 0x190   :  { %5280 = vst [vmem:[#allocation26_spill] sm:$0xff] %v3378_v9  ;;  %v3384_v27 = vpop.eup %2636  ;;  %v1013_v34 = vmul.f32 1.442695, %v917_v50  ;;  %v1021_v42 = vmul.f32 1.442695, %v921_v4  ;;  %v922_v1 = vsub.f32 %v3245_v45, %v830_v29  ;;  %v926_v59 = vsub.f32 %v3272_v7, %v830_v29  ;;  %v3389_v63 = vpop.f32.mrb[32].mxu0 }
 0x191   :  { %5281 = vst [vmem:[#allocation27_spill] sm:$0xff] %v3384_v27  ;;  %v1029_v53 = vmul.f32 1.442695, %v925_v41  ;;  %v1116_v0 = vrot.slane %v1115_v14, 4  ;;  %v1123_v12 = vadd.f32 %v3378_v9, %v1122_v47  ;;  %v1037_v60 = vmul.f32 1.442695, %v929_v58 }
 0x192   :  { %5282 = vst [vmem:[#allocation28_spill] sm:$0xff] %v3389_v63  ;;  %2642 = vpow2.f32 %v1013_v34  ;;  %v930_v31 = vsub.f32 %v3285_v19, %v830_v29  ;;  %v1015_v11 = vmul.f32 1.442695, %v918_v24  ;;  %v1023_v38 = vmul.f32 1.442695, %v922_v1  ;;  %v3392_v37 = vpop.f32.mrb[33].mxu0 }
 0x193   :  { %5283 = vst [vmem:[#allocation29_spill] sm:$0xff] %v3392_v37  ;;  %v1117_v50 = vadd.f32 %v1116_v0, %v1115_v14  ;;  %v1124_v4 = vadd.f32 %v3384_v27, %v1123_v12  ;;  %2644 = vpow2.f32 %v1021_v42  ;;  %v1031_v45 = vmul.f32 1.442695, %v926_v59  ;;  %v3395_v41 = vpop.f32.mrb[34].mxu0  ;;  %v3397_v47 = vpop.f32.mrb[20].mxu1 }
 0x194   :  { %5284 = vst [vmem:[#allocation30_spill] sm:$0xff] %v3395_v41  ;;  %2646 = vpow2.f32 %v1029_v53  ;;  %v1039_v7 = vmul.f32 1.442695, %v930_v31  ;;  %v766_v58 = vrot.slane %v765_v35, 1  ;;  %v775_v9 = vrot.slane %v774_v39, 1  ;;  %v3399_v34 = vpop.f32.mrb[35].mxu0 }
 0x195   :  { %5285 = vst [vmem:[#allocation31_spill] sm:$0xff] %v3399_v34  ;;  %v3401_v29 = vpop.f32.mrb[21].mxu1  ;;  %v3403_v19 = vpop.eup %2638  ;;  %v1118_v24 = vrot.slane %v1117_v50, 2  ;;  %v1125_v14 = vrot.slane %v1124_v4, 4  ;;  %2648 = vpow2.f32 %v1037_v60  ;;  %v851_v42 = vmax.f32 %v850_v30, %v3349_v16 }
 0x196   :  { %5286 = vst [vmem:[#allocation32_spill] sm:$0xff] %v3403_v19  ;;  %v3406_v1 = vpop.f32.mrb[22].mxu1  ;;  %2650 = vpow2.f32 %v1015_v11  ;;  %v767_v0 = vmax.f32 %v765_v35, %v766_v58  ;;  %v776_v12 = vmax.f32 %v774_v39, %v775_v9  ;;  %v860_v53 = vmax.f32 %v859_v36, %v3355_v62 }
 0x197   :  { %v3409_v59 = vpop.f32.mrb[23].mxu1  ;;  %v1119_v31 = vadd.f32 %v1118_v24, %v1117_v50  ;;  %v1126_v27 = vadd.f32 %v1125_v14, %v1124_v4  ;;  %2652 = vpow2.f32 %v1023_v38  ;;  %v852_v48 = vrot.slane %v851_v42, 4 }
 0x198   :  { %2654 = vpow2.f32 %v1031_v45  ;;  %v887_v26 = vsub.f32 %v3247_v46, %v767_v0  ;;  %v891_v60 = vsub.f32 %v3253_v51, %v767_v0  ;;  %v895_v30 = vsub.f32 %v3287_v20, %v767_v0  ;;  %v3414_v8 = vpop.f32.mrb[36].mxu0 }
 0x199   :  { %5287 = vst [vmem:[#allocation33_spill] sm:$0xff] %v3414_v8  ;;  %v3416_v11 = vpop.eup %2640  ;;  %v1120_v35 = vrot.slane %v1119_v31, 1  ;;  %v1127_v39 = vrot.slane %v1126_v27, 2  ;;  %2656 = vpow2.f32 %v1039_v7  ;;  %v899_v36 = vsub.f32 %v3300_v32, %v767_v0  ;;  %v3419_v9 = vpop.f32.mrb[37].mxu0 }
 0x19a   :  { %5288 = vst [vmem:[#allocation34_spill] sm:$0xff] %v3416_v11  ;;  %5289 = vst [vmem:[#allocation35_spill] sm:$0xff] %v3419_v9  ;;  %v953_v38 = vmul.f32 1.442695, %v887_v26  ;;  %v961_v50 = vmul.f32 1.442695, %v891_v60  ;;  %v888_v46 = vsub.f32 %v3251_v49, %v776_v12  ;;  %v892_v20 = vsub.f32 %v3257_v54, %v776_v12 }
 0x19b   :  { %v969_v4 = vmul.f32 1.442695, %v895_v30  ;;  %v1121_v45 = vadd.f32 %v1120_v35, %v1119_v31  ;;  %v1128_v51 = vadd.f32 %v1127_v39, %v1126_v27  ;;  %v977_v58 = vmul.f32 1.442695, %v899_v36  ;;  %v3423_v24 = vpop.f32.mrb[38].mxu0  ;;  %v3425_v14 = vpop.f32.mrb[24].mxu1 }
 0x19c   :  { %5290 = vst [vmem:[#allocation36_spill] sm:$0xff] %v3423_v24  ;;  %v3427_v2 = vpop.eup %2642  ;;  %2658 = vpow2.f32 %v953_v38  ;;  %v896_v32 = vsub.f32 %v3295_v28, %v776_v12  ;;  %v900_v26 = vsub.f32 %v3306_v43, %v776_v12  ;;  %v955_v7 = vmul.f32 1.442695, %v888_v46  ;;  %v3431_v0 = vpop.f32.mrb[39].mxu0 }
 0x19d   :  { %5291 = vst [vmem:[#allocation37_spill] sm:$0xff] %v3427_v2  ;;  %5292 = vst [vmem:[#allocation38_spill] sm:$0xff] %v3431_v0  ;;  %v3433_v49 = vpop.f32.mrb[25].mxu1  ;;  %v3435_v27 = vpop.eup %2644  ;;  %2660 = vrcp.f32 %v1121_v45  ;;  %v1129_v54 = vrot.slane %v1128_v51, 1  ;;  %v963_v31 = vmul.f32 1.442695, %v892_v20  ;;  %v853_v60 = vmax.f32 %v851_v42, %v852_v48 }
 0x19e   :  { %5293 = vst [vmem:[#allocation39_spill] sm:$0xff] %v3435_v27  ;;  %v3437_v30 = vpop.f32.mrb[26].mxu1  ;;  %v3439_v35 = vpop.eup %2646  ;;  %v1149_v28 = vadd.f32 %v3435_v27, %v3427_v2  ;;  %2662 = vpow2.f32 %v961_v50  ;;  %v971_v43 = vmul.f32 1.442695, %v896_v32  ;;  %v979_v12 = vmul.f32 1.442695, %v900_v26 }
 0x19f   :  { %5294 = vst [vmem:[#allocation40_spill] sm:$0xff] %v3439_v35  ;;  %v3443_v39 = vpop.f32.mrb[27].mxu1  ;;  %v3445_v36 = vpop.eup %2648  ;;  %v1130_v38 = vadd.f32 %v1129_v54, %v1128_v51  ;;  %2664 = vpow2.f32 %v969_v4  ;;  %v854_v46 = vrot.slane %v853_v60, 2  ;;  %v861_v45 = vrot.slane %v860_v53, 4 }
 0x1a0   :  { %5295 = vst [vmem:[#allocation41_spill] sm:$0xff] %v3445_v36  ;;  %v3447_v20 = vpop.eup %2650  ;;  %v1150_v48 = vadd.f32 %v3439_v35, %v1149_v28  ;;  %2666 = vpow2.f32 %v977_v58  ;;  %v5297_v42 = vmax.f32 %v3323_v23, %v3329_v6  ;;  %v5298_v32 = vmax.f32 %v3327_v55, %v3331_v57  ;;  %v3458_v27 = vpop.f32.mrb[40].mxu0 }
 0x1a1   :  { %5296 = vst [vmem:[#allocation42_spill] sm:$0xff] %v3447_v20  ;;  %5299 = vst [vmem:[#allocation43_spill] sm:$0xff] %v3458_v27  ;;  %v3460_v4 = vpop.eup %2652  ;;  %2668 = vrcp.f32 %v1130_v38  ;;  %v855_v51 = vmax.f32 %v853_v60, %v854_v46  ;;  %v862_v54 = vmax.f32 %v860_v53, %v861_v45  ;;  %v1353_v58 = vmax.f32 %v3389_v63, %v3392_v37  ;;  %v3464_v28 = vpop.f32.mrb[41].mxu0 }
 0x1a2   :  { %v796_v50 = vmax.f32 %v5297_v42, %v3357_v40  ;;  %v805_v26 = vmax.f32 %v5298_v32, %v3362_v17  ;;  %5300 = vst [vmem:[#allocation44_spill] sm:$0xff] %v3460_v4  ;;  %5301 = vst [vmem:[#allocation45_spill] sm:$0xff] %v3464_v28  ;;  %v3466_v35 = vpop.eup %2654  ;;  %v1151_v42 = vadd.f32 %v3445_v36, %v1150_v48  ;;  %2670 = vpow2.f32 %v955_v7  ;;  %v3472_v44 = vpop.f32.mrb[42].mxu0 }
 0x1a3   :  { %5302 = vst [vmem:[#allocation46_spill] sm:$0xff] %v3466_v35  ;;  %v1158_v2 = vadd.f32 %v3460_v4, %v3447_v20  ;;  %5303 = vst [vmem:[#allocation47_spill] sm:$0xff] %v3472_v44  ;;  %v3474_v38 = vpop.eup %2656  ;;  %2672 = vpow2.f32 %v963_v31  ;;  %v856_v53 = vrot.slane %v855_v51, 1  ;;  %v863_v60 = vrot.slane %v862_v54, 2  ;;  %1354 = vmax.xlane.f32.xlu1 %v1353_v58  ;;  %v3477_v45 = vpop.f32.mrb[43].mxu0 }
 0x1a4   :  { %v797_v32 = vmax.f32 %v796_v50, %v3368_v18  ;;  %5304 = vst [vmem:[#allocation48_spill] sm:$0xff] %v3474_v38  ;;  %v806_v46 = vmax.f32 %v805_v26, %v3376_v10  ;;  %5305 = vst [vmem:[#allocation49_spill] sm:$0xff] %v3477_v45  ;;  %v3479_v37 = vpop.f32.mrb[28].mxu1  ;;  %v1152_v48 = vrot.slane %v1151_v42, 4  ;;  %2674 = vpow2.f32 %v971_v43 }
 0x1a5   :  { %v1159_v63 = vadd.f32 %v3466_v35, %v1158_v2  ;;  %v3482_v50 = vpop.f32.mrb[29].mxu1  ;;  %2676 = vpow2.f32 %v979_v12  ;;  %v857_v36 = vmax.f32 %v855_v51, %v856_v53  ;;  %v864_v4 = vmax.f32 %v862_v54, %v863_v60 }
 0x1a6   :  { %v798_v7 = vrot.slane %v797_v32, 4  ;;  %v807_v31 = vrot.slane %v806_v46, 4  ;;  %v3484_v20 = vpop.f32.mrb[30].mxu1  ;;  %v3486_v33 = vpop.eup %2658  ;;  %v1153_v26 = vadd.f32 %v1152_v48, %v1151_v42 }
 0x1a7   :  { %5306 = vst [vmem:[#allocation50_spill] sm:$0xff] %v3486_v33  ;;  %v1160_v58 = vadd.f32 %v3474_v38, %v1159_v63  ;;  %v3491_v2 = vpop.f32.mrb[31].mxu1  ;;  %v3493_v43 = vpop.eup %2660  ;;  %v933_v12 = vsub.f32 %v3311_v52, %v857_v36  ;;  %v937_v51 = vsub.f32 %v3319_v15, %v857_v36  ;;  %v941_v54 = vsub.f32 %v3337_v25, %v857_v36 }
 0x1a8   :  { %v799_v61 = vmax.f32 %v797_v32, %v798_v7  ;;  %5307 = vst [vmem:[#allocation51_spill] sm:$0xff] %v3493_v43  ;;  %v945_v53 = vsub.f32 %v3349_v16, %v857_v36  ;;  %v3499_v60 = vpop.eup %2662  ;;  %v1154_v42 = vrot.slane %v1153_v26, 2  ;;  %v865_v32 = vrot.slane %v864_v4, 1  ;;  %v3501_v7 = vpop.f32.mrb[44].mxu0 }
 0x1a9   :  { %5308 = vst [vmem:[#allocation52_spill] sm:$0xff] %v3499_v60  ;;  %v1161_v63 = vrot.slane %v1160_v58, 4  ;;  %5309 = vst [vmem:[#allocation53_spill] sm:$0xff] %v3501_v7  ;;  %v3503_v19 = vpop.eup %2664  ;;  %v1095_v38 = vadd.f32 %v3499_v60, %v3486_v33  ;;  %v1045_v52 = vmul.f32 1.442695, %v933_v12  ;;  %v3509_v21 = vpop.f32.mrb[45].mxu0  ;;  %v808_v44 = vmax.f32 %v806_v46, %v807_v31 }
 0x1aa   :  { %v800_v48 = vrot.slane %v799_v61, 2  ;;  %5310 = vst [vmem:[#allocation54_spill] sm:$0xff] %v3503_v19  ;;  %v1053_v35 = vmul.f32 1.442695, %v937_v51  ;;  %v1061_v15 = vmul.f32 1.442695, %v941_v54  ;;  %v3507_v43 = vpop.eup %2666  ;;  %v1155_v25 = vadd.f32 %v1154_v42, %v1153_v26 }
 0x1ab   :  { %5311 = vst [vmem:[#allocation55_spill] sm:$0xff] %v3507_v43  ;;  %v1162_v16 = vadd.f32 %v1161_v63, %v1160_v58  ;;  %v1069_v36 = vmul.f32 1.442695, %v945_v53  ;;  %v866_v56 = vmax.f32 %v864_v4, %v865_v32  ;;  %v3511_v11 = vpop.eup %2668  ;;  %v1096_v13 = vadd.f32 %v3503_v19, %v1095_v38  ;;  %v3514_v45 = vpop.f32.mrb[46].mxu0 }
 0x1ac   :  { %5312 = vst [vmem:[#allocation56_spill] sm:$0xff] %v3511_v11  ;;  %2678 = vpow2.f32 %v1045_v52  ;;  %v801_v7 = vmax.f32 %v799_v61, %v800_v48  ;;  %v3516_v12 = vpop.f32.mrb[32].mxu1  ;;  %v3518_v51 = vpop.eup %2670  ;;  %v1156_v54 = vrot.slane %v1155_v25, 1 }
 0x1ad   :  { %5313 = vst [vmem:[#allocation57_spill] sm:$0xff] %v3518_v51  ;;  %v1163_v26 = vrot.slane %v1162_v16, 2  ;;  %2680 = vpow2.f32 %v1053_v35  ;;  %v934_v4 = vsub.f32 %v3315_v3, %v866_v56  ;;  %v3521_v58 = vpop.f32.mrb[47].mxu0  ;;  %v3523_v53 = vpop.f32.mrb[33].mxu1  ;;  %v1097_v61 = vadd.f32 %v3507_v43, %v1096_v13 }
 0x1ae   :  { %v3525_v42 = vpop.eup %2672  ;;  %2682 = vpow2.f32 %v1061_v15  ;;  %v938_v38 = vsub.f32 %v3321_v22, %v866_v56  ;;  %v942_v46 = vsub.f32 %v3343_v5, %v866_v56  ;;  %v3530_v31 = vpop.f32.mrb[34].mxu1  ;;  %v1157_v35 = vadd.f32 %v1156_v54, %v1155_v25 }
 0x1af   :  { %5314 = vst [vmem:[#allocation58_spill] sm:$0xff] %v3525_v42  ;;  %v3532_v63 = vpop.eup %2674  ;;  %v1164_v32 = vadd.f32 %v1163_v26, %v1162_v16  ;;  %v1104_v3 = vadd.f32 %v3525_v42, %v3518_v51  ;;  %2684 = vpow2.f32 %v1069_v36  ;;  %v3536_v48 = vpop.f32.mrb[35].mxu1  ;;  %v1098_v13 = vrot.slane %v1097_v61, 4 }
 0x1b0   :  { %5315 = vst [vmem:[#allocation59_spill] sm:$0xff] %v3532_v63  ;;  %5316 = vst [vmem:[#allocation60_spill] sm:$0xff] %v3536_v48  ;;  %v3538_v52 = vpop.eup %2676  ;;  %v946_v15 = vsub.f32 %v3355_v62, %v866_v56  ;;  %v1047_v22 = vmul.f32 1.442695, %v934_v4  ;;  %v1055_v43 = vmul.f32 1.442695, %v938_v38  ;;  %2686 = vrcp.f32 %v1157_v35 }
 0x1b1   :  { %5317 = vst [vmem:[#allocation61_spill] sm:$0xff] %v3538_v52  ;;  %v1165_v5 = vrot.slane %v1164_v32, 1  ;;  %v1105_v19 = vadd.f32 %v3532_v63, %v1104_v3  ;;  %v1063_v60 = vmul.f32 1.442695, %v942_v46  ;;  %v3542_v25 = vpop.f32.mrb[48].mxu0  ;;  %v1099_v16 = vadd.f32 %v1098_v13, %v1097_v61 }
 0x1b2   :  { %2688 = vpow2.f32 %v1047_v22  ;;  %v1071_v54 = vmul.f32 1.442695, %v946_v15  ;;  %v802_v36 = vrot.slane %v801_v7, 1  ;;  %v3544_v26 = vpop.f32.mrb[49].mxu0  ;;  %v809_v56 = vrot.slane %v808_v44, 2 }
 0x1b3   :  { %v1166_v33 = vadd.f32 %v1165_v5, %v1164_v32  ;;  %v1106_v42 = vadd.f32 %v3538_v52, %v1105_v19  ;;  %2690 = vpow2.f32 %v1055_v43  ;;  %v3547_v62 = vpop.f32.mrb[50].mxu0  ;;  %v1100_v4 = vrot.slane %v1099_v16, 2  ;;  %v3553_v61 = vpop.f32.mrb[36].mxu1 }
 0x1b4   :  { %2692 = vpow2.f32 %v1063_v60  ;;  %v803_v38 = vmax.f32 %v801_v7, %v802_v36  ;;  %v1356_v46 = vmax.f32 %v3395_v41, %v3399_v34  ;;  %v3551_v35 = vpop.f32.mrb[51].mxu0  ;;  %5319 = vst [vmem:[#allocation63_spill] sm:$0xff] %v3553_v61  ;;  %v810_v13 = vmax.f32 %v808_v44, %v809_v56  ;;  %v3557_v43 = vpop.f32.mrb[37].mxu1 }
 0x1b5   :  { %5318 = vst [vmem:[#allocation62_spill] sm:$0xff] %v3551_v35  ;;  %2694 = vrcp.f32 %v1166_v33  ;;  %v1107_v3 = vrot.slane %v1106_v42, 4  ;;  %5320 = vst [vmem:[#allocation64_spill] sm:$0xff] %v3557_v43  ;;  %v1101_v15 = vadd.f32 %v1100_v4, %v1099_v16  ;;  %v3563_v22 = vpop.f32.mrb[38].mxu1  ;;  %v5328_v52 = vmax.f32 %v3397_v47, %v3406_v1 }
 0x1b6   :  { %v3559_v32 = vpop.eup %2678  ;;  %2696 = vpow2.f32 %v1071_v54  ;;  %v903_v60 = vsub.f32 %v3323_v23, %v803_v38  ;;  %v907_v7 = vsub.f32 %v3329_v6, %v803_v38  ;;  %1357 = vmax.xlane.f32.xlu0 %v1356_v46  ;;  %5322 = vst [vmem:[#allocation66_spill] sm:$0xff] %v3563_v22  ;;  %v911_v44 = vsub.f32 %v3357_v40, %v803_v38  ;;  %v3569_v19 = vpop.f32.mrb[39].mxu1 }
 0x1b7   :  { %5321 = vst [vmem:[#allocation65_spill] sm:$0xff] %v3559_v32  ;;  %v3565_v5 = vpop.eup %2680  ;;  %v1108_v33 = vadd.f32 %v1107_v3, %v1106_v42  ;;  %v915_v36 = vsub.f32 %v3368_v18, %v803_v38  ;;  %v811_v56 = vrot.slane %v810_v13, 1  ;;  %5324 = vst [vmem:[#allocation68_spill] sm:$0xff] %v3569_v19  ;;  %v1102_v16 = vrot.slane %v1101_v15, 1 }
 0x1b8   :  { %5323 = vst [vmem:[#allocation67_spill] sm:$0xff] %v3565_v5  ;;  %v3571_v34 = vpop.eup %2682  ;;  %v1185_v23 = vadd.f32 %v3565_v5, %v3559_v32  ;;  %v985_v6 = vmul.f32 1.442695, %v903_v60  ;;  %v993_v54 = vmul.f32 1.442695, %v907_v7  ;;  %v3577_v40 = vpop.f32.mrb[52].mxu0  ;;  %v832_v63 = vmax.f32 %v5328_v52, %v3425_v14 }
 0x1b9   :  { %5325 = vst [vmem:[#allocation69_spill] sm:$0xff] %v3571_v34  ;;  %v3575_v4 = vpop.eup %2684  ;;  %v1109_v46 = vrot.slane %v1108_v33, 2  ;;  %v1001_v41 = vmul.f32 1.442695, %v911_v44  ;;  %v1009_v42 = vmul.f32 1.442695, %v915_v36  ;;  %v812_v3 = vmax.f32 %v810_v13, %v811_v56 }
 0x1ba   :  { %5326 = vst [vmem:[#allocation70_spill] sm:$0xff] %v3575_v4  ;;  %5327 = vst [vmem:[#allocation71_spill] sm:$0xff] %v3577_v40  ;;  %v1103_v18 = vadd.f32 %v1102_v16, %v1101_v15  ;;  %v1186_v38 = vadd.f32 %v3571_v34, %v1185_v23  ;;  %2698 = vpow2.f32 %v985_v6  ;;  %v3584_v51 = vpop.f32.mrb[53].mxu0  ;;  %v3586_v60 = vpop.eup %2686 }
 0x1bb   :  { %5329 = vst [vmem:[#allocation72_spill] sm:$0xff] %v3584_v51  ;;  %5330 = vst [vmem:[#allocation73_spill] sm:$0xff] %v3586_v60  ;;  %v1110_v7 = vadd.f32 %v1109_v46, %v1108_v33  ;;  %2700 = vpow2.f32 %v993_v54  ;;  %v904_v44 = vsub.f32 %v3327_v55, %v812_v3  ;;  %v908_v13 = vsub.f32 %v3331_v57, %v812_v3  ;;  %v3590_v36 = vpop.f32.mrb[54].mxu0  ;;  %v3599_v6 = vpop.f32.mrb[40].mxu1 }
 0x1bc   :  { %v3592_v15 = vpop.eup %2688  ;;  %2702 = vrcp.f32 %v1103_v18  ;;  %v1187_v56 = vadd.f32 %v3575_v4, %v1186_v38  ;;  %v912_v16 = vsub.f32 %v3362_v17, %v812_v3  ;;  %v916_v52 = vsub.f32 %v3376_v10, %v812_v3  ;;  %v3597_v23 = vpop.f32.mrb[55].mxu0  ;;  %5332 = vst [vmem:[#allocation75_spill] sm:$0xff] %v3599_v6 }
 0x1bd   :  { %5331 = vst [vmem:[#allocation74_spill] sm:$0xff] %v3592_v15  ;;  %v3601_v33 = vpop.eup %2690  ;;  %v1111_v55 = vrot.slane %v1110_v7, 1  ;;  %2704 = vpow2.f32 %v1001_v41  ;;  %v987_v57 = vmul.f32 1.442695, %v904_v44  ;;  %v995_v54 = vmul.f32 1.442695, %v908_v13 }
 0x1be   :  { %5333 = vst [vmem:[#allocation76_spill] sm:$0xff] %v3601_v33  ;;  %v3603_v46 = vpop.f32.mrb[41].mxu1  ;;  %v3605_v34 = vpop.eup %2692  ;;  %v1188_v18 = vrot.slane %v1187_v56, 4  ;;  %v1194_v17 = vadd.f32 %v3601_v33, %v3592_v15  ;;  %2706 = vpow2.f32 %v1009_v42  ;;  %v1003_v10 = vmul.f32 1.442695, %v912_v16  ;;  %v5346_v33 = vld [vmem:[#allocation53_spill] sm:$0xff] }
 0x1bf   :  { %5334 = vst [vmem:[#allocation77_spill] sm:$0xff] %v3603_v46  ;;  %5335 = vst [vmem:[#allocation78_spill] sm:$0xff] %v3605_v34  ;;  %v3609_v3 = vpop.f32.mrb[42].mxu1  ;;  %v3611_v38 = vpop.eup %2694  ;;  %v1112_v4 = vadd.f32 %v1111_v55, %v1110_v7  ;;  %2708 = vpow2.f32 %v987_v57  ;;  %v1011_v5 = vmul.f32 1.442695, %v916_v52  ;;  %v1359_v41 = vmax.f32 %v3414_v8, %v3419_v9 }
 0x1c0   :  { %5336 = vst [vmem:[#allocation79_spill] sm:$0xff] %v3609_v3  ;;  %5337 = vst [vmem:[#allocation80_spill] sm:$0xff] %v3611_v38  ;;  %v3615_v44 = vpop.f32.mrb[43].mxu1  ;;  %v3617_v13 = vpop.eup %2696  ;;  %v1189_v32 = vadd.f32 %v1188_v18, %v1187_v56  ;;  %v1195_v60 = vadd.f32 %v3605_v34, %v1194_v17  ;;  %2710 = vpow2.f32 %v995_v54  ;;  %v5340_v42 = vmax.f32 %v3401_v29, %v3409_v59 }
 0x1c1   :  { %5338 = vst [vmem:[#allocation81_spill] sm:$0xff] %v3615_v44  ;;  %5339 = vst [vmem:[#allocation82_spill] sm:$0xff] %v3617_v13  ;;  %2712 = vrcp.f32 %v1112_v4  ;;  %1360 = vmax.xlane.f32.xlu1 %v1359_v41  ;;  %v833_v7 = vmax.f32 %v832_v63, %v3437_v30  ;;  %v1362_v52 = vmax.f32 %v3423_v24, %v3431_v0  ;;  %v3629_v57 = vpop.f32.mrb[56].mxu0  ;;  %v5343_v24 = vld [vmem:[#allocation47_spill] sm:$0xff] }
 0x1c2   :  { %v841_v16 = vmax.f32 %v5340_v42, %v3433_v49  ;;  %v1365_v55 = vmax.f32 %v3458_v27, %v3464_v28  ;;  %v1190_v56 = vrot.slane %v1189_v32, 2  ;;  %v1196_v54 = vadd.f32 %v3617_v13, %v1195_v60  ;;  %v3633_v17 = vpop.f32.mrb[57].mxu0 }
 0x1c3   :  { %2714 = vpow2.f32 %v1003_v10  ;;  %v834_v4 = vrot.slane %v833_v7, 4  ;;  %v867_v63 = vmax.f32 %v3479_v37, %v3484_v20  ;;  %v876_v41 = vmax.f32 %v3482_v50, %v3491_v2  ;;  %v3639_v42 = vpop.f32.mrb[58].mxu0  ;;  %v5342_v10 = vld [vmem:[#allocation49_spill] sm:$0xff] }
 0x1c4   :  { %v842_v18 = vmax.f32 %v841_v16, %v3443_v39  ;;  %2716 = vpow2.f32 %v1011_v5  ;;  %v3641_v28 = vpop.eup %2698  ;;  %v1191_v27 = vadd.f32 %v1190_v56, %v1189_v32  ;;  %v1197_v0 = vrot.slane %v1196_v54, 4  ;;  %v3645_v9 = vpop.f32.mrb[59].mxu0 }
 0x1c5   :  { %5341 = vst [vmem:[#allocation83_spill] sm:$0xff] %v3641_v28  ;;  %v1368_v16 = vmax.f32 %v5343_v24, %v5342_v10  ;;  %v3647_v5 = vpop.f32.mrb[44].mxu1  ;;  %v3649_v8 = vpop.eup %2700  ;;  %v835_v13 = vmax.f32 %v833_v7, %v834_v4  ;;  %1363 = vmax.xlane.f32.xlu1 %v1362_v52  ;;  %v868_v34 = vmax.f32 %v867_v63, %v3516_v12 }
 0x1c6   :  { %v843_v60 = vrot.slane %v842_v18, 4  ;;  %5344 = vst [vmem:[#allocation84_spill] sm:$0xff] %v3647_v5  ;;  %5345 = vst [vmem:[#allocation85_spill] sm:$0xff] %v3649_v8  ;;  %v877_v32 = vmax.f32 %v876_v41, %v3523_v53  ;;  %v3655_v56 = vpop.f32.mrb[45].mxu1  ;;  %v3657_v38 = vpop.eup %2702  ;;  %v1192_v10 = vrot.slane %v1191_v27, 1  ;;  %v1198_v24 = vadd.f32 %v1197_v0, %v1196_v54 }
 0x1c7   :  { %5347 = vst [vmem:[#allocation53_spill] sm:$0xff] %v3655_v56  ;;  %5348 = vst [vmem:[#allocation86_spill] sm:$0xff] %v3657_v38  ;;  %v1131_v11 = vadd.f32 %v3649_v8, %v3641_v28  ;;  %v3661_v3 = vpop.f32.mrb[46].mxu1  ;;  %v3663_v7 = vpop.eup %2704  ;;  %v836_v52 = vrot.slane %v835_v13, 2  ;;  %v869_v4 = vmax.f32 %v868_v34, %v3530_v31 }
 0x1c8   :  { %v844_v5 = vmax.f32 %v842_v18, %v843_v60  ;;  %5349 = vst [vmem:[#allocation87_spill] sm:$0xff] %v3661_v3  ;;  %5350 = vst [vmem:[#allocation88_spill] sm:$0xff] %v3663_v7  ;;  %v878_v63 = vmax.f32 %v877_v32, %v3536_v48  ;;  %v3669_v15 = vpop.f32.mrb[47].mxu1  ;;  %v3671_v38 = vpop.eup %2706  ;;  %v1193_v0 = vadd.f32 %v1192_v10, %v1191_v27  ;;  %v1199_v54 = vrot.slane %v1198_v24, 2 }
 0x1c9   :  { %5351 = vst [vmem:[#allocation89_spill] sm:$0xff] %v3669_v15  ;;  %5352 = vst [vmem:[#allocation90_spill] sm:$0xff] %v3671_v38  ;;  %v1132_v18 = vadd.f32 %v3663_v7, %v1131_v11  ;;  %v3674_v8 = vpop.eup %2708  ;;  %v837_v28 = vmax.f32 %v835_v13, %v836_v52  ;;  %1366 = vmax.xlane.f32.xlu1 %v1365_v55  ;;  %v870_v3 = vrot.slane %v869_v4, 4  ;;  %v3678_v56 = vpop.f32.mrb[60].mxu0 }
 0x1ca   :  { %v845_v60 = vrot.slane %v844_v5, 2  ;;  %5353 = vst [vmem:[#allocation91_spill] sm:$0xff] %v3674_v8  ;;  %v879_v34 = vrot.slane %v878_v63, 4  ;;  %v3680_v41 = vpop.eup %2710  ;;  %2718 = vrcp.f32 %v1193_v0  ;;  %v1200_v15 = vadd.f32 %v1199_v54, %v1198_v24  ;;  %v3683_v11 = vpop.f32.mrb[61].mxu0 }
 0x1cb   :  { %5354 = vst [vmem:[#allocation92_spill] sm:$0xff] %v3680_v41  ;;  %v1133_v27 = vadd.f32 %v3671_v38, %v1132_v18  ;;  %v3685_v7 = vpop.eup %2712  ;;  %v1140_v13 = vadd.f32 %v3680_v41, %v3674_v8  ;;  %v838_v55 = vrot.slane %v837_v28, 1  ;;  %v871_v52 = vmax.f32 %v869_v4, %v870_v3  ;;  %v3689_v32 = vpop.f32.mrb[62].mxu0 }
 0x1cc   :  { %v846_v10 = vmax.f32 %v844_v5, %v845_v60  ;;  %5355 = vst [vmem:[#allocation93_spill] sm:$0xff] %v3685_v7  ;;  %v880_v44 = vmax.f32 %v878_v63, %v879_v34  ;;  %v1201_v46 = vrot.slane %v1200_v15, 1  ;;  %v3695_v54 = vpop.f32.mrb[63].mxu0  ;;  %v3697_v18 = vpop.f32.mrb[48].mxu1  ;;  %v1383_v5 = vmax.f32 %v3577_v40, %v3584_v51 }
 0x1cd   :  { %v3691_v6 = vpop.eup %2714  ;;  %v1134_v0 = vrot.slane %v1133_v27, 4  ;;  %5356 = vst [vmem:[#allocation94_spill] sm:$0xff] %v3695_v54  ;;  %5357 = vst [vmem:[#allocation95_spill] sm:$0xff] %v3697_v18  ;;  %v839_v3 = vmax.f32 %v837_v28, %v838_v55  ;;  %1369 = vmax.xlane.f32.xlu1 %v1368_v16  ;;  %v872_v4 = vrot.slane %v871_v52, 2  ;;  %v3702_v34 = vpop.f32.mrb[49].mxu1 }
 0x1ce   :  { %v847_v24 = vrot.slane %v846_v10, 1  ;;  %v3699_v60 = vpop.eup %2716  ;;  %v1141_v38 = vadd.f32 %v3691_v6, %v1140_v13  ;;  %v881_v63 = vrot.slane %v880_v44, 2  ;;  %5358 = vst [vmem:[#allocation96_spill] sm:$0xff] %v3702_v34  ;;  %v1202_v41 = vadd.f32 %v1201_v46, %v1200_v15  ;;  %v3706_v48 = vpop.f32.mrb[50].mxu1  ;;  %1384 = vmax.xlane.f32.xlu0 %v1383_v5  ;;  %v5399_v34 = vld [vmem:[#allocation18_spill] sm:$0xff] }
 0x1cf   :  { %v1135_v8 = vadd.f32 %v1134_v0, %v1133_v27  ;;  %5359 = vst [vmem:[#allocation97_spill] sm:$0xff] %v3706_v48  ;;  %v919_v35 = vsub.f32 %v3397_v47, %v839_v3  ;;  %v923_v13 = vsub.f32 %v3406_v1, %v839_v3  ;;  %v927_v28 = vsub.f32 %v3425_v14, %v839_v3  ;;  %v3712_v16 = vpop.f32.mrb[51].mxu1 }
 0x1d0   :  { %v848_v7 = vmax.f32 %v846_v10, %v847_v24  ;;  %v1142_v18 = vadd.f32 %v3699_v60, %v1141_v38  ;;  %5360 = vst [vmem:[#allocation98_spill] sm:$0xff] %v3712_v16  ;;  %2720 = vrcp.f32 %v1202_v41  ;;  %v931_v15 = vsub.f32 %v3437_v30, %v839_v3 }
 0x1d1   :  { %v1136_v55 = vrot.slane %v1135_v8, 2  ;;  %v1017_v10 = vmul.f32 1.442695, %v919_v35  ;;  %v1025_v0 = vmul.f32 1.442695, %v923_v13  ;;  %v5361_v47 = vmax.f32 %v5346_v33, %v3509_v21 }
 0x1d2   :  { %v920_v46 = vsub.f32 %v3401_v29, %v848_v7  ;;  %v1143_v27 = vrot.slane %v1142_v18, 4  ;;  %v924_v38 = vsub.f32 %v3409_v59, %v848_v7  ;;  %v1033_v14 = vmul.f32 1.442695, %v927_v28 }
 0x1d3   :  { %1372 = vmax.xlane.f32.xlu1 %v5361_v47  ;;  %v1137_v1 = vadd.f32 %v1136_v55, %v1135_v8  ;;  %v1041_v24 = vmul.f32 1.442695, %v931_v15  ;;  %v928_v41 = vsub.f32 %v3433_v49, %v848_v7  ;;  %2722 = vpow2.f32 %v1017_v10  ;;  %v3724_v13 = vpop.f32.mrb[52].mxu1 }
 0x1d4   :  { %v1144_v51 = vadd.f32 %v1143_v27, %v1142_v18  ;;  %v932_v30 = vsub.f32 %v3443_v39, %v848_v7  ;;  %v1019_v29 = vmul.f32 1.442695, %v920_v46  ;;  %v3722_v5 = vpop.eup %2718  ;;  %2724 = vpow2.f32 %v1025_v0  ;;  %5362 = vst [vmem:[#allocation99_spill] sm:$0xff] %v3724_v13  ;;  %v3729_v18 = vpop.f32.mrb[53].mxu1 }
 0x1d5   :  { %v1138_v35 = vrot.slane %v1137_v1, 1  ;;  %v1027_v3 = vmul.f32 1.442695, %v924_v38  ;;  %v1035_v59 = vmul.f32 1.442695, %v928_v41  ;;  %2726 = vpow2.f32 %v1033_v14  ;;  %5364 = vst [vmem:[#allocation100_spill] sm:$0xff] %v3729_v18 }
 0x1d6   :  { %v1145_v40 = vrot.slane %v1144_v51, 2  ;;  %v1043_v8 = vmul.f32 1.442695, %v932_v30  ;;  %v873_v28 = vmax.f32 %v871_v52, %v872_v4  ;;  %v5363_v49 = vmax.f32 %v3514_v45, %v3521_v58  ;;  %v3733_v15 = vpop.f32.mrb[54].mxu1  ;;  %v5385_v18 = vld [vmem:[#allocation16_spill] sm:$0xff] }
 0x1d7   :  { %v1139_v39 = vadd.f32 %v1138_v35, %v1137_v1  ;;  %2728 = vpow2.f32 %v1041_v24  ;;  %v882_v7 = vmax.f32 %v880_v44, %v881_v63  ;;  %v1386_v55 = vmax.f32 %v3590_v36, %v3597_v23  ;;  %5365 = vst [vmem:[#allocation101_spill] sm:$0xff] %v3733_v15  ;;  %v3737_v4 = vpop.f32.mrb[55].mxu1  ;;  %v5396_v15 = vld [vmem:[#allocation13_spill] sm:$0xff] }
 0x1d8   :  { %1375 = vmax.xlane.f32.xlu1 %v5363_v49  ;;  %v1146_v46 = vadd.f32 %v1145_v40, %v1144_v51  ;;  %2730 = vpow2.f32 %v1019_v29  ;;  %v874_v27 = vrot.slane %v873_v28, 1  ;;  %v1389_v52 = vmax.f32 %v3629_v57, %v3633_v17  ;;  %5366 = vst [vmem:[#allocation102_spill] sm:$0xff] %v3737_v4  ;;  %v5392_v4 = vld [vmem:[#allocation12_spill] sm:$0xff]  ;;  %v5418_v40 = vld [vmem:[#allocation26_spill] sm:$0xff] }
 0x1d9   :  { %2732 = vrcp.f32 %v1139_v39  ;;  %v883_v10 = vrot.slane %v882_v7, 1  ;;  %v1395_v44 = vmax.f32 %v3678_v56, %v3683_v11  ;;  %v5367_v51 = vmax.f32 %v3542_v25, %v3544_v26 }
 0x1da   :  { %v1147_v63 = vrot.slane %v1146_v46, 1  ;;  %2734 = vpow2.f32 %v1027_v3  ;;  %v875_v38 = vmax.f32 %v873_v28, %v874_v27  ;;  %1390 = vmax.xlane.f32.xlu0 %v1389_v52  ;;  %v3748_v47 = vpop.eup %2720  ;;  %v5372_v27 = vld [vmem:[#allocation60_spill] sm:$0xff] }
 0x1db   :  { %2736 = vpow2.f32 %v1035_v59  ;;  %v884_v1 = vmax.f32 %v882_v7, %v883_v10  ;;  %v3760_v49 = vpop.f32.mrb[56].mxu1 }
 0x1dc   :  { %1378 = vmax.xlane.f32.xlu1 %v5367_v51  ;;  %v1148_v41 = vadd.f32 %v1147_v63, %v1146_v46  ;;  %2738 = vpow2.f32 %v1043_v8  ;;  %v935_v30 = vsub.f32 %v3479_v37, %v875_v38  ;;  %v939_v29 = vsub.f32 %v3484_v20, %v875_v38  ;;  %5368 = vst [vmem:[#allocation103_spill] sm:$0xff] %v3760_v49  ;;  %v5369_v37 = vld [vmem:[#allocation62_spill] sm:$0xff] }
 0x1dd   :  { %v943_v35 = vsub.f32 %v3516_v12, %v875_v38  ;;  %v947_v3 = vsub.f32 %v3530_v31, %v875_v38  ;;  %v936_v28 = vsub.f32 %v3482_v50, %v884_v1  ;;  %v940_v59 = vsub.f32 %v3491_v2, %v884_v1  ;;  %v3762_v39 = vpop.eup %2722  ;;  %v3768_v12 = vpop.f32.mrb[57].mxu1 }
 0x1de   :  { %2740 = vrcp.f32 %v1148_v41  ;;  %v1049_v7 = vmul.f32 1.442695, %v935_v30  ;;  %v1057_v46 = vmul.f32 1.442695, %v939_v29  ;;  %v944_v8 = vsub.f32 %v3523_v53, %v884_v1  ;;  %1396 = vmax.xlane.f32.xlu0 %v1395_v44  ;;  %5371 = vst [vmem:[#allocation62_spill] sm:$0xff] %v3768_v12  ;;  %v3770_v31 = vpop.eup %2724  ;;  %v3777_v41 = vpop.f32.mrb[58].mxu1 }
 0x1df   :  { %v5370_v20 = vmax.f32 %v3547_v62, %v5369_v37  ;;  %v1065_v50 = vmul.f32 1.442695, %v943_v35  ;;  %v1073_v2 = vmul.f32 1.442695, %v947_v3  ;;  %v948_v52 = vsub.f32 %v5372_v27, %v884_v1  ;;  %v3773_v63 = vpop.eup %2726  ;;  %5373 = vst [vmem:[#allocation60_spill] sm:$0xff] %v3777_v41  ;;  %v3781_v29 = vpop.f32.mrb[59].mxu1 }
 0x1e0   :  { %v1051_v10 = vmul.f32 1.442695, %v936_v28  ;;  %v1167_v38 = vadd.f32 %v3770_v31, %v3762_v39  ;;  %2742 = vpow2.f32 %v1049_v7  ;;  %v1059_v53 = vmul.f32 1.442695, %v940_v59  ;;  %5374 = vst [vmem:[#allocation104_spill] sm:$0xff] %v3781_v29  ;;  %v5425_v28 = vld [vmem:[#allocation22_spill] sm:$0xff] }
 0x1e1   :  { %1381 = vmax.xlane.f32.xlu1 %v5370_v20  ;;  %v1067_v51 = vmul.f32 1.442695, %v944_v8  ;;  %v3779_v44 = vpop.eup %2728  ;;  %2744 = vpow2.f32 %v1057_v46  ;;  %v1075_v30 = vmul.f32 1.442695, %v948_v52  ;;  %v5422_v8 = vld [vmem:[#allocation27_spill] sm:$0xff] }
 0x1e2   :  { %v3787_v24 = vpop.eup %2730  ;;  %v1168_v7 = vadd.f32 %v3773_v63, %v1167_v38  ;;  %2746 = vpow2.f32 %v1065_v50  ;;  %v5393_v38 = vld [vmem:[#allocation32_spill] sm:$0xff] }
 0x1e3   :  { %v3794_v0 = vpop.eup %2732  ;;  %2748 = vpow2.f32 %v1073_v2  ;;  %v3813_v27 = vpop.f32.mrb[60].mxu1  ;;  %v5388_v2 = vmax.f32 %v3639_v42, %v3645_v9  ;;  %v3834_v29 = vmul.f32 %v5393_v38, %v5392_v4 }
 0x1e4   :  { %v3802_v50 = vpop.eup %2734  ;;  %2750 = vpow2.f32 %v1051_v10  ;;  %5384 = vst [vmem:[#allocation105_spill] sm:$0xff] %v3813_v27  ;;  %v3826_v12 = vpop.f32.mrb[61].mxu1 }
 0x1e5   :  { %1387 = vmax.xlane.f32.xlu1 %v1386_v55  ;;  %v1169_v55 = vadd.f32 %v3779_v44, %v1168_v7  ;;  %v3809_v14 = vpop.eup %2736  ;;  %v1176_v35 = vadd.f32 %v3802_v50, %v3787_v24  ;;  %2752 = vpow2.f32 %v1059_v53  ;;  %v5386_v7 = vld [vmem:[#allocation34_spill] sm:$0xff]  ;;  %v5390_v53 = vld [vmem:[#allocation17_spill] sm:$0xff]  ;;  %5394 = vst [vmem:[#allocation12_spill] sm:$0xff] %v3834_v29  ;;  %v3837_v41 = vpop.f32.mrb[62].mxu1 }
 0x1e6   :  { %v3819_v10 = vmul.f32 %v5386_v7, %v5385_v18  ;;  %v3821_v13 = vpop.eup %2738  ;;  %2754 = vpow2.f32 %v1067_v51  ;;  %5389 = vst [vmem:[#allocation34_spill] sm:$0xff] %v3826_v12  ;;  %v3830_v49 = vmul.f32 %v5386_v7, %v5390_v53  ;;  %5395 = vst [vmem:[#allocation32_spill] sm:$0xff] %v3837_v41  ;;  %v3847_v48 = vpop.f32.mrb[63].mxu1  ;;  %v5413_v41 = vld [vmem:[#allocation20_spill] sm:$0xff] }
 0x1e7   :  { %v1170_v52 = vrot.slane %v1169_v55, 4  ;;  %v1177_v18 = vadd.f32 %v3809_v14, %v1176_v35  ;;  %2756 = vpow2.f32 %v1075_v30  ;;  %5398 = vst [vmem:[#allocation106_spill] sm:$0xff] %v3847_v48  ;;  %v3853_v30 = vmul.f32 %v5386_v7, %v5399_v34  ;;  %v5401_v35 = vld [vmem:[#allocation19_spill] sm:$0xff] }
 0x1e8   :  { %5387 = vst [vmem:[#allocation16_spill] sm:$0xff] %v3819_v10  ;;  %5391 = vst [vmem:[#allocation17_spill] sm:$0xff] %v3830_v49  ;;  %v3845_v16 = vpop.eup %2740  ;;  %v3857_v1 = vmul.f32 %v5386_v7, %v5401_v35  ;;  %v5405_v10 = vmax.f32 %v3689_v32, %v3695_v54  ;;  %v5411_v49 = vld [vmem:[#allocation25_spill] sm:$0xff]  ;;  %v5437_v54 = vld [vmem:[#allocation44_spill] sm:$0xff] }
 0x1e9   :  { %1393 = vmax.xlane.f32.xlu1 %v5388_v2  ;;  %v3843_v2 = vmul.f32 %v5393_v38, %v5396_v15  ;;  %v1171_v53 = vadd.f32 %v1170_v52, %v1169_v55  ;;  %5400 = vst [vmem:[#allocation18_spill] sm:$0xff] %v3853_v30  ;;  %v1178_v51 = vadd.f32 %v3821_v13, %v1177_v18  ;;  %v5403_v55 = vld [vmem:[#allocation14_spill] sm:$0xff]  ;;  %v5406_v18 = vld [vmem:[#allocation15_spill] sm:$0xff]  ;;  %v5408_v15 = vld [vmem:[#allocation24_spill] sm:$0xff] }
 0x1ea   :  { %5402 = vst [vmem:[#allocation19_spill] sm:$0xff] %v3857_v1  ;;  %v3866_v12 = vmul.f32 %v5393_v38, %v5403_v55  ;;  %v3868_v4 = vpop.eup %2742  ;;  %v3877_v35 = vmul.f32 %v5393_v38, %v5406_v18  ;;  %v5409_v52 = vld [vmem:[#allocation56_spill] sm:$0xff]  ;;  %v5416_v7 = vld [vmem:[#allocation21_spill] sm:$0xff] }
 0x1eb   :  { %5397 = vst [vmem:[#allocation13_spill] sm:$0xff] %v3843_v2  ;;  %v1172_v34 = vrot.slane %v1171_v53, 2  ;;  %v3881_v29 = vmul.f32 %v5409_v52, %v5408_v15  ;;  %v3883_v55 = vpop.eup %2744  ;;  %v1179_v2 = vrot.slane %v1178_v51, 4  ;;  %v3887_v48 = vmul.f32 %v5409_v52, %v5411_v49  ;;  %v3909_v59 = vpop.f32.mrb[64].mxu1 }
 0x1ec   :  { %5404 = vst [vmem:[#allocation14_spill] sm:$0xff] %v3866_v12  ;;  %5407 = vst [vmem:[#allocation15_spill] sm:$0xff] %v3877_v35  ;;  %v3897_v38 = vpop.eup %2746  ;;  %v1203_v15 = vadd.f32 %v3883_v55, %v3868_v4  ;;  %v3905_v49 = vmul.f32 %v5409_v52, %v5418_v40  ;;  %v3919_v1 = vmul.f32 %v5409_v52, %v5422_v8 }
 0x1ed   :  { %1399 = vmax.xlane.f32.xlu1 %v5405_v10  ;;  %5410 = vst [vmem:[#allocation24_spill] sm:$0xff] %v3881_v29  ;;  %5412 = vst [vmem:[#allocation56_spill] sm:$0xff] %v3887_v48  ;;  %v5414_v10 = vld [vmem:[#allocation51_spill] sm:$0xff]  ;;  %v1173_v18 = vadd.f32 %v1172_v34, %v1171_v53  ;;  %v3907_v46 = vpop.eup %2748  ;;  %v5431_v48 = vld [vmem:[#allocation42_spill] sm:$0xff] }
 0x1ee   :  { %v3891_v27 = vmul.f32 %v5414_v10, %v5413_v41  ;;  %v3895_v30 = vmul.f32 %v5414_v10, %v5416_v7  ;;  %5419 = vst [vmem:[#allocation51_spill] sm:$0xff] %v3905_v49  ;;  %v1180_v41 = vadd.f32 %v1179_v2, %v1178_v51  ;;  %5420 = vst [vmem:[#allocation21_spill] sm:$0xff] %v3909_v59  ;;  %v3911_v7 = vpop.f32.mrb[64].mxu0  ;;  %v3921_v12 = vpop.eup %2750  ;;  %v5427_v53 = vld [vmem:[#allocation23_spill] sm:$0xff] }
 0x1ef   :  { %5421 = vst [vmem:[#allocation26_spill] sm:$0xff] %v3911_v7  ;;  %5423 = vst [vmem:[#allocation27_spill] sm:$0xff] %v3919_v1  ;;  %v1174_v40 = vrot.slane %v1173_v18, 1  ;;  %v1204_v35 = vadd.f32 %v3897_v38, %v1203_v15  ;;  %v3924_v51 = vpop.f32.mrb[65].mxu1  ;;  %v391_v2 = vpop.f32.mrb[65].mxu0  ;;  %v3928_v20 = vmul.f32 %v5414_v10, %v5425_v28  ;;  %v3932_v29 = vmul.f32 %v5414_v10, %v5427_v53  ;;  %v5432_v28 = vld [vmem:[#allocation80_spill] sm:$0xff] }
 0x1f0   :  { %5415 = vst [vmem:[#allocation25_spill] sm:$0xff] %v3891_v27  ;;  %5417 = vst [vmem:[#allocation20_spill] sm:$0xff] %v3895_v30  ;;  %v3934_v34 = vpop.eup %2752  ;;  %v1181_v8 = vrot.slane %v1180_v41, 2  ;;  %v3936_v52 = vpop.f32.mrb[66].mxu1  ;;  %v3946_v3 = vmul.f32 %v5432_v28, %v5431_v48  ;;  %v5440_v48 = vld [vmem:[#allocation37_spill] sm:$0xff] }
 0x1f1   :  { %5424 = vst [vmem:[#allocation107_spill] sm:$0xff] %v3924_v51  ;;  %5426 = vst [vmem:[#allocation22_spill] sm:$0xff] %v3928_v20  ;;  %v3940_v15 = vpop.f32.mrb[66].mxu0  ;;  %v3948_v19 = vpop.eup %2754  ;;  %v1175_v10 = vadd.f32 %v1174_v40, %v1173_v18  ;;  %v1205_v53 = vadd.f32 %v3907_v46, %v1204_v35  ;;  %v1212_v22 = vadd.f32 %v3934_v34, %v3921_v12  ;;  %v5441_v20 = vld [vmem:[#allocation73_spill] sm:$0xff] }
 0x1f2   :  { %5428 = vst [vmem:[#allocation23_spill] sm:$0xff] %v3932_v29  ;;  %5429 = vst [vmem:[#allocation108_spill] sm:$0xff] %v3936_v52  ;;  %v3953_v43 = vpop.f32.mrb[67].mxu1  ;;  %v395_v27 = vpop.f32.mrb[67].mxu0  ;;  %v1182_v30 = vadd.f32 %v1181_v8, %v1180_v41  ;;  %v3970_v51 = vmul.f32 %v5432_v28, %v5437_v54  ;;  %v3976_v18 = vmul.f32 %v5441_v20, %v5440_v48 }
 0x1f3   :  { %5430 = vst [vmem:[#allocation109_spill] sm:$0xff] %v3940_v15  ;;  %5433 = vst [vmem:[#allocation42_spill] sm:$0xff] %v3946_v3  ;;  %v3957_v59 = vpop.eup %2756  ;;  %v1594_v40 = vpack.c.bf16 %v395_v27, %v391_v2  ;;  %v3963_v35 = vpop.f32.mrb[68].mxu0  ;;  %2758 = vrcp.f32 %v1175_v10  ;;  %v1206_v49 = vrot.slane %v1205_v53, 4  ;;  %v1213_v1 = vadd.f32 %v3948_v19, %v1212_v22  ;;  %v5443_v27 = vld [vmem:[#allocation39_spill] sm:$0xff]  ;;  %v5445_v10 = vld [vmem:[#allocation46_spill] sm:$0xff] }
 0x1f4   :  { %5434 = vst [vmem:[#allocation80_spill] sm:$0xff] %v3953_v43  ;;  %5435 = vst [vmem:[#allocation110_spill] sm:$0xff] %v3963_v35  ;;  %v3966_v61 = vpop.f32.mrb[69].mxu0  ;;  %v1183_v41 = vrot.slane %v1182_v30, 1  ;;  %v3980_v2 = vmul.f32 %v5441_v20, %v5443_v27  ;;  %v3984_v22 = vmul.f32 %v5432_v28, %v5445_v10  ;;  %v5448_v15 = vld [vmem:[#allocation48_spill] sm:$0xff]  ;;  %v3995_v52 = vpop.f32.mrb[68].mxu1 }
 0x1f5   :  { %5436 = vst [vmem:[#allocation111_spill] sm:$0xff] %v3966_v61  ;;  %5438 = vst [vmem:[#allocation44_spill] sm:$0xff] %v3970_v51  ;;  %v3972_v8 = vpop.f32.mrb[70].mxu0  ;;  %1657 = vmatprep.mubr.bf16.mxu0 %v1594_v40  ;;  %v1207_v29 = vadd.f32 %v1206_v49, %v1205_v53  ;;  %v1214_v54 = vadd.f32 %v3957_v59, %v1213_v1  ;;  %v3993_v48 = vmul.f32 %v5432_v28, %v5448_v15  ;;  %v4005_v3 = vpop.f32.mrb[69].mxu1  ;;  %v5454_v28 = vld [vmem:[#allocation40_spill] sm:$0xff]  ;;  %v5458_v51 = vld [vmem:[#allocation41_spill] sm:$0xff] }
 0x1f6   :  { %5439 = vst [vmem:[#allocation112_spill] sm:$0xff] %v3972_v8  ;;  %5442 = vst [vmem:[#allocation37_spill] sm:$0xff] %v3976_v18  ;;  %v3987_v7 = vpop.f32.mrb[71].mxu0  ;;  %v1184_v43 = vadd.f32 %v1183_v41, %v1182_v30  ;;  %v4013_v41 = vmul.f32 %v5441_v20, %v5454_v28  ;;  %v4015_v27 = vpop.f32.mrb[70].mxu1  ;;  %v4021_v1 = vmul.f32 %v5441_v20, %v5458_v51  ;;  %v5460_v18 = vld [vmem:[#allocation74_spill] sm:$0xff]  ;;  %v5462_v35 = vld [vmem:[#allocation76_spill] sm:$0xff] }
 0x1f7   :  { %5444 = vst [vmem:[#allocation73_spill] sm:$0xff] %v3980_v2  ;;  %5446 = vst [vmem:[#allocation39_spill] sm:$0xff] %v3984_v22  ;;  %v4001_v53 = vpop.f32.mrb[72].mxu0  ;;  %v1208_v10 = vrot.slane %v1207_v29, 2  ;;  %v1215_v40 = vrot.slane %v1214_v54, 4  ;;  %v4025_v2 = vmul.f32 %v3748_v47, %v5460_v18  ;;  %v4029_v30 = vmul.f32 %v3748_v47, %v5462_v35  ;;  %v5466_v61 = vld [vmem:[#allocation65_spill] sm:$0xff] }
 0x1f8   :  { %5447 = vst [vmem:[#allocation46_spill] sm:$0xff] %v3987_v7  ;;  %5449 = vst [vmem:[#allocation48_spill] sm:$0xff] %v3993_v48  ;;  %v4007_v15 = vpop.f32.mrb[73].mxu0  ;;  %2760 = vrcp.f32 %v1184_v43  ;;  %v4033_v48 = vpop.f32.mrb[71].mxu1  ;;  %v4039_v20 = vmul.f32 %v3722_v5, %v5466_v61 }
 0x1f9   :  { %5450 = vst [vmem:[#allocation113_spill] sm:$0xff] %v3995_v52  ;;  %5451 = vst [vmem:[#allocation114_spill] sm:$0xff] %v4001_v53  ;;  %v4017_v49 = vpop.f32.mrb[74].mxu0  ;;  %v1209_v22 = vadd.f32 %v1208_v10, %v1207_v29  ;;  %v1216_v28 = vadd.f32 %v1215_v40, %v1214_v54  ;;  %v5470_v52 = vld [vmem:[#allocation67_spill] sm:$0xff] }
 0x1fa   :  { %5452 = vst [vmem:[#allocation115_spill] sm:$0xff] %v4005_v3  ;;  %5453 = vst [vmem:[#allocation116_spill] sm:$0xff] %v4007_v15  ;;  %v4035_v8 = vpop.f32.mrb[75].mxu0  ;;  %v4057_v51 = vmul.f32 %v3722_v5, %v5470_v52  ;;  %v5475_v3 = vld [vmem:[#allocation82_spill] sm:$0xff] }
 0x1fb   :  { %5455 = vst [vmem:[#allocation40_spill] sm:$0xff] %v4013_v41  ;;  %5456 = vst [vmem:[#allocation117_spill] sm:$0xff] %v4015_v27  ;;  %v4047_v35 = vpop.f32.mrb[76].mxu0  ;;  %v1210_v40 = vrot.slane %v1209_v22, 1  ;;  %v1217_v10 = vrot.slane %v1216_v28, 2  ;;  %v5473_v27 = vld [vmem:[#allocation78_spill] sm:$0xff]  ;;  %v4067_v54 = vmul.f32 %v3748_v47, %v5475_v3 }
 0x1fc   :  { %5457 = vst [vmem:[#allocation118_spill] sm:$0xff] %v4017_v49  ;;  %5459 = vst [vmem:[#allocation41_spill] sm:$0xff] %v4021_v1  ;;  %v4051_v43 = vpop.f32.mrb[77].mxu0  ;;  %v4063_v29 = vmul.f32 %v3748_v47, %v5473_v27  ;;  %v5477_v41 = vld [vmem:[#allocation69_spill] sm:$0xff]  ;;  %v4087_v15 = vpop.f32.mrb[72].mxu1  ;;  %v5489_v27 = vld [vmem:[#allocation58_spill] sm:$0xff] }
 0x1fd   :  { %5461 = vst [vmem:[#allocation74_spill] sm:$0xff] %v4025_v2  ;;  %5463 = vst [vmem:[#allocation76_spill] sm:$0xff] %v4029_v30  ;;  %v4059_v18 = vpop.f32.mrb[78].mxu0  ;;  %v4071_v1 = vmul.f32 %v3722_v5, %v5477_v41  ;;  %v4077_v52 = vpop.eup %2758  ;;  %v1211_v2 = vadd.f32 %v1210_v40, %v1209_v22  ;;  %v1218_v30 = vadd.f32 %v1217_v10, %v1216_v28  ;;  %v5482_v49 = vld [vmem:[#allocation57_spill] sm:$0xff]  ;;  %v5498_v28 = vld [vmem:[#allocation59_spill] sm:$0xff] }
 0x1fe   :  { %5464 = vst [vmem:[#allocation119_spill] sm:$0xff] %v4033_v48  ;;  %5465 = vst [vmem:[#allocation120_spill] sm:$0xff] %v4035_v8  ;;  %v5479_v48 = vld [vmem:[#allocation70_spill] sm:$0xff]  ;;  %v4079_v53 = vpop.f32.mrb[79].mxu0  ;;  %v5483_v47 = vld [vmem:[#allocation93_spill] sm:$0xff] }
 0x1ff   :  { %5467 = vst [vmem:[#allocation65_spill] sm:$0xff] %v4039_v20  ;;  %5468 = vst [vmem:[#allocation121_spill] sm:$0xff] %v4047_v35  ;;  %v4075_v61 = vmul.f32 %v3722_v5, %v5479_v48  ;;  %v4085_v3 = vmul.f32 %v5483_v47, %v5482_v49  ;;  %v4093_v48 = vpop.f32.mrb[80].mxu0  ;;  %2762 = vrcp.f32 %v1211_v2  ;;  %v1219_v40 = vrot.slane %v1218_v30, 1  ;;  %v4099_v49 = vpop.f32.mrb[73].mxu1  ;;  %v5491_v20 = vld [vmem:[#allocation50_spill] sm:$0xff] }
 0x200   :  { %5469 = vst [vmem:[#allocation122_spill] sm:$0xff] %v4051_v43  ;;  %5471 = vst [vmem:[#allocation67_spill] sm:$0xff] %v4057_v51  ;;  %v4101_v10 = vpop.f32.mrb[81].mxu0  ;;  %v4105_v41 = vmul.f32 %v5483_v47, %v5489_v27  ;;  %v5492_v5 = vld [vmem:[#allocation86_spill] sm:$0xff]  ;;  %v4111_v35 = vpop.f32.mrb[74].mxu1  ;;  %v5506_v8 = vld [vmem:[#allocation55_spill] sm:$0xff] }
 0x201   :  { %5472 = vst [vmem:[#allocation123_spill] sm:$0xff] %v4059_v18  ;;  %5474 = vst [vmem:[#allocation78_spill] sm:$0xff] %v4063_v29  ;;  %v4109_v51 = vmul.f32 %v5492_v5, %v5491_v20  ;;  %v4113_v22 = vpop.f32.mrb[82].mxu0  ;;  %v5496_v29 = vld [vmem:[#allocation52_spill] sm:$0xff]  ;;  %v1220_v18 = vadd.f32 %v1219_v40, %v1218_v30  ;;  %v4141_v7 = vmul.f32 %v5492_v5, %v5506_v8  ;;  %v5515_v43 = vld [vmem:[#allocation83_spill] sm:$0xff] }
 0x202   :  { %5476 = vst [vmem:[#allocation82_spill] sm:$0xff] %v4067_v54  ;;  %5478 = vst [vmem:[#allocation69_spill] sm:$0xff] %v4071_v1  ;;  %v4117_v2 = vmul.f32 %v5492_v5, %v5496_v29  ;;  %v4121_v1 = vmul.f32 %v5483_v47, %v5498_v28  ;;  %v5502_v54 = vld [vmem:[#allocation54_spill] sm:$0xff]  ;;  %v4135_v29 = vpop.f32.mrb[83].mxu0 }
 0x203   :  { %5480 = vst [vmem:[#allocation70_spill] sm:$0xff] %v4075_v61  ;;  %5481 = vst [vmem:[#allocation124_spill] sm:$0xff] %v4079_v53  ;;  %v5500_v61 = vld [vmem:[#allocation61_spill] sm:$0xff]  ;;  %v4129_v20 = vmul.f32 %v5492_v5, %v5502_v54  ;;  %v4133_v53 = vpop.f32.mrb[75].mxu1  ;;  %v4149_v40 = vpop.f32.mrb[84].mxu0  ;;  %2764 = vrcp.f32 %v1220_v18  ;;  %v5510_v54 = vld [vmem:[#allocation91_spill] sm:$0xff]  ;;  %v4171_v18 = vmul.f32 %v3794_v0, %v5515_v43  ;;  %v4179_v5 = vmul.f32 %v3845_v16, %v3691_v6 }
 0x204   :  { %5484 = vst [vmem:[#allocation57_spill] sm:$0xff] %v4085_v3  ;;  %5485 = vst [vmem:[#allocation93_spill] sm:$0xff] %v4087_v15  ;;  %v4125_v27 = vmul.f32 %v5483_v47, %v5500_v61  ;;  %v2761_v61 = vpop.eup %2760  ;;  %v4153_v28 = vpop.f32.mrb[85].mxu0  ;;  %v4161_v30 = vmul.f32 %v3845_v16, %v5510_v54  ;;  %v5513_v47 = vld [vmem:[#allocation92_spill] sm:$0xff]  ;;  %v5524_v43 = vld [vmem:[#allocation90_spill] sm:$0xff]  ;;  %v4223_v15 = vmul.f32 %v4077_v52, %v3762_v39 }
 0x205   :  { %5486 = vst [vmem:[#allocation125_spill] sm:$0xff] %v4093_v48  ;;  %5487 = vst [vmem:[#allocation126_spill] sm:$0xff] %v4099_v49  ;;  %v4163_v3 = vpop.f32.mrb[86].mxu0  ;;  %v4237_v6 = vmul.f32 %v2761_v61, %v3821_v13  ;;  %v5606_v49 = vld [vmem:[#allocation96_spill] sm:$0xff] }
 0x206   :  { %5488 = vst [vmem:[#allocation127_spill] sm:$0xff] %v4101_v10  ;;  %5490 = vst [vmem:[#allocation58_spill] sm:$0xff] %v4105_v41  ;;  %v4167_v41 = vmul.f32 %v3845_v16, %v5513_v47  ;;  %v4181_v54 = vpop.f32.mrb[87].mxu0  ;;  %v5522_v47 = vld [vmem:[#allocation88_spill] sm:$0xff]  ;;  %v5624_v10 = vld [vmem:[#allocation34_spill] sm:$0xff] }
 0x207   :  { %5493 = vst [vmem:[#allocation50_spill] sm:$0xff] %v4109_v51  ;;  %5494 = vst [vmem:[#allocation86_spill] sm:$0xff] %v4111_v35  ;;  %v5517_v51 = vld [vmem:[#allocation85_spill] sm:$0xff]  ;;  %v5621_v48 = vld [vmem:[#allocation104_spill] sm:$0xff] }
 0x208   :  { %5495 = vst [vmem:[#allocation128_spill] sm:$0xff] %v4113_v22  ;;  %5497 = vst [vmem:[#allocation52_spill] sm:$0xff] %v4117_v2  ;;  %v4175_v8 = vmul.f32 %v3794_v0, %v5517_v51  ;;  %v4196_v51 = vmul.f32 %v2761_v61, %v3787_v24  ;;  %v4234_v2 = vmul.f32 %v2761_v61, %v3809_v14 }
 0x209   :  { %5499 = vst [vmem:[#allocation59_spill] sm:$0xff] %v4121_v1  ;;  %5501 = vst [vmem:[#allocation61_spill] sm:$0xff] %v4125_v27  ;;  %v4193_v1 = vmul.f32 %v3794_v0, %v5524_v43  ;;  %v4198_v27 = vpop.f32.mrb[76].mxu1  ;;  %v2763_v39 = vpop.eup %2762  ;;  %v4253_v14 = vmul.f32 %v4077_v52, %v3779_v44 }
 0x20a   :  { %5503 = vst [vmem:[#allocation54_spill] sm:$0xff] %v4129_v20  ;;  %5504 = vst [vmem:[#allocation129_spill] sm:$0xff] %v4133_v53  ;;  %v4185_v20 = vmul.f32 %v3845_v16, %v3699_v60  ;;  %v4204_v16 = vpop.f32.mrb[88].mxu0  ;;  %v4210_v43 = vpop.f32.mrb[77].mxu1  ;;  %v4219_v60 = vmul.f32 %v2761_v61, %v3802_v50  ;;  %v4241_v50 = vmul.f32 %v4077_v52, %v3773_v63 }
 0x20b   :  { %5505 = vst [vmem:[#allocation130_spill] sm:$0xff] %v4135_v29  ;;  %5507 = vst [vmem:[#allocation55_spill] sm:$0xff] %v4141_v7  ;;  %v4189_v7 = vmul.f32 %v3794_v0, %v5522_v47  ;;  %v4212_v24 = vpop.f32.mrb[89].mxu0  ;;  %v4225_v47 = vpop.f32.mrb[78].mxu1  ;;  %v4268_v44 = vmul.f32 %v2763_v39, %v3868_v4  ;;  %v4274_v13 = vmul.f32 %v2763_v39, %v3897_v38 }
 0x20c   :  { %5508 = vst [vmem:[#allocation131_spill] sm:$0xff] %v4149_v40  ;;  %5509 = vst [vmem:[#allocation132_spill] sm:$0xff] %v4153_v28  ;;  %v4227_v0 = vpop.f32.mrb[90].mxu0  ;;  %v4277_v63 = vmul.f32 %v2763_v39, %v3907_v46  ;;  %v5615_v40 = vld [vmem:[#allocation102_spill] sm:$0xff] }
 0x20d   :  { %5511 = vst [vmem:[#allocation91_spill] sm:$0xff] %v4161_v30  ;;  %5512 = vst [vmem:[#allocation133_spill] sm:$0xff] %v4163_v3  ;;  %v2765_v61 = vpop.eup %2764  ;;  %v5571_v30 = vld [vmem:[#allocation29_spill] sm:$0xff]  ;;  %v5618_v28 = vld [vmem:[#allocation62_spill] sm:$0xff] }
 0x20e   :  { %5514 = vst [vmem:[#allocation92_spill] sm:$0xff] %v4167_v41  ;;  %5516 = vst [vmem:[#allocation83_spill] sm:$0xff] %v4171_v18  ;;  %v4231_v18 = vmul.f32 %v4077_v52, %v3770_v31  ;;  %v4271_v52 = vmul.f32 %v2763_v39, %v3883_v55  ;;  %v4284_v31 = vmul.f32 %v2765_v61, %v3921_v12 }
 0x20f   :  { %5518 = vst [vmem:[#allocation85_spill] sm:$0xff] %v4175_v8  ;;  %5519 = vst [vmem:[#allocation134_spill] sm:$0xff] %v4179_v5  ;;  %v4247_v5 = vpop.f32.mrb[91].mxu0  ;;  %v4287_v4 = vmul.f32 %v2765_v61, %v3934_v34  ;;  %v4290_v55 = vmul.f32 %v2765_v61, %v3948_v19  ;;  %v4293_v38 = vmul.f32 %v2765_v61, %v3957_v59 }
 0x210   :  { %5520 = vst [vmem:[#allocation135_spill] sm:$0xff] %v4181_v54  ;;  %5521 = vst [vmem:[#allocation136_spill] sm:$0xff] %v4185_v20 }
 0x211   :  { %5523 = vst [vmem:[#allocation88_spill] sm:$0xff] %v4189_v7  ;;  %5525 = vst [vmem:[#allocation90_spill] sm:$0xff] %v4193_v1  ;;  %v4245_v1 = vpop.f32.mrb[79].mxu1 }
 0x212   :  { %5526 = vst [vmem:[#allocation137_spill] sm:$0xff] %v4196_v51  ;;  %5527 = vst [vmem:[#allocation138_spill] sm:$0xff] %v4198_v27  ;;  %v4281_v20 = vpop.f32.mrb[80].mxu1  ;;  %v5573_v51 = vld [vmem:[#allocation31_spill] sm:$0xff]  ;;  %v5599_v27 = vld [vmem:[#allocation84_spill] sm:$0xff] }
 0x213   :  { %5528 = vst [vmem:[#allocation139_spill] sm:$0xff] %v4204_v16  ;;  %5529 = vst [vmem:[#allocation140_spill] sm:$0xff] %v4210_v43  ;;  %v4295_v46 = vpop.f32.mrb[81].mxu1  ;;  %v5609_v16 = vld [vmem:[#allocation98_spill] sm:$0xff] }
 0x214   :  { %5530 = vst [vmem:[#allocation141_spill] sm:$0xff] %v4212_v24  ;;  %5531 = vst [vmem:[#allocation142_spill] sm:$0xff] %v4219_v60  ;;  %v4299_v7 = vpop.f32.mrb[82].mxu1  ;;  %v5570_v60 = vld [vmem:[#allocation28_spill] sm:$0xff] }
 0x215   :  { %5532 = vst [vmem:[#allocation143_spill] sm:$0xff] %v4223_v15  ;;  %5533 = vst [vmem:[#allocation144_spill] sm:$0xff] %v4225_v47  ;;  %v5600_v47 = vld [vmem:[#allocation53_spill] sm:$0xff]  ;;  %v5612_v24 = vld [vmem:[#allocation100_spill] sm:$0xff] }
 0x216   :  { %5534 = vst [vmem:[#allocation145_spill] sm:$0xff] %v4227_v0  ;;  %5535 = vst [vmem:[#allocation146_spill] sm:$0xff] %v4231_v18  ;;  %v5601_v43 = vmax.f32 %v5599_v27, %v5600_v47 }
 0x217   :  { %5536 = vst [vmem:[#allocation147_spill] sm:$0xff] %v4234_v2  ;;  %5537 = vst [vmem:[#allocation148_spill] sm:$0xff] %v4237_v6 }
 0x218   :  { %5538 = vst [vmem:[#allocation149_spill] sm:$0xff] %v4241_v50  ;;  %5539 = vst [vmem:[#allocation150_spill] sm:$0xff] %v4245_v1  ;;  %v5603_v1 = vld [vmem:[#allocation89_spill] sm:$0xff] }
 0x219   :  { %5540 = vst [vmem:[#allocation151_spill] sm:$0xff] %v4247_v5  ;;  %5541 = vst [vmem:[#allocation152_spill] sm:$0xff] %v4253_v14 }
 0x21a   :  { %5542 = vst [vmem:[#allocation153_spill] sm:$0xff] %v4268_v44  ;;  %5543 = vst [vmem:[#allocation154_spill] sm:$0xff] %v4271_v52  ;;  %v4307_v44 = vpop.f32.mrb[83].mxu1 }
 0x21b   :  { %5544 = vst [vmem:[#allocation155_spill] sm:$0xff] %v4274_v13  ;;  %5545 = vst [vmem:[#allocation156_spill] sm:$0xff] %v4277_v63  ;;  %v4311_v61 = vpop.f32.mrb[84].mxu1 }
 0x21c   :  { %5546 = vst [vmem:[#allocation157_spill] sm:$0xff] %v4281_v20  ;;  %5547 = vst [vmem:[#allocation158_spill] sm:$0xff] %v4284_v31  ;;  %v4313_v52 = vpop.f32.mrb[85].mxu1  ;;  %v5593_v20 = vld [vmem:[#allocation75_spill] sm:$0xff] }
 0x21d   :  { %5548 = vst [vmem:[#allocation159_spill] sm:$0xff] %v4287_v4  ;;  %5549 = vst [vmem:[#allocation160_spill] sm:$0xff] %v4290_v55  ;;  %v4315_v39 = vpop.f32.mrb[86].mxu1 }
 0x21e   :  { %5550 = vst [vmem:[#allocation161_spill] sm:$0xff] %v4293_v38  ;;  %5551 = vst [vmem:[#allocation162_spill] sm:$0xff] %v4295_v46  ;;  %v4319_v13 = vpop.f32.mrb[87].mxu1 }
 0x21f   :  { %5552 = vst [vmem:[#allocation163_spill] sm:$0xff] %v4299_v7  ;;  %5553 = vst [vmem:[#allocation164_spill] sm:$0xff] %v4307_v44  ;;  %v4323_v19 = vpop.f32.mrb[88].mxu1  ;;  %v5594_v7 = vld [vmem:[#allocation77_spill] sm:$0xff] }
 0x220   :  { %5554 = vst [vmem:[#allocation165_spill] sm:$0xff] %v4311_v61  ;;  %5555 = vst [vmem:[#allocation166_spill] sm:$0xff] %v4313_v52  ;;  %v4325_v63 = vpop.f32.mrb[89].mxu1  ;;  %v5595_v46 = vmax.f32 %v5593_v20, %v5594_v7 }
 0x221   :  { %5556 = vst [vmem:[#allocation167_spill] sm:$0xff] %v4315_v39  ;;  %5557 = vst [vmem:[#allocation168_spill] sm:$0xff] %v4319_v13  ;;  %v4327_v55 = vpop.f32.mrb[90].mxu1 }
 0x222   :  { %5558 = vst [vmem:[#allocation169_spill] sm:$0xff] %v4323_v19  ;;  %5559 = vst [vmem:[#allocation170_spill] sm:$0xff] %v4325_v63  ;;  %v4331_v38 = vpop.f32.mrb[91].mxu1 }
 0x223   :  { %5560 = vst [vmem:[#allocation171_spill] sm:$0xff] %v4327_v55  ;;  %5561 = vst [vmem:[#allocation172_spill] sm:$0xff] %v4331_v38  ;;  %v4335_v12 = vpop.f32.mrb[92].mxu1 }
 0x224   :  { %5562 = vst [vmem:[#allocation173_spill] sm:$0xff] %v4335_v12  ;;  %v4337_v4 = vpop.f32.mrb[93].mxu1 }
 0x225   :  { %5563 = vst [vmem:[#allocation174_spill] sm:$0xff] %v4337_v4  ;;  %v4339_v50 = vpop.f32.mrb[94].mxu1 }
 0x226   :  { %5564 = vst [vmem:[#allocation175_spill] sm:$0xff] %v4339_v50  ;;  %v4343_v14 = vpop.f32.mrb[95].mxu1 }
 0x227   :  { %5565 = vst [vmem:[#allocation176_spill] sm:$0xff] %v4343_v14 }
 0x22b   :  { %v4347_v59 = vpop.f32.mrb[96].mxu1 }
 0x22c   :  { %5566 = vst [vmem:[#allocation177_spill] sm:$0xff] %v4347_v59  ;;  %v4349_v6 = vpop.f32.mrb[97].mxu1 }
 0x22d   :  { %5567 = vst [vmem:[#allocation178_spill] sm:$0xff] %v4349_v6  ;;  %v4351_v15 = vpop.f32.mrb[98].mxu1 }
 0x22e   :  { %5568 = vst [vmem:[#allocation179_spill] sm:$0xff] %v4351_v15  ;;  %v4355_v18 = vpop.f32.mrb[99].mxu1  ;;  %v5572_v15 = vld [vmem:[#allocation30_spill] sm:$0xff] }
 0x22f   :  { %5569 = vst [vmem:[#allocation180_spill] sm:$0xff] %v4355_v18 }
 0x230   :  { %v1355_v34 = vpop.xlane.xlu1 %1354 }
 0x231   :  { %v1401_v8 = vsub.f32 %v5570_v60, %v1355_v34  ;;  %v1402_v41 = vsub.f32 %v5571_v30, %v1355_v34 }
 0x233   :  { %v1433_v2 = vmul.f32 1.442695, %v1401_v8  ;;  %v1435_v12 = vmul.f32 1.442695, %v1402_v41  ;;  %v5575_v8 = vld [vmem:[#allocation35_spill] sm:$0xff] }
 0x235   :  { %2766 = vpow2.f32 %v1433_v2  ;;  %v5574_v2 = vld [vmem:[#allocation33_spill] sm:$0xff] }
 0x236   :  { %2768 = vpow2.f32 %v1435_v12 }
 0x23f   :  { %v4361_v50 = vpop.eup %2766 }
 0x240   :  { %v4363_v4 = vpop.eup %2768 }
 0x241   :  { %v1497_v31 = vadd.f32 %v4363_v4, %v4361_v50 }
 0x243   :  { %v1358_v59 = vpop.xlane.xlu0 %1357  ;;  %1498 = vadd.xlane.f32.xlu0 %v1497_v31  ;;  %v5577_v31 = vld [vmem:[#allocation38_spill] sm:$0xff] }
 0x244   :  { %v1403_v14 = vsub.f32 %v5572_v15, %v1358_v59  ;;  %v1404_v6 = vsub.f32 %v5573_v51, %v1358_v59  ;;  %v5576_v15 = vld [vmem:[#allocation36_spill] sm:$0xff] }
 0x246   :  { %v1437_v60 = vmul.f32 1.442695, %v1403_v14  ;;  %v1439_v18 = vmul.f32 1.442695, %v1404_v6 }
 0x248   :  { %2770 = vpow2.f32 %v1437_v60 }
 0x249   :  { %2772 = vpow2.f32 %v1439_v18 }
 0x24e   :  { %v1361_v41 = vpop.xlane.xlu1 %1360 }
 0x24f   :  { %v1405_v30 = vsub.f32 %v5574_v2, %v1361_v41  ;;  %v1406_v12 = vsub.f32 %v5575_v8, %v1361_v41  ;;  %v5578_v41 = vld [vmem:[#allocation43_spill] sm:$0xff] }
 0x251   :  { %v1441_v34 = vmul.f32 1.442695, %v1405_v30  ;;  %v1443_v19 = vmul.f32 1.442695, %v1406_v12  ;;  %v5579_v30 = vld [vmem:[#allocation45_spill] sm:$0xff] }
 0x252   :  { %v4371_v55 = vpop.eup %2770  ;;  %v1364_v63 = vpop.xlane.xlu1 %1363 }
 0x253   :  { %v4373_v38 = vpop.eup %2772  ;;  %2774 = vpow2.f32 %v1441_v34  ;;  %v1407_v51 = vsub.f32 %v5576_v15, %v1364_v63  ;;  %v1408_v14 = vsub.f32 %v5577_v31, %v1364_v63  ;;  %v5580_v15 = vld [vmem:[#allocation47_spill] sm:$0xff] }
 0x254   :  { %2776 = vpow2.f32 %v1443_v19  ;;  %v1500_v18 = vadd.f32 %v4373_v38, %v4371_v55  ;;  %v5581_v19 = vld [vmem:[#allocation49_spill] sm:$0xff] }
 0x255   :  { %v1445_v6 = vmul.f32 1.442695, %v1407_v51  ;;  %v1447_v59 = vmul.f32 1.442695, %v1408_v14 }
 0x256   :  { %v1367_v60 = vpop.xlane.xlu1 %1366  ;;  %1501 = vadd.xlane.f32.xlu1 %v1500_v18 }
 0x257   :  { %2778 = vpow2.f32 %v1445_v6  ;;  %v1409_v2 = vsub.f32 %v5578_v41, %v1367_v60  ;;  %v1410_v8 = vsub.f32 %v5579_v30, %v1367_v60 }
 0x258   :  { %2780 = vpow2.f32 %v1447_v59 }
 0x259   :  { %v1449_v12 = vmul.f32 1.442695, %v1409_v2  ;;  %v1451_v34 = vmul.f32 1.442695, %v1410_v8 }
 0x25a   :  { %v1370_v61 = vpop.xlane.xlu1 %1369 }
 0x25b   :  { %2782 = vpow2.f32 %v1449_v12  ;;  %v1411_v63 = vsub.f32 %v5580_v15, %v1370_v61  ;;  %v1412_v31 = vsub.f32 %v5581_v19, %v1370_v61  ;;  %v1385_v41 = vpop.xlane.xlu0 %1384  ;;  %v5582_v12 = vld [vmem:[#allocation71_spill] sm:$0xff]  ;;  %v5583_v19 = vld [vmem:[#allocation72_spill] sm:$0xff] }
 0x25c   :  { %2784 = vpow2.f32 %v1451_v34  ;;  %v1421_v34 = vsub.f32 %v5582_v12, %v1385_v41 }
 0x25d   :  { %v4383_v39 = vpop.eup %2774  ;;  %v1453_v51 = vmul.f32 1.442695, %v1411_v63  ;;  %v1455_v14 = vmul.f32 1.442695, %v1412_v31  ;;  %v1422_v31 = vsub.f32 %v5583_v19, %v1385_v41 }
 0x25e   :  { %v4385_v18 = vpop.eup %2776 }
 0x25f   :  { %2786 = vpow2.f32 %v1453_v51  ;;  %v1503_v2 = vadd.f32 %v4385_v18, %v4383_v39  ;;  %v1475_v52 = vmul.f32 1.442695, %v1422_v31 }
 0x260   :  { %v1373_v6 = vpop.xlane.xlu1 %1372  ;;  %2788 = vpow2.f32 %v1455_v14 }
 0x261   :  { %v1413_v59 = vsub.f32 %v5346_v33, %v1373_v6  ;;  %v1414_v60 = vsub.f32 %v3509_v21, %v1373_v6  ;;  %v4391_v30 = vpop.eup %2778  ;;  %1504 = vadd.xlane.f32.xlu0 %v1503_v2 }
 0x262   :  { %v4394_v15 = vpop.eup %2780 }
 0x263   :  { %v1457_v61 = vmul.f32 1.442695, %v1413_v59  ;;  %v1459_v8 = vmul.f32 1.442695, %v1414_v60  ;;  %v1506_v51 = vadd.f32 %v4394_v15, %v4391_v30  ;;  %v1473_v60 = vmul.f32 1.442695, %v1421_v34 }
 0x265   :  { %v1376_v63 = vpop.xlane.xlu1 %1375  ;;  %2790 = vpow2.f32 %v1457_v61  ;;  %v4401_v14 = vpop.eup %2782  ;;  %1507 = vadd.xlane.f32.xlu1 %v1506_v51 }
 0x266   :  { %v1415_v33 = vsub.f32 %v3514_v45, %v1376_v63  ;;  %v1416_v21 = vsub.f32 %v3521_v58, %v1376_v63  ;;  %2792 = vpow2.f32 %v1459_v8  ;;  %v4403_v2 = vpop.eup %2784 }
 0x267   :  { %v1391_v41 = vpop.xlane.xlu0 %1390  ;;  %v1509_v61 = vadd.f32 %v4403_v2, %v4401_v14 }
 0x268   :  { %v1461_v6 = vmul.f32 1.442695, %v1415_v33  ;;  %v1463_v59 = vmul.f32 1.442695, %v1416_v21  ;;  %v1425_v8 = vsub.f32 %v3629_v57, %v1391_v41  ;;  %v1426_v63 = vsub.f32 %v3633_v17, %v1391_v41 }
 0x269   :  { %v1379_v12 = vpop.xlane.xlu1 %1378  ;;  %v4411_v19 = vpop.eup %2786  ;;  %1510 = vadd.xlane.f32.xlu0 %v1509_v61 }
 0x26a   :  { %2794 = vpow2.f32 %v1461_v6  ;;  %v1417_v45 = vsub.f32 %v3542_v25, %v1379_v12  ;;  %v1418_v58 = vsub.f32 %v3544_v26, %v1379_v12  ;;  %v4413_v31 = vpop.eup %2788  ;;  %v1481_v25 = vmul.f32 1.442695, %v1425_v8 }
 0x26b   :  { %2796 = vpow2.f32 %v1463_v59  ;;  %v1483_v26 = vmul.f32 1.442695, %v1426_v63  ;;  %v1397_v51 = vpop.xlane.xlu0 %1396  ;;  %v1512_v17 = vadd.f32 %v4413_v31, %v4411_v19 }
 0x26c   :  { %v1465_v34 = vmul.f32 1.442695, %v1417_v45  ;;  %v1467_v33 = vmul.f32 1.442695, %v1418_v58  ;;  %2798 = vpow2.f32 %v1473_v60  ;;  %v1429_v59 = vsub.f32 %v3678_v56, %v1397_v51 }
 0x26d   :  { %2800 = vpow2.f32 %v1475_v52  ;;  %v1430_v60 = vsub.f32 %v3683_v11, %v1397_v51  ;;  %1513 = vadd.xlane.f32.xlu1 %v1512_v17 }
 0x26e   :  { %v1382_v21 = vpop.xlane.xlu1 %1381  ;;  %2802 = vpow2.f32 %v1465_v34 }
 0x26f   :  { %v1419_v6 = vsub.f32 %v3547_v62, %v1382_v21  ;;  %v1420_v57 = vsub.f32 %v5369_v37, %v1382_v21  ;;  %2804 = vpow2.f32 %v1467_v33  ;;  %v4421_v12 = vpop.eup %2790  ;;  %v1489_v62 = vmul.f32 1.442695, %v1429_v59 }
 0x270   :  { %2806 = vpow2.f32 %v1481_v25  ;;  %v4423_v45 = vpop.eup %2792  ;;  %v1491_v37 = vmul.f32 1.442695, %v1430_v60 }
 0x271   :  { %v1469_v41 = vmul.f32 1.442695, %v1419_v6  ;;  %v1471_v52 = vmul.f32 1.442695, %v1420_v57  ;;  %2808 = vpow2.f32 %v1483_v26  ;;  %v1515_v56 = vadd.f32 %v4423_v45, %v4421_v12 }
 0x272   :  { %v1388_v58 = vpop.xlane.xlu1 %1387 }
 0x273   :  { %2810 = vpow2.f32 %v1469_v41  ;;  %v1423_v61 = vsub.f32 %v3590_v36, %v1388_v58  ;;  %v1424_v8 = vsub.f32 %v3597_v23, %v1388_v58  ;;  %1516 = vadd.xlane.f32.xlu0 %v1515_v56 }
 0x274   :  { %2812 = vpow2.f32 %v1471_v52  ;;  %v4429_v11 = vpop.eup %2794 }
 0x275   :  { %v1477_v63 = vmul.f32 1.442695, %v1423_v61  ;;  %v1479_v34 = vmul.f32 1.442695, %v1424_v8  ;;  %2814 = vpow2.f32 %v1489_v62  ;;  %v4431_v33 = vpop.eup %2796 }
 0x276   :  { %v1394_v21 = vpop.xlane.xlu1 %1393  ;;  %2816 = vpow2.f32 %v1491_v37  ;;  %v4433_v25 = vpop.eup %2798  ;;  %v1518_v36 = vadd.f32 %v4431_v33, %v4429_v11 }
 0x277   :  { %2818 = vpow2.f32 %v1477_v63  ;;  %v1427_v23 = vsub.f32 %v3639_v42, %v1394_v21  ;;  %v1428_v26 = vsub.f32 %v3645_v9, %v1394_v21  ;;  %v4439_v51 = vpop.eup %2800  ;;  %v5584_v9 = vld [vmem:[#allocation94_spill] sm:$0xff] }
 0x278   :  { %2820 = vpow2.f32 %v1479_v34  ;;  %v4441_v6 = vpop.eup %2802  ;;  %1519 = vadd.xlane.f32.xlu1 %v1518_v36  ;;  %v1527_v61 = vadd.f32 %v4439_v51, %v4433_v25 }
 0x279   :  { %v1485_v57 = vmul.f32 1.442695, %v1427_v23  ;;  %v1487_v17 = vmul.f32 1.442695, %v1428_v26  ;;  %v4443_v59 = vpop.eup %2804 }
 0x27a   :  { %v1400_v60 = vpop.xlane.xlu1 %1399  ;;  %v4445_v41 = vpop.eup %2806  ;;  %v1521_v52 = vadd.f32 %v4443_v59, %v4441_v6 }
 0x27b   :  { %2822 = vpow2.f32 %v1485_v57  ;;  %v1431_v42 = vsub.f32 %v3689_v32, %v1400_v60  ;;  %v1432_v58 = vsub.f32 %v5584_v9, %v1400_v60  ;;  %v4451_v62 = vpop.eup %2808 }
 0x27c   :  { %2824 = vpow2.f32 %v1487_v17  ;;  %1522 = vadd.xlane.f32.xlu0 %v1521_v52  ;;  %v1533_v23 = vadd.f32 %v4451_v62, %v4445_v41 }
 0x27d   :  { %v4453_v37 = vpop.eup %2810  ;;  %v1493_v8 = vmul.f32 1.442695, %v1431_v42  ;;  %v1495_v56 = vmul.f32 1.442695, %v1432_v58 }
 0x27e   :  { %v4457_v63 = vpop.eup %2812 }
 0x27f   :  { %v4459_v34 = vpop.eup %2814  ;;  %v1524_v32 = vadd.f32 %v4457_v63, %v4453_v37  ;;  %2826 = vpow2.f32 %v1493_v8  ;;  %v5587_v8 = vld [vmem:[#allocation63_spill] sm:$0xff] }
 0x280   :  { %5585 = vst [vmem:[#allocation28_spill] sm:$0xff] %v4459_v34  ;;  %v4463_v21 = vpop.eup %2816  ;;  %2828 = vpow2.f32 %v1495_v56  ;;  %1528 = vadd.xlane.f32.xlu0 %v1527_v61  ;;  %v5588_v56 = vld [vmem:[#allocation64_spill] sm:$0xff] }
 0x281   :  { %v4465_v36 = vpop.eup %2818  ;;  %1525 = vadd.xlane.f32.xlu1 %v1524_v32  ;;  %v1539_v60 = vadd.f32 %v4463_v21, %v4459_v34  ;;  %v5589_v32 = vmax.f32 %v5587_v8, %v5588_v56  ;;  %v5627_v34 = vld [vmem:[#allocation106_spill] sm:$0xff] }
 0x282   :  { %v4469_v26 = vpop.eup %2820 }
 0x283   :  { %v1530_v57 = vadd.f32 %v4469_v26, %v4465_v36 }
 0x284   :  { %1534 = vadd.xlane.f32.xlu0 %v1533_v23  ;;  %v5590_v23 = vld [vmem:[#allocation66_spill] sm:$0xff] }
 0x285   :  { %v4473_v17 = vpop.eup %2822  ;;  %1531 = vadd.xlane.f32.xlu1 %v1530_v57  ;;  %v5591_v57 = vld [vmem:[#allocation68_spill] sm:$0xff] }
 0x286   :  { %v4477_v52 = vpop.eup %2824  ;;  %v5592_v13 = vmax.f32 %v5590_v23, %v5591_v57 }
 0x287   :  { %v1536_v42 = vadd.f32 %v4477_v52, %v4473_v17 }
 0x288   :  { %1540 = vadd.xlane.f32.xlu0 %v1539_v60  ;;  %v5597_v60 = vld [vmem:[#allocation81_spill] sm:$0xff] }
 0x289   :  { %v4481_v9 = vpop.eup %2826  ;;  %1537 = vadd.xlane.f32.xlu1 %v1536_v42  ;;  %v5596_v42 = vld [vmem:[#allocation79_spill] sm:$0xff] }
 0x28a   :  { %5586 = vst [vmem:[#allocation29_spill] sm:$0xff] %v4481_v9  ;;  %v4483_v58 = vpop.eup %2828  ;;  %v5598_v44 = vmax.f32 %v5596_v42, %v5597_v60 }
 0x28b   :  { %v1542_v61 = vadd.f32 %v4483_v58, %v4481_v9 }
 0x28c   :  { %1924 = vmax.xlane.f32.xlu0 %v5589_v32  ;;  %v5605_v32 = vld [vmem:[#allocation95_spill] sm:$0xff] }
 0x28d   :  { %1543 = vadd.xlane.f32.xlu1 %v1542_v61  ;;  %v5602_v61 = vld [vmem:[#allocation87_spill] sm:$0xff]  ;;  %v5607_v53 = vmax.f32 %v5605_v32, %v5606_v49 }
 0x28e   :  { %v5604_v35 = vmax.f32 %v5602_v61, %v5603_v1 }
 0x290   :  { %1930 = vmax.xlane.f32.xlu0 %v5595_v46  ;;  %v5611_v46 = vld [vmem:[#allocation99_spill] sm:$0xff] }
 0x291   :  { %1927 = vmax.xlane.f32.xlu1 %v5592_v13  ;;  %v5608_v13 = vld [vmem:[#allocation97_spill] sm:$0xff]  ;;  %v5613_v5 = vmax.f32 %v5611_v46, %v5612_v24  ;;  %v5630_v24 = vld [vmem:[#allocation107_spill] sm:$0xff] }
 0x292   :  { %v5610_v0 = vmax.f32 %v5608_v13, %v5609_v16 }
 0x294   :  { %1936 = vmax.xlane.f32.xlu0 %v5601_v43  ;;  %v5617_v43 = vld [vmem:[#allocation103_spill] sm:$0xff] }
 0x295   :  { %1933 = vmax.xlane.f32.xlu1 %v5598_v44  ;;  %v5614_v44 = vld [vmem:[#allocation101_spill] sm:$0xff]  ;;  %v5619_v54 = vmax.f32 %v5617_v43, %v5618_v28 }
 0x296   :  { %v5616_v3 = vmax.f32 %v5614_v44, %v5615_v40  ;;  %v5633_v44 = vld [vmem:[#allocation80_spill] sm:$0xff] }
 0x298   :  { %1942 = vmax.xlane.f32.xlu0 %v5607_v53  ;;  %v5623_v53 = vld [vmem:[#allocation105_spill] sm:$0xff] }
 0x299   :  { %1939 = vmax.xlane.f32.xlu1 %v5604_v35  ;;  %v5620_v35 = vld [vmem:[#allocation60_spill] sm:$0xff]  ;;  %v5625_v29 = vmax.f32 %v5623_v53, %v5624_v10 }
 0x29a   :  { %v5622_v22 = vmax.f32 %v5620_v35, %v5621_v48 }
 0x29c   :  { %1948 = vmax.xlane.f32.xlu0 %v5613_v5  ;;  %v5629_v5 = vld [vmem:[#allocation21_spill] sm:$0xff] }
 0x29d   :  { %1945 = vmax.xlane.f32.xlu1 %v5610_v0  ;;  %v5626_v0 = vld [vmem:[#allocation32_spill] sm:$0xff]  ;;  %v5631_v40 = vmax.f32 %v5629_v5, %v5630_v24 }
 0x29e   :  { %v5628_v9 = vmax.f32 %v5626_v0, %v5627_v34 }
 0x2a0   :  { %1954 = vmax.xlane.f32.xlu0 %v5619_v54 }
 0x2a1   :  { %1951 = vmax.xlane.f32.xlu1 %v5616_v3  ;;  %v5632_v3 = vld [vmem:[#allocation108_spill] sm:$0xff] }
 0x2a2   :  { %v5634_v28 = vmax.f32 %v5632_v3, %v5633_v44 }
 0x2a4   :  { %1960 = vmax.xlane.f32.xlu0 %v5625_v29 }
 0x2a5   :  { %1957 = vmax.xlane.f32.xlu1 %v5622_v22 }
 0x2a8   :  { %1966 = vmax.xlane.f32.xlu0 %v5631_v40 }
 0x2a9   :  { %1963 = vmax.xlane.f32.xlu1 %v5628_v9 }
 0x2ad   :  { %1969 = vmax.xlane.f32.xlu1 %v5634_v28 }
 0x2d0   :  { %v1499_v54 = vpop.xlane.xlu0 %1498 }
 0x2d1   :  { %2830 = vrcp.f32 %v1499_v54 }
 0x2db   :  { %v2831_v22 = vpop.eup %2830 }
 0x2dc   :  { %v1562_v29 = vmul.f32 %v2831_v22, %v4363_v4  ;;  %v1561_v9 = vmul.f32 %v2831_v22, %v4361_v50 }
 0x2e3   :  { %v1502_v48 = vpop.xlane.xlu1 %1501 }
 0x2e4   :  { %2832 = vrcp.f32 %v1502_v48 }
 0x2ee   :  { %v2833_v35 = vpop.eup %2832  ;;  %v1505_v10 = vpop.xlane.xlu0 %1504 }
 0x2ef   :  { %v1564_v34 = vmul.f32 %v2833_v35, %v4373_v38  ;;  %v1563_v24 = vmul.f32 %v2833_v35, %v4371_v55  ;;  %2834 = vrcp.f32 %v1505_v10 }
 0x2f1   :  { %v1610_v40 = vpack.c.bf16 %v1564_v34, %v1562_v29  ;;  %v1609_v5 = vpack.c.bf16 %v1563_v24, %v1561_v9 }
 0x2f2   :  { %v1508_v44 = vpop.xlane.xlu1 %1507 }
 0x2f3   :  { %2836 = vrcp.f32 %v1508_v44  ;;  %1625 = vmatprep.subr.bf16.mxu0 %v1610_v40 }
 0x2f4   :  { %1626 = vmatpush1.bf16.xpose.msra.mxu0 %v1609_v5 }
 0x2f6   :  { %v1511_v28 = vpop.xlane.xlu0 %1510 }
 0x2f7   :  { %2838 = vrcp.f32 %v1511_v28 }
 0x2f9   :  { %v2835_v54 = vpop.eup %2834 }
 0x2fa   :  { %v1514_v48 = vpop.xlane.xlu1 %1513  ;;  %v1566_v38 = vmul.f32 %v2835_v54, %v4385_v18  ;;  %v1565_v55 = vmul.f32 %v2835_v54, %v4383_v39 }
 0x2fb   :  { %2840 = vrcp.f32 %v1514_v48 }
 0x2fd   :  { %v2837_v3 = vpop.eup %2836 }
 0x2fe   :  { %v1568_v50 = vmul.f32 %v2837_v3, %v4394_v15  ;;  %v1567_v10 = vmul.f32 %v2837_v3, %v4391_v30 }
 0x300   :  { %v1517_v4 = vpop.xlane.xlu0 %1516  ;;  %v1612_v24 = vpack.c.bf16 %v1568_v50, %v1566_v38  ;;  %v1611_v34 = vpack.c.bf16 %v1567_v10, %v1565_v55 }
 0x301   :  { %2842 = vrcp.f32 %v1517_v4  ;;  %v2839_v35 = vpop.eup %2838 }
 0x302   :  { %1627 = vmatprep.subr.bf16.mxu0 %v1612_v24  ;;  %v1570_v29 = vmul.f32 %v2839_v35, %v4403_v2  ;;  %v1569_v15 = vmul.f32 %v2839_v35, %v4401_v14 }
 0x303   :  { %1628 = vmatpush1.bf16.xpose.msra.mxu0 %v1611_v34 }
 0x305   :  { %v1520_v44 = vpop.xlane.xlu1 %1519  ;;  %v2841_v5 = vpop.eup %2840 }
 0x306   :  { %2844 = vrcp.f32 %v1520_v44  ;;  %v1572_v18 = vmul.f32 %v2841_v5, %v4413_v31  ;;  %v1571_v39 = vmul.f32 %v2841_v5, %v4411_v19 }
 0x308   :  { %v1614_v9 = vpack.c.bf16 %v1572_v18, %v1570_v29  ;;  %v1613_v30 = vpack.c.bf16 %v1571_v39, %v1569_v15 }
 0x309   :  { %v1523_v22 = vpop.xlane.xlu0 %1522 }
 0x30a   :  { %2846 = vrcp.f32 %v1523_v22  ;;  %1629 = vmatprep.subr.bf16.mxu0 %v1614_v9 }
 0x30b   :  { %v2843_v28 = vpop.eup %2842  ;;  %1630 = vmatpush1.bf16.xpose.msra.mxu0 %v1613_v30 }
 0x30c   :  { %v1574_v2 = vmul.f32 %v2843_v28, %v4423_v45  ;;  %v1573_v14 = vmul.f32 %v2843_v28, %v4421_v12 }
 0x30d   :  { %v1529_v40 = vpop.xlane.xlu0 %1528 }
 0x30e   :  { %v1526_v3 = vpop.xlane.xlu1 %1525 }
 0x30f   :  { %2848 = vrcp.f32 %v1526_v3 }
 0x310   :  { %v2845_v48 = vpop.eup %2844  ;;  %2850 = vrcp.f32 %v1529_v40 }
 0x311   :  { %v1576_v31 = vmul.f32 %v2845_v48, %v4431_v33  ;;  %v1575_v19 = vmul.f32 %v2845_v48, %v4429_v11  ;;  %v1535_v4 = vpop.xlane.xlu0 %1534 }
 0x312   :  { %v1532_v54 = vpop.xlane.xlu1 %1531 }
 0x313   :  { %2852 = vrcp.f32 %v1532_v54  ;;  %v1616_v38 = vpack.c.bf16 %v1576_v31, %v1574_v2  ;;  %v1615_v50 = vpack.c.bf16 %v1575_v19, %v1573_v14 }
 0x314   :  { %2854 = vrcp.f32 %v1535_v4  ;;  %v2847_v24 = vpop.eup %2846 }
 0x315   :  { %1631 = vmatprep.subr.bf16.mxu0 %v1616_v38  ;;  %v1541_v10 = vpop.xlane.xlu0 %1540  ;;  %v1578_v45 = vmul.f32 %v2847_v24, %v4443_v59  ;;  %v1577_v12 = vmul.f32 %v2847_v24, %v4441_v6 }
 0x316   :  { %v1538_v55 = vpop.xlane.xlu1 %1537  ;;  %1632 = vmatpush1.bf16.xpose.msra.mxu0 %v1615_v50 }
 0x317   :  { %2856 = vrcp.f32 %v1538_v55 }
 0x319   :  { %v2849_v34 = vpop.eup %2848  ;;  %v1925_v35 = vpop.xlane.xlu0 %1924 }
 0x31a   :  { %v1580_v33 = vmul.f32 %v2849_v34, %v4457_v63  ;;  %v1579_v11 = vmul.f32 %v2849_v34, %v4453_v37  ;;  %v1544_v44 = vpop.xlane.xlu1 %1543  ;;  %v2851_v5 = vpop.eup %2850  ;;  %v1971_v22 = vsub.f32 %v5587_v8, %v1925_v35  ;;  %v1972_v29 = vsub.f32 %v5588_v56, %v1925_v35 }
 0x31b   :  { %2858 = vrcp.f32 %v1544_v44  ;;  %v1582_v63 = vmul.f32 %v2851_v5, %v4439_v51  ;;  %v1581_v14 = vmul.f32 %v2851_v5, %v4433_v25 }
 0x31c   :  { %v1618_v18 = vpack.c.bf16 %v1580_v33, %v1578_v45  ;;  %v1617_v15 = vpack.c.bf16 %v1579_v11, %v1577_v12  ;;  %2860 = vrcp.f32 %v1541_v10  ;;  %v2003_v9 = vmul.f32 1.442695, %v1971_v22 }
 0x31d   :  { %v2853_v39 = vpop.eup %2852  ;;  %v2005_v59 = vmul.f32 1.442695, %v1972_v29  ;;  %v1931_v30 = vpop.xlane.xlu0 %1930 }
 0x31e   :  { %1633 = vmatprep.subr.bf16.mxu0 %v1618_v18  ;;  %v1584_v6 = vmul.f32 %v2853_v39, %v4469_v26  ;;  %v1928_v37 = vpop.xlane.xlu1 %1927  ;;  %v2855_v3 = vpop.eup %2854  ;;  %2862 = vpow2.f32 %v2003_v9  ;;  %v1975_v40 = vsub.f32 %v5593_v20, %v1931_v30  ;;  %v1583_v48 = vmul.f32 %v2853_v39, %v4465_v36 }
 0x31f   :  { %1634 = vmatpush1.bf16.xpose.msra.mxu0 %v1617_v15  ;;  %v1973_v8 = vsub.f32 %v5590_v23, %v1928_v37  ;;  %v1974_v56 = vsub.f32 %v5591_v57, %v1928_v37  ;;  %2864 = vpow2.f32 %v2005_v59  ;;  %v1976_v54 = vsub.f32 %v5594_v7, %v1931_v30  ;;  %v5635_v59 = vld [vmem:[#allocation100_spill] sm:$0xff] }
 0x320   :  { %v1620_v28 = vpack.c.bf16 %v1584_v6, %v1582_v63  ;;  %v2011_v31 = vmul.f32 1.442695, %v1975_v40  ;;  %v1586_v23 = vmul.f32 %v2855_v3, %v4451_v62  ;;  %v1619_v50 = vpack.c.bf16 %v1583_v48, %v1581_v14  ;;  %v5636_v40 = vld [vmem:[#allocation101_spill] sm:$0xff]  ;;  %v5637_v48 = vld [vmem:[#allocation102_spill] sm:$0xff] }
 0x321   :  { %v2857_v51 = vpop.eup %2856  ;;  %v2007_v2 = vmul.f32 1.442695, %v1973_v8  ;;  %v2009_v26 = vmul.f32 1.442695, %v1974_v56  ;;  %v2013_v19 = vmul.f32 1.442695, %v1976_v54  ;;  %v1937_v20 = vpop.xlane.xlu0 %1936  ;;  %v1585_v11 = vmul.f32 %v2855_v3, %v4445_v41 }
 0x322   :  { %1635 = vmatprep.subr.bf16.mxu0 %v1620_v28  ;;  %v1588_v57 = vmul.f32 %v2857_v51, %v4477_v52  ;;  %v1934_v4 = vpop.xlane.xlu1 %1933  ;;  %v1979_v7 = vsub.f32 %v5599_v27, %v1937_v20  ;;  %v1980_v10 = vsub.f32 %v5600_v47, %v1937_v20  ;;  %v1587_v45 = vmul.f32 %v2857_v51, %v4473_v17  ;;  %v5639_v14 = vld [vmem:[#allocation62_spill] sm:$0xff] }
 0x323   :  { %2866 = vpow2.f32 %v2007_v2  ;;  %v1977_v38 = vsub.f32 %v5596_v42, %v1934_v4  ;;  %v1978_v36 = vsub.f32 %v5597_v60, %v1934_v4 }
 0x324   :  { %2868 = vpow2.f32 %v2009_v26  ;;  %v1622_v55 = vpack.c.bf16 %v1588_v57, %v1586_v23  ;;  %v2019_v34 = vmul.f32 1.442695, %v1979_v7  ;;  %v2021_v52 = vmul.f32 1.442695, %v1980_v10  ;;  %v5638_v26 = vld [vmem:[#allocation29_spill] sm:$0xff] }
 0x325   :  { %v2859_v25 = vpop.eup %2858  ;;  %2870 = vpow2.f32 %v2011_v31  ;;  %v2015_v24 = vmul.f32 1.442695, %v1977_v38  ;;  %v2017_v62 = vmul.f32 1.442695, %v1978_v36  ;;  %v1943_v42 = vpop.xlane.xlu0 %1942 }
 0x326   :  { %2872 = vpow2.f32 %v2013_v19  ;;  %v1940_v33 = vpop.xlane.xlu1 %1939  ;;  %v2861_v12 = vpop.eup %2860  ;;  %v1983_v47 = vsub.f32 %v5605_v32, %v1943_v42  ;;  %v1984_v44 = vsub.f32 %v5606_v49, %v1943_v42  ;;  %v1592_v35 = vmul.f32 %v2859_v25, %v4483_v58 }
 0x327   :  { %1636 = vmatpush1.bf16.xpose.msra.mxu0 %v1619_v50  ;;  %2874 = vpow2.f32 %v2015_v24  ;;  %v1981_v27 = vsub.f32 %v5602_v61, %v1940_v33  ;;  %v1982_v60 = vsub.f32 %v5603_v1, %v1940_v33  ;;  %v1621_v1 = vpack.c.bf16 %v1587_v45, %v1585_v11 }
 0x328   :  { %1637 = vmatprep.subr.bf16.mxu0 %v1622_v55  ;;  %2876 = vpow2.f32 %v2017_v62  ;;  %v4578_v17 = vpop.eup %2862  ;;  %v2027_v29 = vmul.f32 1.442695, %v1983_v47  ;;  %v2029_v61 = vmul.f32 1.442695, %v1984_v44  ;;  %v1590_v32 = vmul.f32 %v2861_v12, %v4463_v21  ;;  %v5641_v62 = vld [vmem:[#allocation60_spill] sm:$0xff] }
 0x329   :  { %2878 = vpow2.f32 %v2019_v34  ;;  %v2023_v5 = vmul.f32 1.442695, %v1981_v27  ;;  %v2025_v22 = vmul.f32 1.442695, %v1982_v60  ;;  %v4580_v18 = vpop.eup %2864  ;;  %v1949_v39 = vpop.xlane.xlu0 %1948  ;;  %v1591_v31 = vmul.f32 %v2859_v25, %v5638_v26 }
 0x32a   :  { %2880 = vpow2.f32 %v2021_v52  ;;  %v1946_v15 = vpop.xlane.xlu1 %1945  ;;  %v1987_v58 = vsub.f32 %v5611_v46, %v1949_v39  ;;  %v1624_v9 = vpack.c.bf16 %v1592_v35, %v1590_v32  ;;  %v1988_v63 = vsub.f32 %v5635_v59, %v1949_v39  ;;  %v5642_v52 = vld [vmem:[#allocation104_spill] sm:$0xff]  ;;  %v5644_v39 = vld [vmem:[#allocation106_spill] sm:$0xff]  ;;  %v5646_v59 = vld [vmem:[#allocation107_spill] sm:$0xff] }
 0x32b   :  { %2882 = vpow2.f32 %v2023_v5  ;;  %v1985_v49 = vsub.f32 %v5608_v13, %v1946_v15  ;;  %v1986_v41 = vsub.f32 %v5609_v16, %v1946_v15  ;;  %v2067_v6 = vadd.f32 %v4580_v18, %v4578_v17 }
 0x32c   :  { %2884 = vpow2.f32 %v2025_v22  ;;  %v2035_v3 = vmul.f32 1.442695, %v1987_v58  ;;  %v2037_v13 = vmul.f32 1.442695, %v1988_v63 }
 0x32d   :  { %v4589_v37 = vpop.eup %2866  ;;  %2886 = vpow2.f32 %v2027_v29  ;;  %v2031_v21 = vmul.f32 1.442695, %v1985_v49  ;;  %v2033_v30 = vmul.f32 1.442695, %v1986_v41  ;;  %2068 = vadd.xlane.f32.xlu0 %v2067_v6  ;;  %v1955_v46 = vpop.xlane.xlu0 %1954  ;;  %v5645_v41 = vld [vmem:[#allocation21_spill] sm:$0xff] }
 0x32e   :  { %v4591_v8 = vpop.eup %2868  ;;  %2888 = vpow2.f32 %v2029_v61  ;;  %v1952_v16 = vpop.xlane.xlu1 %1951  ;;  %v1991_v51 = vsub.f32 %v5617_v43, %v1955_v46  ;;  %v1992_v19 = vsub.f32 %v5639_v14, %v1955_v46  ;;  %v5640_v43 = vld [vmem:[#allocation28_spill] sm:$0xff] }
 0x32f   :  { %v4593_v56 = vpop.eup %2870  ;;  %1638 = vmatpush1.bf16.xpose.msra.mxu0 %v1621_v1  ;;  %2890 = vpow2.f32 %v2031_v21  ;;  %v1989_v28 = vsub.f32 %v5636_v40, %v1952_v16  ;;  %v1990_v54 = vsub.f32 %v5637_v48, %v1952_v16  ;;  %v2070_v23 = vadd.f32 %v4591_v8, %v4589_v37  ;;  %v5647_v48 = vld [vmem:[#allocation108_spill] sm:$0xff] }
 0x330   :  { %v4598_v2 = vpop.eup %2872  ;;  %1639 = vmatprep.subr.bf16.mxu0 %v1624_v9  ;;  %2892 = vpow2.f32 %v2033_v30  ;;  %v2043_v38 = vmul.f32 1.442695, %v1991_v51  ;;  %v1589_v7 = vmul.f32 %v2861_v12, %v5640_v43  ;;  %v2045_v50 = vmul.f32 1.442695, %v1992_v19  ;;  %v5643_v12 = vld [vmem:[#allocation34_spill] sm:$0xff]  ;;  %v5648_v51 = vld [vmem:[#allocation80_spill] sm:$0xff] }
 0x331   :  { %v4604_v57 = vpop.eup %2874  ;;  %2894 = vpow2.f32 %v2035_v3  ;;  %v2039_v4 = vmul.f32 1.442695, %v1989_v28  ;;  %v2041_v20 = vmul.f32 1.442695, %v1990_v54  ;;  %2071 = vadd.xlane.f32.xlu1 %v2070_v23  ;;  %v2073_v55 = vadd.f32 %v4598_v2, %v4593_v56  ;;  %v1961_v25 = vpop.xlane.xlu0 %1960  ;;  %v5649_v43 = vld [vmem:[#allocation109_spill] sm:$0xff] }
 0x332   :  { %v4606_v36 = vpop.eup %2876  ;;  %2896 = vpow2.f32 %v2037_v13  ;;  %v1958_v10 = vpop.xlane.xlu1 %1957  ;;  %v1995_v33 = vsub.f32 %v5623_v53, %v1961_v25  ;;  %v1623_v27 = vpack.c.bf16 %v1591_v31, %v1589_v7  ;;  %v1996_v60 = vsub.f32 %v5643_v12, %v1961_v25  ;;  %v5650_v7 = vld [vmem:[#allocation26_spill] sm:$0xff]  ;;  %v5653_v25 = vld [vmem:[#allocation111_spill] sm:$0xff] }
 0x333   :  { %v4611_v24 = vpop.eup %2878  ;;  %2898 = vpow2.f32 %v2039_v4  ;;  %v1993_v34 = vsub.f32 %v5641_v62, %v1958_v10  ;;  %v1994_v45 = vsub.f32 %v5642_v52, %v1958_v10  ;;  %2074 = vadd.xlane.f32.xlu0 %v2073_v55  ;;  %v2076_v47 = vadd.f32 %v4606_v36, %v4604_v57  ;;  %v5652_v10 = vld [vmem:[#allocation46_spill] sm:$0xff] }
 0x334   :  { %v4616_v42 = vpop.eup %2880  ;;  %2900 = vpow2.f32 %v2041_v20  ;;  %v2051_v5 = vmul.f32 1.442695, %v1995_v33  ;;  %v2053_v53 = vmul.f32 1.442695, %v1996_v60  ;;  %v5654_v62 = vpack.c.bf16 %v5652_v10, %v5653_v25  ;;  %v5677_v10 = vld [vmem:[#allocation132_spill] sm:$0xff] }
 0x335   :  { %v4621_v11 = vpop.eup %2882  ;;  %2902 = vpow2.f32 %v2043_v38  ;;  %v2047_v44 = vmul.f32 1.442695, %v1993_v34  ;;  %v2049_v35 = vmul.f32 1.442695, %v1994_v45  ;;  %2077 = vadd.xlane.f32.xlu1 %v2076_v47  ;;  %v2079_v29 = vadd.f32 %v4616_v42, %v4611_v24  ;;  %v1967_v61 = vpop.xlane.xlu0 %1966 }
 0x336   :  { %v4623_v22 = vpop.eup %2884  ;;  %2904 = vpow2.f32 %v2045_v50  ;;  %v1964_v1 = vpop.xlane.xlu1 %1963  ;;  %v1999_v58 = vsub.f32 %v5645_v41, %v1967_v61  ;;  %v2000_v63 = vsub.f32 %v5646_v59, %v1967_v61  ;;  %v5651_v50 = vpack.c.bf16 %v5649_v43, %v5650_v7  ;;  %v5674_v43 = vld [vmem:[#allocation125_spill] sm:$0xff] }
 0x337   :  { %v4627_v32 = vpop.eup %2886  ;;  %1640 = vmatpush1.bf16.xpose.msra.mxu0 %v1623_v27  ;;  %2906 = vpow2.f32 %v2047_v44  ;;  %v1997_v15 = vsub.f32 %v5626_v0, %v1964_v1  ;;  %v1998_v49 = vsub.f32 %v5644_v39, %v1964_v1  ;;  %2080 = vadd.xlane.f32.xlu0 %v2079_v29  ;;  %v2082_v6 = vadd.f32 %v4623_v22, %v4621_v11  ;;  %v5656_v29 = vld [vmem:[#allocation110_spill] sm:$0xff]  ;;  %v5659_v39 = vld [vmem:[#allocation116_spill] sm:$0xff] }
 0x338   :  { %v4632_v9 = vpop.eup %2888  ;;  %2908 = vpow2.f32 %v2049_v35  ;;  %v2059_v13 = vmul.f32 1.442695, %v1999_v58  ;;  %v2061_v16 = vmul.f32 1.442695, %v2000_v63 }
 0x339   :  { %v4637_v21 = vpop.eup %2890  ;;  %2910 = vpow2.f32 %v2051_v5  ;;  %v2055_v30 = vmul.f32 1.442695, %v1997_v15  ;;  %v2057_v3 = vmul.f32 1.442695, %v1998_v49  ;;  %2083 = vadd.xlane.f32.xlu1 %v2082_v6  ;;  %v2085_v46 = vadd.f32 %v4632_v9, %v4627_v32  ;;  %v5658_v15 = vld [vmem:[#allocation120_spill] sm:$0xff] }
 0x33a   :  { %v4639_v0 = vpop.eup %2892  ;;  %2912 = vpow2.f32 %v2053_v53  ;;  %v1970_v40 = vpop.xlane.xlu1 %1969  ;;  %v5655_v53 = vld [vmem:[#allocation112_spill] sm:$0xff]  ;;  %v5660_v49 = vpack.c.bf16 %v5658_v15, %v5659_v39  ;;  %v5688_v39 = vld [vmem:[#allocation11_spill] sm:$0xff] }
 0x33b   :  { %v4643_v28 = vpop.eup %2894  ;;  %2914 = vpow2.f32 %v2055_v30  ;;  %v2001_v54 = vsub.f32 %v5647_v48, %v1970_v40  ;;  %v2002_v26 = vsub.f32 %v5648_v51, %v1970_v40  ;;  %v2088_v31 = vadd.f32 %v4639_v0, %v4637_v21  ;;  %2086 = vadd.xlane.f32.xlu0 %v2085_v46  ;;  %v5664_v46 = vld [vmem:[#allocation124_spill] sm:$0xff]  ;;  %v5665_v40 = vld [vmem:[#allocation122_spill] sm:$0xff]  ;;  %v5668_v51 = vld [vmem:[#allocation121_spill] sm:$0xff] }
 0x33c   :  { %v4649_v14 = vpop.eup %2896  ;;  %2916 = vpow2.f32 %v2057_v3  ;;  %v5657_v1 = vpack.c.bf16 %v5655_v53, %v5656_v29  ;;  %v5661_v3 = vld [vmem:[#allocation118_spill] sm:$0xff]  ;;  %v5666_v48 = vpack.c.bf16 %v5664_v46, %v5665_v40  ;;  %v5685_v29 = vld [vmem:[#allocation145_spill] sm:$0xff]  ;;  %v3014_v40 = vmov 0.0  }
 0x33d   :  { %v4651_v19 = vpop.eup %2898  ;;  %2918 = vpow2.f32 %v2059_v13  ;;  %v2063_v23 = vmul.f32 1.442695, %v2001_v54  ;;  %v2065_v4 = vmul.f32 1.442695, %v2002_v26  ;;  %v2091_v20 = vadd.f32 %v4649_v14, %v4643_v28  ;;  %2089 = vadd.xlane.f32.xlu1 %v2088_v31  ;;  %v5662_v13 = vld [vmem:[#allocation114_spill] sm:$0xff]  ;;  %v5667_v54 = vld [vmem:[#allocation123_spill] sm:$0xff]  ;;  %2528 = vmatprep.subr.bf16.mxu1 %v3014_v40 }
 0x33e   :  { %v4655_v38 = vpop.eup %2900  ;;  %1658 = vmatmul.mubr.bf16.vlgmr.msra.gmra.mrb[92].mxu0 %v5651_v50  ;;  %2920 = vpow2.f32 %v2061_v16  ;;  %v5663_v16 = vpack.c.bf16 %v5661_v3, %v5662_v13  ;;  %v5669_v26 = vpack.c.bf16 %v5667_v54, %v5668_v51  ;;  %v5670_v31 = vld [vmem:[#allocation130_spill] sm:$0xff]  ;;  %v5676_v50 = vld [vmem:[#allocation135_spill] sm:$0xff]  ;;  %2544 = vmatprep.mubr.msk.bf16.mxu1 %vm3015_vm2, %v3014_v40 }
 0x33f   :  { %v4660_v55 = vpop.eup %2902  ;;  %1665 = vmatprep.mubr.bf16.mxu0 %v5654_v62  ;;  %2922 = vpow2.f32 %v2063_v23  ;;  %v2094_v34 = vadd.f32 %v4655_v38, %v4651_v19  ;;  %2092 = vadd.xlane.f32.xlu0 %v2091_v20  ;;  %v5671_v23 = vld [vmem:[#allocation127_spill] sm:$0xff]  ;;  %v5673_v20 = vld [vmem:[#allocation128_spill] sm:$0xff]  ;;  %v5678_v25 = vpack.c.bf16 %v5676_v50, %v5677_v10  ;;  %v5679_v62 = vld [vmem:[#allocation133_spill] sm:$0xff] }
 0x340   :  { %v4667_v52 = vpop.eup %2904  ;;  %2924 = vpow2.f32 %v2065_v4  ;;  %v5672_v4 = vpack.c.bf16 %v5670_v31, %v5671_v23  ;;  %v5675_v7 = vpack.c.bf16 %v5673_v20, %v5674_v43  ;;  %v5694_v13 = vld [vmem:[#allocation119_spill] sm:$0xff] }
 0x341   :  { %v4669_v45 = vpop.eup %2906  ;;  %v2097_v33 = vadd.f32 %v4667_v52, %v4660_v55  ;;  %2095 = vadd.xlane.f32.xlu1 %v2094_v34  ;;  %v5680_v34 = vld [vmem:[#allocation131_spill] sm:$0xff] }
 0x342   :  { %v4673_v27 = vpop.eup %2908 }
 0x343   :  { %v4675_v12 = vpop.eup %2910  ;;  %v2100_v60 = vadd.f32 %v4673_v27, %v4669_v45  ;;  %2098 = vadd.xlane.f32.xlu0 %v2097_v33  ;;  %v5681_v33 = vpack.c.bf16 %v5679_v62, %v5680_v34 }
 0x344   :  { %v4679_v47 = vpop.eup %2912 }
 0x345   :  { %v4681_v44 = vpop.eup %2914  ;;  %v2103_v35 = vadd.f32 %v4679_v47, %v4675_v12  ;;  %2101 = vadd.xlane.f32.xlu1 %v2100_v60  ;;  %v5682_v60 = vld [vmem:[#allocation151_spill] sm:$0xff] }
 0x346   :  { %v4685_v5 = vpop.eup %2916  ;;  %1666 = vmatmul.mubr.bf16.gmra.mrb[96].mxu0 %v5657_v1  ;;  %v5686_v1 = vld [vmem:[#allocation139_spill] sm:$0xff] }
 0x347   :  { %v4690_v61 = vpop.eup %2918  ;;  %1673 = vmatprep.mubr.bf16.mxu0 %v5660_v49  ;;  %v2106_v41 = vadd.f32 %v4685_v5, %v4681_v44  ;;  %2104 = vadd.xlane.f32.xlu0 %v2103_v35  ;;  %v5683_v35 = vld [vmem:[#allocation141_spill] sm:$0xff]  ;;  %v5687_v15 = vpack.c.bf16 %v5685_v29, %v5686_v1 }
 0x348   :  { %v4697_v58 = vpop.eup %2920  ;;  %v5684_v53 = vpack.c.bf16 %v5682_v60, %v5683_v35  ;;  %v5689_v49 = vld [vmem:[#allocation9_spill] sm:$0xff] }
 0x349   :  { %v4699_v59 = vpop.eup %2922  ;;  %v2109_v63 = vadd.f32 %v4697_v58, %v4690_v61  ;;  %2107 = vadd.xlane.f32.xlu1 %v2106_v41  ;;  %v5690_v41 = vpack.c.bf16 %v5688_v39, %v5689_v49 }
 0x34a   :  { %v4703_v6 = vpop.eup %2924 }
 0x34b   :  { %v2112_v30 = vadd.f32 %v4703_v6, %v4699_v59  ;;  %2110 = vadd.xlane.f32.xlu0 %v2109_v63  ;;  %v5691_v63 = vld [vmem:[#allocation10_spill] sm:$0xff] }
 0x34d   :  { %2113 = vadd.xlane.f32.xlu1 %v2112_v30  ;;  %v5692_v30 = vld [vmem:[#allocation8_spill] sm:$0xff] }
 0x34e   :  { %1674 = vmatmul.mubr.bf16.gmra.mrb[100].mxu0 %v5663_v16  ;;  %v5693_v3 = vpack.c.bf16 %v5691_v63, %v5692_v30  ;;  %v5695_v16 = vld [vmem:[#allocation115_spill] sm:$0xff] }
 0x34f   :  { %1681 = vmatprep.mubr.bf16.mxu0 %v5666_v48  ;;  %v5696_v46 = vpack.c.bf16 %v5694_v13, %v5695_v16 }
 0x356   :  { %1682 = vmatmul.mubr.bf16.gmra.mrb[104].mxu0 %v5669_v26 }
 0x357   :  { %1689 = vmatprep.mubr.bf16.mxu0 %v5672_v4 }
 0x35e   :  { %1690 = vmatmul.mubr.bf16.gmra.mrb[108].mxu0 %v5675_v7 }
 0x35f   :  { %1697 = vmatprep.mubr.bf16.mxu0 %v5678_v25 }
 0x366   :  { %1698 = vmatmul.mubr.bf16.gmra.mrb[112].mxu0 %v5681_v33 }
 0x367   :  { %1705 = vmatprep.mubr.bf16.mxu0 %v5684_v53 }
 0x36e   :  { %1706 = vmatmul.mubr.bf16.gmra.mrb[116].mxu0 %v5687_v15 }
 0x36f   :  { %1713 = vmatprep.mubr.bf16.mxu0 %v5690_v41 }
 0x376   :  { %1714 = vmatmul.mubr.bf16.gmra.mrb[120].mxu0 %v5693_v3 }
 0x377   :  { %2227 = vmatprep.mubr.bf16.mxu0 %v5696_v46 }
 0x3ba   :  { %v2069_v48 = vpop.xlane.xlu0 %2068 }
 0x3bb   :  { %2926 = vrcp.f32 %v2069_v48 }
 0x3be   :  { %v2072_v54 = vpop.xlane.xlu1 %2071 }
 0x3bf   :  { %2928 = vrcp.f32 %v2072_v54 }
 0x3c0   :  { %v2075_v51 = vpop.xlane.xlu0 %2074 }
 0x3c1   :  { %2930 = vrcp.f32 %v2075_v51 }
 0x3c2   :  { %v2078_v26 = vpop.xlane.xlu1 %2077 }
 0x3c3   :  { %2932 = vrcp.f32 %v2078_v26 }
 0x3c4   :  { %v2081_v31 = vpop.xlane.xlu0 %2080 }
 0x3c5   :  { %2934 = vrcp.f32 %v2081_v31  ;;  %v2927_v4 = vpop.eup %2926 }
 0x3c6   :  { %v2084_v23 = vpop.xlane.xlu1 %2083  ;;  %v2132_v7 = vmul.f32 %v2927_v4, %v4580_v18  ;;  %v2131_v10 = vmul.f32 %v2927_v4, %v4578_v17 }
 0x3c7   :  { %2936 = vrcp.f32 %v2084_v23 }
 0x3c8   :  { %v2087_v34 = vpop.xlane.xlu0 %2086 }
 0x3c9   :  { %v2929_v20 = vpop.eup %2928 }
 0x3ca   :  { %v2090_v43 = vpop.xlane.xlu1 %2089  ;;  %v2134_v50 = vmul.f32 %v2929_v20, %v4591_v8  ;;  %v2133_v25 = vmul.f32 %v2929_v20, %v4589_v37 }
 0x3cb   :  { %v2931_v62 = vpop.eup %2930  ;;  %2938 = vrcp.f32 %v2090_v43 }
 0x3cc   :  { %v2180_v33 = vpack.c.bf16 %v2134_v50, %v2132_v7  ;;  %v2179_v60 = vpack.c.bf16 %v2133_v25, %v2131_v10  ;;  %v2136_v53 = vmul.f32 %v2931_v62, %v4598_v2  ;;  %2940 = vrcp.f32 %v2087_v34  ;;  %v2093_v2 = vpop.xlane.xlu0 %2092 }
 0x3cd   :  { %v2933_v35 = vpop.eup %2932  ;;  %v2135_v39 = vmul.f32 %v2931_v62, %v4593_v56 }
 0x3ce   :  { %2195 = vmatprep.subr.bf16.mxu0 %v2180_v33  ;;  %v2138_v29 = vmul.f32 %v2933_v35, %v4606_v36  ;;  %v2137_v17 = vmul.f32 %v2933_v35, %v4604_v57  ;;  %v2096_v15 = vpop.xlane.xlu1 %2095 }
 0x3cf   :  { %2196 = vmatpush1.bf16.xpose.msra.mxu0 %v2179_v60  ;;  %v2935_v18 = vpop.eup %2934  ;;  %2942 = vrcp.f32 %v2096_v15  ;;  %v5698_v15 = vld [vmem:[#allocation113_spill] sm:$0xff] }
 0x3d0   :  { %v2182_v1 = vpack.c.bf16 %v2138_v29, %v2136_v53  ;;  %v2140_v36 = vmul.f32 %v2935_v18, %v4616_v42  ;;  %v2181_v49 = vpack.c.bf16 %v2137_v17, %v2135_v39  ;;  %2944 = vrcp.f32 %v2093_v2  ;;  %v2099_v16 = vpop.xlane.xlu0 %2098  ;;  %v5697_v17 = vld [vmem:[#allocation117_spill] sm:$0xff]  ;;  %v4784_v2 = vld [vmem:[#allocation2] sm:$0xff]  }
 0x3d1   :  { %v2937_v8 = vpop.eup %2936  ;;  %v2139_v13 = vmul.f32 %v2935_v18, %v4611_v24 }
 0x3d2   :  { %2197 = vmatprep.subr.bf16.mxu0 %v2182_v1  ;;  %v2142_v37 = vmul.f32 %v2937_v8, %v4623_v22  ;;  %v2141_v30 = vmul.f32 %v2937_v8, %v4621_v11  ;;  %v2102_v22 = vpop.xlane.xlu1 %2101 }
 0x3d3   :  { %2946 = vrcp.f32 %v2102_v22  ;;  %v5707_v22 = vld [vmem:[#allocation140_spill] sm:$0xff] }
 0x3d4   :  { %v2184_v41 = vpack.c.bf16 %v2142_v37, %v2140_v36  ;;  %v2183_v42 = vpack.c.bf16 %v2141_v30, %v2139_v13  ;;  %2948 = vrcp.f32 %v2099_v16  ;;  %v2105_v31 = vpop.xlane.xlu0 %2104  ;;  %v5699_v37 = vpack.c.bf16 %v5697_v17, %v5698_v15  ;;  %v5706_v30 = vld [vmem:[#allocation150_spill] sm:$0xff] }
 0x3d5   :  { %v2939_v63 = vpop.eup %2938 }
 0x3d6   :  { %v2941_v57 = vpop.eup %2940  ;;  %v2146_v3 = vmul.f32 %v2939_v63, %v4639_v0  ;;  %v2145_v51 = vmul.f32 %v2939_v63, %v4637_v21  ;;  %v2108_v26 = vpop.xlane.xlu1 %2107  ;;  %v5704_v63 = vld [vmem:[#allocation93_spill] sm:$0xff] }
 0x3d7   :  { %2198 = vmatpush1.bf16.xpose.msra.mxu0 %v2181_v49  ;;  %v2144_v56 = vmul.f32 %v2941_v57, %v4632_v9  ;;  %v2143_v0 = vmul.f32 %v2941_v57, %v4627_v32  ;;  %2950 = vrcp.f32 %v2108_v26  ;;  %v5710_v26 = vld [vmem:[#allocation138_spill] sm:$0xff] }
 0x3d8   :  { %2199 = vmatprep.subr.bf16.mxu0 %v2184_v41  ;;  %2952 = vrcp.f32 %v2105_v31  ;;  %v2111_v50 = vpop.xlane.xlu0 %2110  ;;  %v5713_v31 = vld [vmem:[#allocation162_spill] sm:$0xff] }
 0x3d9   :  { %v2186_v46 = vpack.c.bf16 %v2146_v3, %v2144_v56  ;;  %v2943_v48 = vpop.eup %2942  ;;  %v2185_v9 = vpack.c.bf16 %v2145_v51, %v2143_v0  ;;  %v5708_v3 = vpack.c.bf16 %v5706_v30, %v5707_v22  ;;  %v4794_v56 = vld [vmem:[#allocation2 + $0x8] sm:$0xff]   ;;  %v5709_v51 = vld [vmem:[#allocation144_spill] sm:$0xff]  ;;  %v5733_v30 = vld [vmem:[#allocation175_spill] sm:$0xff] }
 0x3da   :  { %v2945_v54 = vpop.eup %2944  ;;  %v2150_v11 = vmul.f32 %v2943_v48, %v4655_v38  ;;  %v2149_v43 = vmul.f32 %v2943_v48, %v4651_v19  ;;  %v2114_v7 = vpop.xlane.xlu1 %2113  ;;  %v5712_v0 = vld [vmem:[#allocation164_spill] sm:$0xff]  ;;  %v5734_v22 = vld [vmem:[#allocation173_spill] sm:$0xff] }
 0x3db   :  { %v2148_v24 = vmul.f32 %v2945_v54, %v4649_v14  ;;  %v2147_v38 = vmul.f32 %v2945_v54, %v4643_v28  ;;  %2954 = vrcp.f32 %v2114_v7 }
 0x3dc   :  { %2956 = vrcp.f32 %v2111_v50  ;;  %v5716_v50 = vld [vmem:[#allocation157_spill] sm:$0xff] }
 0x3dd   :  { %v2188_v23 = vpack.c.bf16 %v2150_v11, %v2148_v24  ;;  %v2947_v4 = vpop.eup %2946  ;;  %v2187_v14 = vpack.c.bf16 %v2149_v43, %v2147_v38  ;;  %v5711_v11 = vpack.c.bf16 %v5709_v51, %v5710_v26  ;;  %v5714_v24 = vpack.c.bf16 %v5712_v0, %v5713_v31  ;;  %v5715_v38 = vld [vmem:[#allocation163_spill] sm:$0xff] }
 0x3de   :  { %v2949_v20 = vpop.eup %2948  ;;  %v2154_v21 = vmul.f32 %v2947_v4, %v4673_v27  ;;  %v2153_v34 = vmul.f32 %v2947_v4, %v4669_v45  ;;  %v4804_v4 = vld [vmem:[#allocation2 + $0x10] sm:$0xff]   ;;  %v5739_v31 = vld [vmem:[#allocation179_spill] sm:$0xff] }
 0x3df   :  { %2200 = vmatpush1.bf16.xpose.msra.mxu0 %v2183_v42  ;;  %v2152_v32 = vmul.f32 %v2949_v20, %v4667_v52  ;;  %v2151_v33 = vmul.f32 %v2949_v20, %v4660_v55 }
 0x3e0   :  { %2201 = vmatprep.subr.bf16.mxu0 %v2186_v46 }
 0x3e1   :  { %v2190_v10 = vpack.c.bf16 %v2154_v21, %v2152_v32  ;;  %v2951_v25 = vpop.eup %2950  ;;  %v2189_v28 = vpack.c.bf16 %v2153_v34, %v2151_v33  ;;  %v5717_v32 = vpack.c.bf16 %v5715_v38, %v5716_v50 }
 0x3e2   :  { %v2953_v62 = vpop.eup %2952  ;;  %v2158_v19 = vmul.f32 %v2951_v25, %v4685_v5  ;;  %v2157_v53 = vmul.f32 %v2951_v25, %v4681_v44  ;;  %v5700_v44 = vld [vmem:[#allocation129_spill] sm:$0xff] }
 0x3e3   :  { %v2156_v27 = vmul.f32 %v2953_v62, %v4679_v47  ;;  %v2155_v18 = vmul.f32 %v2953_v62, %v4675_v12 }
 0x3e5   :  { %v2192_v60 = vpack.c.bf16 %v2158_v19, %v2156_v27  ;;  %v2955_v35 = vpop.eup %2954  ;;  %v2191_v1 = vpack.c.bf16 %v2157_v53, %v2155_v18  ;;  %v4814_v19 = vld [vmem:[#allocation2 + $0x18] sm:$0xff]   ;;  %v5725_v18 = vld [vmem:[#allocation170_spill] sm:$0xff] }
 0x3e6   :  { %v2957_v52 = vpop.eup %2956  ;;  %v2162_v29 = vmul.f32 %v2955_v35, %v4703_v6  ;;  %v2161_v55 = vmul.f32 %v2955_v35, %v4699_v59  ;;  %v5701_v6 = vld [vmem:[#allocation126_spill] sm:$0xff]  ;;  %v5721_v35 = vld [vmem:[#allocation167_spill] sm:$0xff] }
 0x3e7   :  { %2202 = vmatpush1.bf16.xpose.msra.mxu0 %v2185_v9  ;;  %v2160_v45 = vmul.f32 %v2957_v52, %v4697_v58  ;;  %v2159_v47 = vmul.f32 %v2957_v52, %v4690_v61  ;;  %v5702_v39 = vpack.c.bf16 %v5700_v44, %v5701_v6  ;;  %v5703_v61 = vld [vmem:[#allocation86_spill] sm:$0xff]  ;;  %v5722_v52 = vld [vmem:[#allocation165_spill] sm:$0xff] }
 0x3e8   :  { %2203 = vmatprep.subr.bf16.mxu0 %v2188_v23  ;;  %v5705_v57 = vpack.c.bf16 %v5703_v61, %v5704_v63  ;;  %v5723_v53 = vpack.c.bf16 %v5721_v35, %v5722_v52  ;;  %v5728_v44 = vld [vmem:[#allocation169_spill] sm:$0xff]  ;;  %v5752_v52 = vld [vmem:[#allocation15_spill] sm:$0xff] }
 0x3e9   :  { %v2194_v5 = vpack.c.bf16 %v2162_v29, %v2160_v45  ;;  %v2193_v8 = vpack.c.bf16 %v2161_v55, %v2159_v47  ;;  %v5724_v29 = vld [vmem:[#allocation172_spill] sm:$0xff] }
 0x3ea   :  { %v5726_v45 = vpack.c.bf16 %v5724_v29, %v5725_v18  ;;  %v4824_v55 = vld [vmem:[#allocation2 + $0x20] sm:$0xff]  }
 0x3eb   :  { %v5755_v18 = vld [vmem:[#allocation56_spill] sm:$0xff] }
 0x3ef   :  { %2204 = vmatpush1.bf16.xpose.msra.mxu0 %v2187_v14  ;;  %v5718_v14 = vld [vmem:[#allocation168_spill] sm:$0xff] }
 0x3f0   :  { %2205 = vmatprep.subr.bf16.mxu0 %v2190_v10  ;;  %v5719_v10 = vld [vmem:[#allocation166_spill] sm:$0xff] }
 0x3f1   :  { %v5720_v25 = vpack.c.bf16 %v5718_v14, %v5719_v10  ;;  %v5742_v14 = vld [vmem:[#allocation17_spill] sm:$0xff]  ;;  %v5743_v10 = vld [vmem:[#allocation16_spill] sm:$0xff] }
 0x3f7   :  { %2206 = vmatpush1.bf16.xpose.msra.mxu0 %v2189_v28 }
 0x3f8   :  { %2207 = vmatprep.subr.bf16.mxu0 %v2192_v60 }
 0x3ff   :  { %2208 = vmatpush1.bf16.xpose.msra.mxu0 %v2191_v1 }
 0x400   :  { %2209 = vmatprep.subr.bf16.mxu0 %v2194_v5 }
 0x407   :  { %2210 = vmatpush1.bf16.xpose.msra.mxu0 %v2193_v8 }
 0x40e   :  { %2228 = vmatmul.mubr.bf16.vlgmr.msra.gmra.mrb[124].mxu0 %v5699_v37  ;;  %v5727_v37 = vld [vmem:[#allocation171_spill] sm:$0xff] }
 0x40f   :  { %2235 = vmatprep.mubr.bf16.mxu0 %v5702_v39  ;;  %v5729_v6 = vpack.c.bf16 %v5727_v37, %v5728_v44  ;;  %v5730_v39 = vld [vmem:[#allocation176_spill] sm:$0xff]  ;;  %v5764_v44 = vld [vmem:[#allocation23_spill] sm:$0xff] }
 0x411   :  { %v1659_v12 = vpop.f32.mrb[92].mxu0 }
 0x412   :  { %v1661_v58 = vpop.f32.mrb[93].mxu0 }
 0x413   :  { %v1662_v36 = vpop.f32.mrb[94].mxu0 }
 0x414   :  { %v1722_v49 = vpack.c.bf16 %v1662_v36, %v1659_v12  ;;  %v1664_v41 = vpop.f32.mrb[95].mxu0  ;;  %v5731_v12 = vld [vmem:[#allocation174_spill] sm:$0xff] }
 0x415   :  { %v5732_v58 = vpack.c.bf16 %v5730_v39, %v5731_v12  ;;  %v4834_v41 = vld [vmem:[#allocation2 + $0x28] sm:$0xff]   ;;  %v5767_v12 = vld [vmem:[#allocation44_spill] sm:$0xff] }
 0x416   :  { %v1778_v59 = vmul.bf16 %v4784_v2, %v1722_v49  ;;  %2236 = vmatmul.mubr.bf16.gmra.mrb[128].mxu0 %v5705_v57 }
 0x417   :  { %2243 = vmatprep.mubr.bf16.mxu0 %v5708_v3  ;;  %v5735_v3 = vpack.c.bf16 %v5733_v30, %v5734_v22  ;;  %v5776_v22 = vld [vmem:[#allocation41_spill] sm:$0xff] }
 0x418   :  { %2529 = vmatpush3.bf16.msra.mxu1 %v1778_v59 }
 0x419   :  { %v1667_v13 = vpop.f32.mrb[96].mxu0  ;;  %2530 = vmatprep.subr.bf16.mxu1 %v3014_v40 }
 0x41a   :  { %v1669_v16 = vpop.f32.mrb[97].mxu0 }
 0x41b   :  { %v1670_v42 = vpop.f32.mrb[98].mxu0  ;;  %v5737_v16 = vld [vmem:[#allocation178_spill] sm:$0xff] }
 0x41c   :  { %v1723_v46 = vpack.c.bf16 %v1670_v42, %v1667_v13  ;;  %v1672_v48 = vpop.f32.mrb[99].mxu0  ;;  %v5736_v13 = vld [vmem:[#allocation180_spill] sm:$0xff] }
 0x41d   :  { %v5738_v42 = vpack.c.bf16 %v5736_v13, %v5737_v16  ;;  %v5779_v16 = vld [vmem:[#allocation76_spill] sm:$0xff] }
 0x41e   :  { %v1779_v54 = vmul.bf16 %v4794_v56, %v1723_v46  ;;  %2244 = vmatmul.mubr.bf16.gmra.mrb[132].mxu0 %v5711_v11 }
 0x41f   :  { %2251 = vmatprep.mubr.bf16.mxu0 %v5714_v24  ;;  %v5740_v24 = vld [vmem:[#allocation177_spill] sm:$0xff] }
 0x420   :  { %2531 = vmatpush3.bf16.msra.mxu1 %v1779_v54  ;;  %v4844_v54 = vld [vmem:[#allocation2 + $0x30] sm:$0xff]  }
 0x421   :  { %v1675_v9 = vpop.f32.mrb[100].mxu0  ;;  %2532 = vmatprep.subr.bf16.mxu1 %v3014_v40 }
 0x422   :  { %v1677_v23 = vpop.f32.mrb[101].mxu0 }
 0x423   :  { %v1678_v20 = vpop.f32.mrb[102].mxu0 }
 0x424   :  { %v1724_v43 = vpack.c.bf16 %v1678_v20, %v1675_v9  ;;  %v1680_v7 = vpop.f32.mrb[103].mxu0  ;;  %v5741_v9 = vpack.c.bf16 %v5739_v31, %v5740_v24  ;;  %v5788_v24 = vld [vmem:[#allocation70_spill] sm:$0xff] }
 0x426   :  { %v1780_v21 = vmul.bf16 %v4804_v4, %v1724_v43  ;;  %2252 = vmatmul.mubr.bf16.gmra.mrb[136].mxu0 %v5717_v32  ;;  %v4851_v43 = vld [vmem:[#allocation2 + $0x38] sm:$0xff]   ;;  %v4857_v32 = vld [vmem:[%s5000_s2] sm:$0xf] }
 0x427   :  { %2259 = vmatprep.mubr.bf16.mxu0 %v5720_v25  ;;  %v5744_v25 = vpack.c.bf16 %v5742_v14, %v5743_v10  ;;  %v1350_v14 = vld [vmem:[%s5002_s4] sm:$0xff] }
 0x428   :  { %2533 = vmatpush3.bf16.msra.mxu1 %v1780_v21  ;;  %1829 = vperm.xlu0 %2589, %v1350_v14   ;;  %v5804_v14 = vld [vmem:[#allocation91_spill] sm:$0xff] }
 0x429   :  { %v1683_v62 = vpop.f32.mrb[104].mxu0  ;;  %2534 = vmatprep.subr.bf16.mxu1 %v3014_v40 }
 0x42a   :  { %v1685_v34 = vpop.f32.mrb[105].mxu0 }
 0x42b   :  { %v1686_v33 = vpop.f32.mrb[106].mxu0  ;;  %v5746_v34 = vld [vmem:[#allocation12_spill] sm:$0xff] }
 0x42c   :  { %v1725_v27 = vpack.c.bf16 %v1686_v33, %v1683_v62  ;;  %v1688_v28 = vpop.f32.mrb[107].mxu0  ;;  %v5745_v62 = vld [vmem:[#allocation13_spill] sm:$0xff] }
 0x42d   :  { %v5747_v33 = vpack.c.bf16 %v5745_v62, %v5746_v34  ;;  %v5749_v28 = vld [vmem:[#allocation19_spill] sm:$0xff] }
 0x42e   :  { %v1781_v60 = vmul.bf16 %v4814_v19, %v1725_v27  ;;  %2260 = vmatmul.mubr.bf16.gmra.mrb[140].mxu0 %v5723_v53  ;;  %v5748_v27 = vmov 0   ;;  %v5753_v53 = vld [vmem:[#allocation14_spill] sm:$0xff] }
 0x42f   :  { %2267 = vmatprep.mubr.bf16.mxu0 %v5726_v45  ;;  %v5754_v29 = vpack.c.bf16 %v5752_v52, %v5753_v53  ;;  %v5756_v45 = vld [vmem:[#allocation24_spill] sm:$0xff] }
 0x430   :  { %2535 = vmatpush3.bf16.msra.mxu1 %v1781_v60  ;;  %v5750_v60 = vld [vmem:[#allocation18_spill] sm:$0xff] }
 0x431   :  { %v1691_v1 = vpop.f32.mrb[108].mxu0  ;;  %2536 = vmatprep.subr.bf16.mxu1 %v3014_v40  ;;  %v5751_v35 = vpack.c.bf16 %v5749_v28, %v5750_v60 }
 0x432   :  { %v1693_v5 = vpop.f32.mrb[109].mxu0 }
 0x433   :  { %v1694_v47 = vpop.f32.mrb[110].mxu0  ;;  %v5758_v5 = vld [vmem:[#allocation20_spill] sm:$0xff] }
 0x434   :  { %v1726_v8 = vpack.c.bf16 %v1694_v47, %v1691_v1  ;;  %v1696_v17 = vpop.f32.mrb[111].mxu0  ;;  %v5757_v1 = vpack.c.bf16 %v5755_v18, %v5756_v45  ;;  %v5759_v47 = vld [vmem:[#allocation25_spill] sm:$0xff] }
 0x435   :  { %v5761_v17 = vld [vmem:[#allocation27_spill] sm:$0xff] }
 0x436   :  { %v1782_v15 = vmul.bf16 %v4824_v55, %v1726_v8  ;;  %2268 = vmatmul.mubr.bf16.gmra.mrb[144].mxu0 %v5729_v6  ;;  %v5760_v8 = vpack.c.bf16 %v5758_v5, %v5759_v47  ;;  %v5765_v6 = vld [vmem:[#allocation22_spill] sm:$0xff] }
 0x437   :  { %2275 = vmatprep.mubr.bf16.mxu0 %v5732_v58  ;;  %v5766_v39 = vpack.c.bf16 %v5764_v44, %v5765_v6  ;;  %v5768_v58 = vld [vmem:[#allocation42_spill] sm:$0xff] }
 0x438   :  { %2537 = vmatpush3.bf16.msra.mxu1 %v1782_v15  ;;  %v5762_v15 = vld [vmem:[#allocation51_spill] sm:$0xff] }
 0x439   :  { %v1699_v36 = vpop.f32.mrb[112].mxu0  ;;  %2538 = vmatprep.subr.bf16.mxu1 %v3014_v40  ;;  %v5763_v37 = vpack.c.bf16 %v5761_v17, %v5762_v15 }
 0x43a   :  { %v1701_v49 = vpop.f32.mrb[113].mxu0 }
 0x43b   :  { %v1702_v59 = vpop.f32.mrb[114].mxu0  ;;  %v5770_v49 = vld [vmem:[#allocation73_spill] sm:$0xff] }
 0x43c   :  { %v1727_v61 = vpack.c.bf16 %v1702_v59, %v1699_v36  ;;  %v1704_v63 = vpop.f32.mrb[115].mxu0  ;;  %v5769_v36 = vpack.c.bf16 %v5767_v12, %v5768_v58  ;;  %v5771_v59 = vld [vmem:[#allocation37_spill] sm:$0xff] }
 0x43d   :  { %v5773_v63 = vld [vmem:[#allocation48_spill] sm:$0xff] }
 0x43e   :  { %v1783_v57 = vmul.bf16 %v4834_v41, %v1727_v61  ;;  %2276 = vmatmul.mubr.bf16.gmra.mrb[148].mxu0 %v5735_v3  ;;  %v5772_v61 = vpack.c.bf16 %v5770_v49, %v5771_v59  ;;  %v5777_v3 = vld [vmem:[#allocation40_spill] sm:$0xff] }
 0x43f   :  { %2283 = vmatprep.mubr.bf16.mxu0 %v5738_v42  ;;  %v5778_v13 = vpack.c.bf16 %v5776_v22, %v5777_v3  ;;  %v5780_v42 = vld [vmem:[#allocation74_spill] sm:$0xff] }
 0x440   :  { %2539 = vmatpush3.bf16.msra.mxu1 %v1783_v57  ;;  %v5774_v57 = vld [vmem:[#allocation39_spill] sm:$0xff] }
 0x441   :  { %v1707_v46 = vpop.f32.mrb[116].mxu0  ;;  %2540 = vmatprep.subr.bf16.mxu1 %v3014_v40  ;;  %v5775_v30 = vpack.c.bf16 %v5773_v63, %v5774_v57 }
 0x442   :  { %v1709_v48 = vpop.f32.mrb[117].mxu0 }
 0x443   :  { %v1710_v51 = vpop.f32.mrb[118].mxu0  ;;  %v5782_v48 = vld [vmem:[#allocation67_spill] sm:$0xff] }
 0x444   :  { %v1728_v26 = vpack.c.bf16 %v1710_v51, %v1707_v46  ;;  %v1712_v11 = vpop.f32.mrb[119].mxu0  ;;  %v5781_v46 = vpack.c.bf16 %v5779_v16, %v5780_v42  ;;  %v5783_v51 = vld [vmem:[#allocation65_spill] sm:$0xff] }
 0x445   :  { %v5785_v11 = vld [vmem:[#allocation82_spill] sm:$0xff] }
 0x446   :  { %v1784_v0 = vmul.bf16 %v4844_v54, %v1728_v26  ;;  %2284 = vmatmul.mubr.bf16.gmra.mrb[152].mxu0 %v5741_v9  ;;  %v5784_v26 = vpack.c.bf16 %v5782_v48, %v5783_v51  ;;  %v5789_v9 = vld [vmem:[#allocation69_spill] sm:$0xff] }
 0x448   :  { %2541 = vmatpush3.bf16.msra.mxu1 %v1784_v0  ;;  %v5786_v0 = vld [vmem:[#allocation78_spill] sm:$0xff] }
 0x449   :  { %v1715_v23 = vpop.f32.mrb[120].mxu0  ;;  %2542 = vmatprep.subr.bf16.mxu1 %v3014_v40  ;;  %v5787_v31 = vpack.c.bf16 %v5785_v11, %v5786_v0 }
 0x44a   :  { %v1717_v20 = vpop.f32.mrb[121].mxu0 }
 0x44b   :  { %v1718_v7 = vpop.f32.mrb[122].mxu0 }
 0x44c   :  { %v1729_v21 = vpack.c.bf16 %v1718_v7, %v1715_v23  ;;  %v1720_v38 = vpop.f32.mrb[123].mxu0  ;;  %v5790_v23 = vpack.c.bf16 %v5788_v24, %v5789_v9  ;;  %v5791_v24 = vld [vmem:[#allocation58_spill] sm:$0xff]  ;;  %v5792_v9 = vld [vmem:[#allocation57_spill] sm:$0xff] }
 0x44e   :  { %v1785_v50 = vmul.bf16 %v4851_v43, %v1729_v21 }
 0x450   :  { %2543 = vmatpush3.bf16.msra.mxu1 %v1785_v50 }
 0x451   :  { %1832 = vmatprep.subr.bf16.mxu1 %v5744_v25 }
 0x453   :  { %2545 = vmatmul.mubr.bf16.vlgmr.msra.gmra.mrb[100].mxu1 %v4857_v32 }
 0x454   :  { %1833 = vmatpush1.bf16.msra.mxu1 %v5747_v33  ;;  %1864 = vmatprep.mubr.bf16.mxu1 %v5748_v27 }
 0x455   :  { %1834 = vmatprep.subr.bf16.mxu1 %v5751_v35 }
 0x458   :  { %1835 = vmatpush1.bf16.msra.mxu1 %v5754_v29 }
 0x459   :  { %1836 = vmatprep.subr.bf16.mxu1 %v5757_v1 }
 0x45c   :  { %1837 = vmatpush1.bf16.msra.mxu1 %v5760_v8 }
 0x45d   :  { %1838 = vmatprep.subr.bf16.mxu1 %v5763_v37 }
 0x460   :  { %1839 = vmatpush1.bf16.msra.mxu1 %v5766_v39 }
 0x461   :  { %1840 = vmatprep.subr.bf16.mxu1 %v5769_v36 }
 0x464   :  { %1841 = vmatpush1.bf16.msra.mxu1 %v5772_v61 }
 0x465   :  { %1842 = vmatprep.subr.bf16.mxu1 %v5775_v30 }
 0x468   :  { %1843 = vmatpush1.bf16.msra.mxu1 %v5778_v13 }
 0x469   :  { %1844 = vmatprep.subr.bf16.mxu1 %v5781_v46 }
 0x46c   :  { %1845 = vmatpush1.bf16.msra.mxu1 %v5784_v26 }
 0x46d   :  { %1846 = vmatprep.subr.bf16.mxu1 %v5787_v31 }
 0x470   :  { %1847 = vmatpush1.bf16.msra.mxu1 %v5790_v23  ;;  %v5793_v23 = vpack.c.bf16 %v5791_v24, %v5792_v9 }
 0x471   :  { %2548 = vmatprep.subr.bf16.mxu1 %v3014_v40 }
 0x4e1   :  { %v2229_v20 = vpop.f32.mrb[124].mxu0 }
 0x4e2   :  { %v2231_v7 = vpop.f32.mrb[125].mxu0 }
 0x4e3   :  { %v2232_v21 = vpop.f32.mrb[126].mxu0  ;;  %v5797_v7 = vld [vmem:[#allocation61_spill] sm:$0xff] }
 0x4e4   :  { %v2292_v38 = vpack.c.bf16 %v2232_v21, %v2229_v20  ;;  %v2234_v50 = vpop.f32.mrb[127].mxu0  ;;  %v5795_v20 = vld [vmem:[#allocation50_spill] sm:$0xff] }
 0x4e5   :  { %v5803_v50 = vld [vmem:[#allocation92_spill] sm:$0xff] }
 0x4e6   :  { %v2300_v48 = vmul.bf16 %v4784_v2, %v2292_v38  ;;  %v5801_v38 = vld [vmem:[#allocation54_spill] sm:$0xff] }
 0x4e9   :  { %v2237_v10 = vpop.f32.mrb[128].mxu0 }
 0x4ea   :  { %v2239_v25 = vpop.f32.mrb[129].mxu0 }
 0x4eb   :  { %v2240_v62 = vpop.f32.mrb[130].mxu0  ;;  %v5806_v25 = vld [vmem:[#allocation85_spill] sm:$0xff] }
 0x4ec   :  { %v2293_v34 = vpack.c.bf16 %v2240_v62, %v2237_v10  ;;  %v2242_v33 = vpop.f32.mrb[131].mxu0  ;;  %v5805_v10 = vpack.c.bf16 %v5803_v50, %v5804_v14 }
 0x4ed   :  { %v5810_v33 = vld [vmem:[#allocation134_spill] sm:$0xff] }
 0x4ee   :  { %v2301_v11 = vmul.bf16 %v4794_v56, %v2293_v34  ;;  %v5809_v34 = vld [vmem:[#allocation136_spill] sm:$0xff] }
 0x4f1   :  { %v2245_v28 = vpop.f32.mrb[132].mxu0 }
 0x4f2   :  { %v2247_v60 = vpop.f32.mrb[133].mxu0 }
 0x4f3   :  { %v2248_v35 = vpop.f32.mrb[134].mxu0  ;;  %v5813_v60 = vld [vmem:[#allocation88_spill] sm:$0xff] }
 0x4f4   :  { %v2294_v52 = vpack.c.bf16 %v2248_v35, %v2245_v28  ;;  %v2250_v53 = vpop.f32.mrb[135].mxu0  ;;  %v5811_v28 = vpack.c.bf16 %v5809_v34, %v5810_v33 }
 0x4f5   :  { %v5816_v53 = vld [vmem:[#allocation137_spill] sm:$0xff] }
 0x4f6   :  { %v2302_v0 = vmul.bf16 %v4804_v4, %v2294_v52  ;;  %v5815_v52 = vld [vmem:[#allocation142_spill] sm:$0xff] }
 0x4f9   :  { %v2253_v29 = vpop.f32.mrb[136].mxu0 }
 0x4fa   :  { %v2255_v18 = vpop.f32.mrb[137].mxu0 }
 0x4fb   :  { %v2256_v45 = vpop.f32.mrb[138].mxu0  ;;  %v5818_v18 = vld [vmem:[#allocation146_spill] sm:$0xff] }
 0x4fc   :  { %v2295_v1 = vpack.c.bf16 %v2256_v45, %v2253_v29  ;;  %v2258_v5 = vpop.f32.mrb[139].mxu0  ;;  %v5817_v29 = vpack.c.bf16 %v5815_v52, %v5816_v53  ;;  %v5819_v45 = vld [vmem:[#allocation143_spill] sm:$0xff] }
 0x4fd   :  { %v5821_v5 = vld [vmem:[#allocation148_spill] sm:$0xff] }
 0x4fe   :  { %v2303_v2 = vmul.bf16 %v4814_v19, %v2295_v1  ;;  %v5820_v1 = vpack.c.bf16 %v5818_v18, %v5819_v45 }
 0x501   :  { %v2261_v47 = vpop.f32.mrb[140].mxu0 }
 0x502   :  { %v2263_v8 = vpop.f32.mrb[141].mxu0 }
 0x503   :  { %v2264_v17 = vpop.f32.mrb[142].mxu0 }
 0x504   :  { %v2296_v15 = vpack.c.bf16 %v2264_v17, %v2261_v47  ;;  %v2266_v37 = vpop.f32.mrb[143].mxu0  ;;  %v5822_v47 = vld [vmem:[#allocation147_spill] sm:$0xff]  ;;  %v5824_v17 = vld [vmem:[#allocation152_spill] sm:$0xff] }
 0x505   :  { %v5823_v8 = vpack.c.bf16 %v5821_v5, %v5822_v47 }
 0x506   :  { %v2304_v31 = vmul.bf16 %v4824_v55, %v2296_v15  ;;  %v5794_v55 = vld [vmem:[#allocation52_spill] sm:$0xff]  ;;  %v5825_v15 = vld [vmem:[#allocation149_spill] sm:$0xff] }
 0x507   :  { %v5826_v37 = vpack.c.bf16 %v5824_v17, %v5825_v15 }
 0x509   :  { %v2269_v44 = vpop.f32.mrb[144].mxu0 }
 0x50a   :  { %v2271_v6 = vpop.f32.mrb[145].mxu0 }
 0x50b   :  { %v2272_v39 = vpop.f32.mrb[146].mxu0  ;;  %v5828_v6 = vld [vmem:[#allocation158_spill] sm:$0xff] }
 0x50c   :  { %v2297_v12 = vpack.c.bf16 %v2272_v39, %v2269_v44  ;;  %v2274_v58 = vpop.f32.mrb[147].mxu0  ;;  %v5827_v44 = vld [vmem:[#allocation159_spill] sm:$0xff] }
 0x50d   :  { %v5829_v39 = vpack.c.bf16 %v5827_v44, %v5828_v6  ;;  %v5831_v58 = vld [vmem:[#allocation153_spill] sm:$0xff] }
 0x50e   :  { %v2305_v56 = vmul.bf16 %v4834_v41, %v2297_v12  ;;  %v5796_v41 = vpack.c.bf16 %v5794_v55, %v5795_v20  ;;  %v5830_v12 = vld [vmem:[#allocation154_spill] sm:$0xff] }
 0x511   :  { %v2277_v36 = vpop.f32.mrb[148].mxu0 }
 0x512   :  { %v2279_v49 = vpop.f32.mrb[149].mxu0 }
 0x513   :  { %v2280_v59 = vpop.f32.mrb[150].mxu0  ;;  %v5833_v49 = vld [vmem:[#allocation161_spill] sm:$0xff] }
 0x514   :  { %v2298_v61 = vpack.c.bf16 %v2280_v59, %v2277_v36  ;;  %v2282_v63 = vpop.f32.mrb[151].mxu0  ;;  %v5832_v36 = vpack.c.bf16 %v5830_v12, %v5831_v58  ;;  %v5834_v59 = vld [vmem:[#allocation160_spill] sm:$0xff]  ;;  %v1351_v12 = vld [vmem:[%s5002_s4 + $0x8] sm:$0xff]  ;;  %v1352_v58 = vld [vmem:[%s5002_s4 + $0x10] sm:$0xff] }
 0x515   :  { %v5836_v63 = vld [vmem:[#allocation156_spill] sm:$0xff] }
 0x516   :  { %v2306_v4 = vmul.bf16 %v4844_v54, %v2298_v61  ;;  %v5798_v54 = vld [vmem:[#allocation59_spill] sm:$0xff]  ;;  %v5835_v61 = vpack.c.bf16 %v5833_v49, %v5834_v59 }
 0x517   :  { %v5799_v21 = vpack.c.bf16 %v5797_v7, %v5798_v54 }
 0x519   :  { %v2285_v57 = vpop.f32.mrb[152].mxu0 }
 0x51a   :  { %v2287_v30 = vpop.f32.mrb[153].mxu0 }
 0x51b   :  { %v2288_v22 = vpop.f32.mrb[154].mxu0 }
 0x51c   :  { %v2299_v3 = vpack.c.bf16 %v2288_v22, %v2285_v57  ;;  %v2290_v13 = vpop.f32.mrb[155].mxu0  ;;  %v5837_v57 = vld [vmem:[#allocation155_spill] sm:$0xff]  ;;  %v1830_v22 = vpop.permute.xlu0 %1829 }
 0x51d   :  { %v5838_v30 = vpack.c.bf16 %v5836_v63, %v5837_v57 }
 0x51e   :  { %v2307_v19 = vmul.bf16 %v4851_v43, %v2299_v3 }
 0x526   :  { %v1820_v16 = vpop.f32.mrb[100].mxu1 }
 0x527   :  { %v1826_v42 = vpack.c.bf16 %v1820_v16, %v1820_v16  ;;  %v2546_v46 = vpop.f32.mrb[101].mxu1 }
 0x528   :  { %v1823_v51 = vpop.f32.mrb[102].mxu1 }
 0x529   :  { %1865 = vmatmul.mubr.bf16.vlgmr.msra.gmra.mrb[104].mxu1 %v1826_v42  ;;  %v2547_v26 = vpop.f32.mrb[103].mxu1 }
 0x52a   :  { %2549 = vmatpush3.bf16.msra.mxu1 %v2300_v48  ;;  %2564 = vmatprep.mubr.msk.bf16.mxu1 %vm3015_vm2, %v3014_v40 }
 0x52b   :  { %2550 = vmatprep.subr.bf16.mxu1 %v3014_v40 }
 0x52e   :  { %2551 = vmatpush3.bf16.msra.mxu1 %v2301_v11 }
 0x52f   :  { %2552 = vmatprep.subr.bf16.mxu1 %v3014_v40 }
 0x532   :  { %2553 = vmatpush3.bf16.msra.mxu1 %v2302_v0 }
 0x533   :  { %2554 = vmatprep.subr.bf16.mxu1 %v3014_v40 }
 0x536   :  { %2555 = vmatpush3.bf16.msra.mxu1 %v2303_v2 }
 0x537   :  { %2556 = vmatprep.subr.bf16.mxu1 %v3014_v40 }
 0x53a   :  { %2557 = vmatpush3.bf16.msra.mxu1 %v2304_v31 }
 0x53b   :  { %2558 = vmatprep.subr.bf16.mxu1 %v3014_v40 }
 0x53e   :  { %2559 = vmatpush3.bf16.msra.mxu1 %v2305_v56 }
 0x53f   :  { %2560 = vmatprep.subr.bf16.mxu1 %v3014_v40 }
 0x542   :  { %2561 = vmatpush3.bf16.msra.mxu1 %v2306_v4 }
 0x543   :  { %2562 = vmatprep.subr.bf16.mxu1 %v3014_v40  ;;  %v5800_v40 = vld [vmem:[#allocation55_spill] sm:$0xff] }
 0x544   :  { %v5802_v43 = vpack.c.bf16 %v5800_v40, %v5801_v38 }
 0x546   :  { %2563 = vmatpush3.bf16.msra.mxu1 %v2307_v19 }
 0x547   :  { %2349 = vmatprep.subr.bf16.mxu1 %v5793_v23 }
 0x549   :  { %2565 = vmatmul.mubr.bf16.vlgmr.msra.gmra.mrb[108].mxu1 %v4857_v32  ;;  %v5807_v32 = vld [vmem:[#allocation83_spill] sm:$0xff] }
 0x54a   :  { %2350 = vmatpush1.bf16.msra.mxu1 %v5796_v41  ;;  %2381 = vmatprep.mubr.bf16.mxu1 %v5748_v27  ;;  %v5808_v62 = vpack.c.bf16 %v5806_v25, %v5807_v32  ;;  %v5812_v27 = vld [vmem:[#allocation90_spill] sm:$0xff] }
 0x54b   :  { %2351 = vmatprep.subr.bf16.mxu1 %v5799_v21  ;;  %v5814_v35 = vpack.c.bf16 %v5812_v27, %v5813_v60 }
 0x54e   :  { %2352 = vmatpush1.bf16.msra.mxu1 %v5802_v43 }
 0x54f   :  { %2353 = vmatprep.subr.bf16.mxu1 %v5805_v10 }
 0x552   :  { %2354 = vmatpush1.bf16.msra.mxu1 %v5808_v62 }
 0x553   :  { %2355 = vmatprep.subr.bf16.mxu1 %v5811_v28 }
 0x556   :  { %2356 = vmatpush1.bf16.msra.mxu1 %v5814_v35 }
 0x557   :  { %2357 = vmatprep.subr.bf16.mxu1 %v5817_v29 }
 0x55a   :  { %2358 = vmatpush1.bf16.msra.mxu1 %v5820_v1 }
 0x55b   :  { %2359 = vmatprep.subr.bf16.mxu1 %v5823_v8 }
 0x55e   :  { %2360 = vmatpush1.bf16.msra.mxu1 %v5826_v37 }
 0x55f   :  { %2361 = vmatprep.subr.bf16.mxu1 %v5829_v39 }
 0x562   :  { %2362 = vmatpush1.bf16.msra.mxu1 %v5832_v36 }
 0x563   :  { %2363 = vmatprep.subr.bf16.mxu1 %v5835_v61 }
 0x566   :  { %2364 = vmatpush1.bf16.msra.mxu1 %v5838_v30 }
 0x5fc   :  { %v1866_v3 = vpop.f32.mrb[104].mxu1 }
 0x5fd   :  { %v1868_v13 = vpop.f32.mrb[105].mxu1  ;;  %v1867_v16 = vadd.f32 %v1866_v3, %v1830_v22 }
 0x5fe   :  { %v1869_v42 = vadd.f32 %v1868_v13, %v1830_v22  ;;  %v1870_v46 = vpop.f32.mrb[106].mxu1 }
 0x5ff   :  { %v1871_v48 = vpop.f32.mrb[107].mxu1 }
 0x600   :  { %v1873_v51 = vadd.f32 %v1869_v42, %v1867_v16 }
 0x602   :  { %1874 = vadd.xlane.f32.xlu1 %v1873_v51 }
 0x61c   :  { %v2342_v26 = vpop.f32.mrb[108].mxu1 }
 0x61d   :  { %v2348_v11 = vpack.c.bf16 %v2342_v26, %v2342_v26  ;;  %v2566_v0 = vpop.f32.mrb[109].mxu1 }
 0x61e   :  { %v2345_v2 = vpop.f32.mrb[110].mxu1 }
 0x61f   :  { %2382 = vmatmul.mubr.bf16.vlgmr.msra.gmra.mrb[112].mxu1 %v2348_v11  ;;  %v2567_v31 = vpop.f32.mrb[111].mxu1 }
 0x68f   :  { %v1875_v56 = vpop.xlane.xlu1 %1874 }
 0x690   :  { %v1876_v4 = vrot.slane %v1875_v56, 4 }
 0x692   :  { %v1877_v19 = vadd.f32 %v1876_v4, %v1875_v56 }
 0x694   :  { %v1878_v24 = vrot.slane %v1877_v19, 2 }
 0x696   :  { %v1879_v9 = vadd.f32 %v1878_v24, %v1877_v19 }
 0x698   :  { %v1880_v23 = vrot.slane %v1879_v9, 1 }
 0x69a   :  { %v1881_v55 = vadd.f32 %v1880_v23, %v1879_v9 }
 0x69c   :  { %2570 = vpush %v1881_v55 }
 0x6cd   :  { %s2571_s15 = spop %2570 }
 0x6ce   :  { %s1883_s16 = smul.f32 0.00048828125, %s2571_s15 }
 0x6d0   :  { %v1884_v20 = vstv %s1883_s16 }
 0x6d1   :  { %v1885_v41 = vsub.f32 %v1867_v16, %v1884_v20  ;;  %v1886_v7 = vsub.f32 %v1869_v42, %v1884_v20 }
 0x6d3   :  { %v1887_v54 = vmul.f32 %v1885_v41, %v1885_v41  ;;  %v1888_v21 = vmul.f32 %v1886_v7, %v1886_v7 }
 0x6d5   :  { %v1889_v40 = vadd.f32 %v1888_v21, %v1887_v54 }
 0x6d7   :  { %1890 = vadd.xlane.f32.xlu1 %v1889_v40 }
 0x6f2   :  { %v2383_v38 = vpop.f32.mrb[112].mxu1 }
 0x6f3   :  { %v2384_v43 = vadd.f32 %v2383_v38, %v1830_v22  ;;  %v2385_v50 = vpop.f32.mrb[113].mxu1 }
 0x6f4   :  { %v2386_v14 = vadd.f32 %v2385_v50, %v1830_v22  ;;  %v2387_v10 = vpop.f32.mrb[114].mxu1 }
 0x6f5   :  { %v2388_v25 = vpop.f32.mrb[115].mxu1 }
 0x6f6   :  { %v2390_v32 = vadd.f32 %v2386_v14, %v2384_v43 }
 0x6f8   :  { %2391 = vadd.xlane.f32.xlu1 %v2390_v32 }
 0x764   :  { %v1891_v62 = vpop.xlane.xlu1 %1890 }
 0x765   :  { %v1892_v34 = vrot.slane %v1891_v62, 4 }
 0x767   :  { %v1893_v33 = vadd.f32 %v1892_v34, %v1891_v62 }
 0x769   :  { %v1894_v28 = vrot.slane %v1893_v33, 2 }
 0x76b   :  { %v1895_v27 = vadd.f32 %v1894_v28, %v1893_v33 }
 0x76d   :  { %v1896_v60 = vrot.slane %v1895_v27, 1 }
 0x76f   :  { %v1897_v35 = vadd.f32 %v1896_v60, %v1895_v27 }
 0x771   :  { %2572 = vpush %v1897_v35 }
 0x785   :  { %v2392_v52 = vpop.xlane.xlu1 %2391 }
 0x786   :  { %v2393_v53 = vrot.slane %v2392_v52, 4 }
 0x788   :  { %v2394_v29 = vadd.f32 %v2393_v53, %v2392_v52 }
 0x78a   :  { %v2395_v18 = vrot.slane %v2394_v29, 2 }
 0x78c   :  { %v2396_v1 = vadd.f32 %v2395_v18, %v2394_v29 }
 0x78e   :  { %v2397_v5 = vrot.slane %v2396_v1, 1 }
 0x790   :  { %v2398_v8 = vadd.f32 %v2397_v5, %v2396_v1 }
 0x7a2   :  { %s2573_s17 = spop %2572 }
 0x7a3   :  { %s1899_s18 = smul.f32 0.00048828125, %s2573_s17 }
 0x7a5   :  { %s1900_s19 = sadd.f32 1e-05, %s1899_s18 }
 0x7a7   :  { %v1901_v45 = vstv %s1900_s19 }
 0x7a8   :  { %2958 = vrsqrt.f32 %v1901_v45 }
 0x7b2   :  { %v2959_v47 = vpop.eup %2958 }
 0x7b3   :  { %2574 = vpush %v2959_v47 }
 0x7b4   :  { %2576 = vpush %v2398_v8 }
 0x7e4   :  { %s2575_s20 = spop %2574 }
 0x7e5   :  { %s2577_s21 = spop %2576  ;;  %v1904_v59 = vstv %s2575_s20 }
 0x7e6   :  { %s2400_s22 = smul.f32 0.00048828125, %s2577_s21  ;;  %v1905_v57 = vmul.f32 %v1904_v59, %v1885_v41  ;;  %v1906_v30 = vmul.f32 %v1904_v59, %v1886_v7 }
 0x7e8   :  { %v2401_v17 = vstv %s2400_s22 }
 0x7e9   :  { %v2402_v15 = vsub.f32 %v2384_v43, %v2401_v17  ;;  %v2403_v37 = vsub.f32 %v2386_v14, %v2401_v17 }
 0x7eb   :  { %v2404_v44 = vmul.f32 %v2402_v15, %v2402_v15  ;;  %v2405_v6 = vmul.f32 %v2403_v37, %v2403_v37 }
 0x7ed   :  { %v2406_v39 = vadd.f32 %v2405_v6, %v2404_v44 }
 0x7ef   :  { %2407 = vadd.xlane.f32.xlu1 %v2406_v39 }
 0x800   :  { %1909 = vperm.xlu1 %2590, %v1351_v12  }
 0x804   :  { %1916 = vperm.xlu1 %2590, %v1352_v58  }
 0x87c   :  { %v2408_v36 = vpop.xlane.xlu1 %2407 }
 0x87d   :  { %v2409_v49 = vrot.slane %v2408_v36, 4 }
 0x87f   :  { %v2410_v61 = vadd.f32 %v2409_v49, %v2408_v36 }
 0x880   :  { %v1910_v63 = vpop.permute.xlu1 %1909 }
 0x881   :  { %v2411_v22 = vrot.slane %v2410_v61, 2  ;;  %v1912_v3 = vmul.f32 %v1910_v63, %v1905_v57  ;;  %v1913_v13 = vmul.f32 %v1910_v63, %v1906_v30 }
 0x883   :  { %v2412_v16 = vadd.f32 %v2411_v22, %v2410_v61 }
 0x884   :  { %v1917_v42 = vpop.permute.xlu1 %1916 }
 0x885   :  { %v1919_v46 = vadd.f32 %v1917_v42, %v1912_v3  ;;  %v1920_v48 = vadd.f32 %v1917_v42, %v1913_v13  ;;  %v2413_v51 = vrot.slane %v2412_v16, 1 }
 0x887   :  { %1921 = vst [vmem:[#allocation5] sm:$0xff] %v1919_v46  ;;  %1922 = vst [vmem:[#allocation5 + $0x8] sm:$0xff] %v1920_v48  ;;  %v2414_v26 = vadd.f32 %v2413_v51, %v2412_v16 }
 0x889   :  { %2578 = vpush %v2414_v26 }
 0x8ba   :  { %s2579_s4 = spop %2578 }
 0x8bb   :  { %s2416_s27 = smul.f32 0.00048828125, %s2579_s4 }
 0x8bd   :  { %s2417_s28 = sadd.f32 1e-05, %s2416_s27 }
 0x8bf   :  { %v2418_v11 = vstv %s2417_s28 }
 0x8c0   :  { %2960 = vrsqrt.f32 %v2418_v11 }
 0x8ca   :  { %v2961_v0 = vpop.eup %2960 }
 0x8cb   :  { %2580 = vpush %v2961_v0 }
 0x8fc   :  { %s2581_s29 = spop %2580 }
 0x8fd   :  { %v2421_v2 = vstv %s2581_s29 }
 0x8fe   :  { %v2422_v31 = vmul.f32 %v2421_v2, %v2402_v15  ;;  %v2423_v56 = vmul.f32 %v2421_v2, %v2403_v37 }
 0x900   :  { %v2424_v4 = vmul.f32 %v2422_v31, %v1910_v63  ;;  %v2425_v19 = vmul.f32 %v2423_v56, %v1910_v63 }
 0x902   :  { %v2426_v24 = vadd.f32 %v2424_v4, %v1917_v42  ;;  %v2427_v9 = vadd.f32 %v2425_v19, %v1917_v42 }
 0x904   :  { %2428 = vst [vmem:[#allocation5 + $0x10] sm:$0xff] %v2426_v24  ;;  %2429 = vst [vmem:[#allocation5 + $0x18] sm:$0xff] %v2427_v9 }
 0x905   :  { %2995 = shalt.err (!%p2992_p12)
}
 0x906   :  { %s2996_s10 = scalar_lea.hbm %s5003_s5, 512 }
 0x907   :  { %p2997_p13 = scmp.ne.s32.totalorder %s5003_s5, %s2996_s10  ;;  %p3000_p0 = scmp.lt.u32.totalorder %s2996_s10, %s5003_s5 }
 0x909   :  { %p3002_p1 = pnand %p3000_p0, %p2997_p13 }
 0x90b   :  { %3005 = shalt.err (!%p3002_p1)
}
 0x90c   :  { %2439 = dma.vmem_to_hbm [thread:$0]  %s2437_s6, 512, %s5003_s5, [#allocation4]  }
 0x90d   :  { %3008 = dma.done.wait [#allocation4], 512  }
 0x90e   :  { %3009 = vsyncadd [#allocation4], 4294966784 }
 0x90f   :  { %2443 = vsyncpa [#allocation3], 1 }
 0x910   :  { %2444 = vsyncpa [#allocation4], 1 }

</bundles_post_ra>
